<compile_context>
chip_gen: v7x
topology: tpu7x:2x2x1
jax: 0.10.0
libtpu: 0.0.40
codegen_flags: <defaults>
</compile_context>

<pallas_src>
import functools
import math

import jax
import jax.numpy as jnp
from jax import lax
from jax.experimental import pallas as pl
from jax.experimental.pallas import tpu as pltpu

BN_EPS = 1e-5
NEG_SLOPE = 0.2


def conv_block_2d(x_nchw, weight, gamma, beta, *, kernel_size, padding,
                  block_rows=1024):
    """Forward pass of ConvBlock2d.

    x_nchw : (N, Cin, H, W)    float32
    weight : (Cout, Cin, K, K) float32 (PyTorch conv weight layout, no bias)
    gamma, beta : (Cout,)      float32 (BatchNorm affine params)
    returns (N, Cout, H_out, W_out) with H_out = H + 1 + 2*padding - K + 1
    """
    N, Cin, H, W = x_nchw.shape
    Cout = weight.shape[0]
    K = kernel_size

    # --- glue: F.pad(x,(0,1,0,1)) merged with the conv's symmetric padding ----
    x_nhwc = jnp.transpose(x_nchw, (0, 2, 3, 1))
    xp = jnp.pad(x_nhwc, ((0, 0), (padding, padding + 1),
                          (padding, padding + 1), (0, 0)))
    Hp = H + 2 * padding + 1
    Wp = W + 2 * padding + 1
    Ho = Hp - K + 1
    Wo = Wp - K + 1
    M = N * Ho * Wo                       # true element count for BN stats

    # --- tiling ----------------------------------------------------------------
    # TH image rows per tile; TH*Wp flat rows must be a multiple of 8.
    step = 8 // math.gcd(Wp, 8)
    max_th = max(step, (max(1, block_rows // Wp) // step) * step)
    th_cover = step * pl.cdiv(Ho, step)   # smallest TH covering the image
    TH = min(max_th, th_cover)
    num_h = pl.cdiv(Ho, TH)
    Ho_pad = num_h * TH
    TM = TH * Wp                          # output flat rows per tile (mult of 8)
    TIN = (TH + K - 1) * Wp + (K - 1)     # input flat rows per tile (with halo)
    TIN = ((TIN + 7) // 8) * 8
    COUT_PAD = ((Cout + 127) // 128) * 128

    # --- glue: overlapping flat-spatial input tiles (only the K-1 row halo is
    # duplicated; padded rows are zeros so padded outputs are exactly 0) -------
    L_need = (num_h - 1) * TH * Wp + TIN
    x_flat = xp.reshape(N, Hp * Wp, Cin)
    x_flat = jnp.pad(x_flat, ((0, 0), (0, L_need - Hp * Wp), (0, 0)))
    x_tiles = jnp.stack(
        [x_flat[:, t * TH * Wp: t * TH * Wp + TIN, :] for t in range(num_h)],
        axis=1).astype(jnp.bfloat16)                      # (N, num_h, TIN, Cin)

    # Weight as (K*K, Cin, COUT_PAD) bf16; row (dy*K+dx) is the (dy,dx) tap.
    w_r = jnp.transpose(weight, (2, 3, 1, 0)).reshape(K * K, Cin, Cout)
    w_r = jnp.pad(w_r, ((0, 0), (0, 0),
                        (0, COUT_PAD - Cout))).astype(jnp.bfloat16)

    # Mask of valid output columns (flat col % Wp < Wo): kills the wrap-around
    # garbage columns so BN statistics and the stored conv stay exact.
    mask = (jnp.arange(TM) % Wp < Wo).astype(jnp.float32).reshape(TM, 1)

    gamma_p = jnp.pad(gamma.astype(jnp.float32), (0, COUT_PAD - Cout))
    beta_p = jnp.pad(beta.astype(jnp.float32), (0, COUT_PAD - Cout))

    cparams1 = pltpu.CompilerParams(
        dimension_semantics=("parallel", "parallel"),
        vmem_limit_bytes=48 * 1024 * 1024,    # within v7x's 64 MiB/core VMEM
    )
    cparams2 = pltpu.CompilerParams(
        dimension_semantics=("parallel",),
        vmem_limit_bytes=48 * 1024 * 1024,
    )

    # --- pass 1: in-kernel im2col conv (K*K MXU taps) + partial BN stats ------
    def conv_stats_kernel(x_ref, w_ref, msk_ref, conv_ref, stat_ref):
        acc = jnp.zeros((TM, COUT_PAD), jnp.float32)
        for dy in range(K):
            for dx in range(K):
                lhs = x_ref[pl.ds(dy * Wp + dx, TM), :]         # (TM, Cin) bf16
                acc = acc + jnp.dot(lhs, w_ref[dy * K + dx],
                                    preferred_element_type=jnp.float32)
        acc = acc * msk_ref[...]                   # zero wrap-around columns
        conv_ref[...] = acc.astype(jnp.bfloat16)   # bf16 intermediate
        stat_ref[0:1, :] = jnp.sum(acc, axis=0, keepdims=True)
        stat_ref[1:2, :] = jnp.sum(acc * acc, axis=0, keepdims=True)

    num_tiles = N * num_h
    conv_pad, stats = pl.pallas_call(
        conv_stats_kernel,
        grid=(N, num_h),
        in_specs=[
            pl.BlockSpec((None, None, TIN, Cin), lambda n, t: (n, t, 0, 0)),
            pl.BlockSpec((K * K, Cin, COUT_PAD), lambda n, t: (0, 0, 0)),
            pl.BlockSpec((TM, 1), lambda n, t: (0, 0)),
        ],
        out_specs=(
            pl.BlockSpec((TM, COUT_PAD), lambda n, t: (n * num_h + t, 0)),
            pl.BlockSpec((None, 2, COUT_PAD),
                         lambda n, t: (n * num_h + t, 0, 0)),
        ),
        out_shape=(
            jax.ShapeDtypeStruct((num_tiles * TM, COUT_PAD), jnp.bfloat16),
            jax.ShapeDtypeStruct((num_tiles, 2, COUT_PAD), jnp.float32),
        ),
        compiler_params=cparams1,
        cost_estimate=pl.CostEstimate(
            flops=2 * num_tiles * TM * Cin * K * K * COUT_PAD,
            transcendentals=0,
            bytes_accessed=(x_tiles.size * 2 + w_r.size * 2
                            + num_tiles * TM * COUT_PAD * 2
                            + num_tiles * 2 * COUT_PAD * 4),
        ),
    )(x_tiles, w_r, mask)

    # --- glue: reduce tiny partials, build fused BN affine (scale, shift) -----
    # TODO(synk): E[x^2]-E[x]^2 in f32 with a clamp; switch to a shifted /
    # compensated reduction if BN-stat precision ever matters at large M.
    inv_m = 1.0 / float(M)
    mean = jnp.sum(stats[:, 0, :], axis=0) * inv_m
    var = jnp.maximum(jnp.sum(stats[:, 1, :], axis=0) * inv_m - mean * mean, 0.0)
    inv_std = lax.rsqrt(var + BN_EPS)      # biased var = PyTorch training BN
    scale = (gamma_p * inv_std).reshape(1, COUT_PAD)
    shift = (beta_p - mean * gamma_p * inv_std).reshape(1, COUT_PAD)

    # --- pass 2: y = conv*scale + shift, LeakyReLU(0.2); lane-dense f32 out ---
    def bn_act_kernel(conv_ref, scale_ref, shift_ref, out_ref):
        y = conv_ref[...].astype(jnp.float32) * scale_ref[...] + shift_ref[...]
        out_ref[...] = jnp.where(y >= 0.0, y, NEG_SLOPE * y)

    out_pad = pl.pallas_call(
        bn_act_kernel,
        grid=(num_tiles,),
        in_specs=[
            pl.BlockSpec((TM, COUT_PAD), lambda i: (i, 0)),
            pl.BlockSpec((1, COUT_PAD), lambda i: (0, 0)),
            pl.BlockSpec((1, COUT_PAD), lambda i: (0, 0)),
        ],
        out_specs=pl.BlockSpec((TM, COUT_PAD), lambda i: (i, 0)),
        out_shape=jax.ShapeDtypeStruct((num_tiles * TM, COUT_PAD), jnp.float32),
        compiler_params=cparams2,
        cost_estimate=pl.CostEstimate(
            flops=3 * num_tiles * TM * COUT_PAD,
            transcendentals=0,
            bytes_accessed=num_tiles * TM * COUT_PAD * 6 + 2 * COUT_PAD * 4),
    )(conv_pad, scale, shift)

    # --- glue: strip row/col/channel padding, back to NCHW --------------------
    out = out_pad.reshape(N, Ho_pad, Wp, COUT_PAD)[:, :Ho, :Wo, :Cout]
    # TODO(synk): return NHWC directly when the consumer allows it; this
    # transpose costs one extra output-sized HBM round trip (kept for NCHW
    # parity with the PyTorch module).
    return jnp.transpose(out, (0, 3, 1, 2))


def _reference(x_nchw, weight, gamma, beta, *, kernel_size, padding):
    """Pure-JAX f32 reference matching the PyTorch forward."""
    xp = jnp.pad(
        x_nchw,
        ((0, 0), (0, 0), (padding, padding + 1), (padding, padding + 1)),
    )
    conv = lax.conv_general_dilated(
        xp, weight, window_strides=(1, 1), padding="VALID",
        dimension_numbers=("NCHW", "OIHW", "NCHW"),
    )
    mean = jnp.mean(conv, axis=(0, 2, 3), keepdims=True)
    var = jnp.mean((conv - mean) ** 2, axis=(0, 2, 3), keepdims=True)
    y = (conv - mean) * lax.rsqrt(var + BN_EPS)
    y = y * gamma.reshape(1, -1, 1, 1) + beta.reshape(1, -1, 1, 1)
    return jnp.where(y >= 0.0, y, NEG_SLOPE * y)


if __name__ == "__main__":
    # Small shapes consistent with the module.
    N, Cin, H, W = 2, 4, 16, 16
    Cout, K, PAD = 8, 3, 1

    key = jax.random.PRNGKey(0)
    kx, kw, kg, kb = jax.random.split(key, 4)
    x = jax.random.normal(kx, (N, Cin, H, W), dtype=jnp.float32)
    # Deterministic synthetic conv weight (Conv2d has bias=False).
    weight = 0.1 * jax.random.normal(kw, (Cout, Cin, K, K), dtype=jnp.float32)
    # BatchNorm affine params (perturbed from default init to exercise the math).
    gamma = 1.0 + 0.1 * jax.random.normal(kg, (Cout,), dtype=jnp.float32)
    beta = 0.1 * jax.random.normal(kb, (Cout,), dtype=jnp.float32)

    fn = jax.jit(functools.partial(conv_block_2d, kernel_size=K, padding=PAD))
    out = jax.block_until_ready(fn(x, weight, gamma, beta))

    ref = _reference(x, weight, gamma, beta, kernel_size=K, padding=PAD)
    assert out.shape == (N, Cout, H + 1, W + 1), out.shape
    # Tolerance covers bf16 MXU operands + bf16 conv intermediate vs f32 ref.
    max_err = float(jnp.max(jnp.abs(out - ref)))
    assert jnp.allclose(out, ref, atol=3e-2, rtol=3e-2), max_err
    print("KERNEL_OK")
</pallas_src>

<mosaic_0001>
module attributes {stable_mosaic.version = 11 : i64} {
  func.func @bn_act_kernel(%arg0: i32, %arg1: memref<456x128xbf16, #tpu.memory_space<vmem>>, %arg2: memref<1x128xf32, #tpu.memory_space<vmem>>, %arg3: memref<1x128xf32, #tpu.memory_space<vmem>>, %arg4: memref<456x128xf32, #tpu.memory_space<vmem>>) attributes {dimension_semantics = [#tpu.dimension_semantics<parallel>], iteration_bounds = array<i64: 2>, scalar_prefetch = 0 : i64, scratch_operands = 0 : i64, tpu.core_type = #tpu.core_type<tc>, window_params = [{transform_indices = @transform_0, window_bounds = array<i64: 456, 128>}, {pipeline_mode = #tpu.pipeline_mode<synchronous>, transform_indices = @transform_1, window_bounds = array<i64: 1, 128>}, {pipeline_mode = #tpu.pipeline_mode<synchronous>, transform_indices = @transform_2, window_bounds = array<i64: 1, 128>}, {transform_indices = @transform_3, window_bounds = array<i64: 456, 128>}]} {
    %c0 = arith.constant 0 : index
    %c0_0 = arith.constant 0 : index
    %0 = vector.load %arg1[%c0, %c0_0] : memref<456x128xbf16, #tpu.memory_space<vmem>>, vector<456x128xbf16>
    %1 = arith.extf %0 : vector<456x128xbf16> to vector<456x128xf32>
    %c0_1 = arith.constant 0 : index
    %c0_2 = arith.constant 0 : index
    %2 = vector.load %arg2[%c0_1, %c0_2] : memref<1x128xf32, #tpu.memory_space<vmem>>, vector<1x128xf32>
    %3 = vector.broadcast %2 : vector<1x128xf32> to vector<456x128xf32>
    %4 = arith.mulf %1, %3 : vector<456x128xf32>
    %c0_3 = arith.constant 0 : index
    %c0_4 = arith.constant 0 : index
    %5 = vector.load %arg3[%c0_3, %c0_4] : memref<1x128xf32, #tpu.memory_space<vmem>>, vector<1x128xf32>
    %6 = vector.broadcast %5 : vector<1x128xf32> to vector<456x128xf32>
    %7 = arith.addf %4, %6 : vector<456x128xf32>
    %cst = arith.constant 0.000000e+00 : f32
    %8 = vector.broadcast %cst : f32 to vector<456x128xf32>
    %9 = arith.cmpf oge, %7, %8 : vector<456x128xf32>
    %cst_5 = arith.constant 2.000000e-01 : f32
    %10 = vector.broadcast %cst_5 : f32 to vector<456x128xf32>
    %11 = arith.mulf %10, %7 : vector<456x128xf32>
    %12 = arith.select %9, %7, %11 : vector<456x128xi1>, vector<456x128xf32>
    %c0_6 = arith.constant 0 : index
    %c0_7 = arith.constant 0 : index
    %13 = vector.load %arg4[%c0_6, %c0_7] : memref<456x128xf32, #tpu.memory_space<vmem>>, vector<456x128xf32>
    tpu.vector_store %arg4[%c0_6, %c0_7], %12 {strides = array<i32>} : memref<456x128xf32, #tpu.memory_space<vmem>>, vector<456x128xf32>,
    return
  }
  func.func @transform_0(%arg0: i32) -> (i32, i32) {
    %c0_i32 = arith.constant 0 : i32
    %c0_i32_0 = arith.constant 0 : i32
    return %arg0, %c0_i32 : i32, i32
  }
  func.func @transform_1(%arg0: i32) -> (i32, i32) {
    %c0_i32 = arith.constant 0 : i32
    %c0_i32_0 = arith.constant 0 : i32
    %c0_i32_1 = arith.constant 0 : i32
    return %c0_i32, %c0_i32_0 : i32, i32
  }
  func.func @transform_2(%arg0: i32) -> (i32, i32) {
    %c0_i32 = arith.constant 0 : i32
    %c0_i32_0 = arith.constant 0 : i32
    %c0_i32_1 = arith.constant 0 : i32
    return %c0_i32, %c0_i32_0 : i32, i32
  }
  func.func @transform_3(%arg0: i32) -> (i32, i32) {
    %c0_i32 = arith.constant 0 : i32
    %c0_i32_0 = arith.constant 0 : i32
    return %arg0, %c0_i32 : i32, i32
  }
}

module attributes {stable_mosaic.version = 11 : i64} {
  func.func @conv_stats_kernel(%arg0: i32, %arg1: i32, %arg2: memref<1x1x496x4xbf16, #tpu.memory_space<vmem>>, %arg3: memref<9x4x128xbf16, #tpu.memory_space<vmem>>, %arg4: memref<456x1xf32, #tpu.memory_space<vmem>>, %arg5: memref<456x128xbf16, #tpu.memory_space<vmem>>, %arg6: memref<1x2x128xf32, #tpu.memory_space<vmem>>) attributes {dimension_semantics = [#tpu.dimension_semantics<parallel>, #tpu.dimension_semantics<parallel>], iteration_bounds = array<i64: 2, 1>, scalar_prefetch = 0 : i64, scratch_operands = 0 : i64, tpu.core_type = #tpu.core_type<tc>, window_params = [{transform_indices = @transform_0, window_bounds = array<i64: 1, 1, 496, 4>}, {pipeline_mode = #tpu.pipeline_mode<synchronous>, transform_indices = @transform_1, window_bounds = array<i64: 9, 4, 128>}, {pipeline_mode = #tpu.pipeline_mode<synchronous>, transform_indices = @transform_2, window_bounds = array<i64: 456, 1>}, {transform_indices = @transform_3, window_bounds = array<i64: 456, 128>}, {transform_indices = @transform_4, window_bounds = array<i64: 1, 2, 128>}]} {
    %cst = arith.constant 0.000000e+00 : f32
    %0 = vector.broadcast %cst : f32 to vector<456x128xf32>
    %c0 = arith.constant 0 : index
    %c0_0 = arith.constant 0 : index
    %c0_1 = arith.constant 0 : index
    %c0_2 = arith.constant 0 : index
    %1 = vector.load %arg2[%c0, %c0_0, %c0_1, %c0_2] : memref<1x1x496x4xbf16, #tpu.memory_space<vmem>>, vector<1x1x456x4xbf16>
    %2 = vector.shape_cast %1 : vector<1x1x456x4xbf16> to vector<456x4xbf16>
    %c0_3 = arith.constant 0 : index
    %c0_4 = arith.constant 0 : index
    %c0_5 = arith.constant 0 : index
    %3 = vector.load %arg3[%c0_3, %c0_4, %c0_5] : memref<9x4x128xbf16, #tpu.memory_space<vmem>>, vector<1x4x128xbf16>
    %4 = vector.shape_cast %3 : vector<1x4x128xbf16> to vector<4x128xbf16>
    %cst_6 = arith.constant dense<0.000000e+00> : vector<456x128xf32>
    %5 = tpu.matmul %2, %4, %cst_6 {dimension_numbers = #tpu.dot_dimension_numbers<[1], [0], [0], [1], [0, 0, 1, 1], [], []>} : vector<456x4xbf16>, vector<4x128xbf16>, vector<456x128xf32> -> vector<456x128xf32>
    %6 = arith.addf %0, %5 : vector<456x128xf32>
    %c0_7 = arith.constant 0 : index
    %c0_8 = arith.constant 0 : index
    %c1 = arith.constant 1 : index
    %c0_9 = arith.constant 0 : index
    %7 = vector.load %arg2[%c0_7, %c0_8, %c1, %c0_9] : memref<1x1x496x4xbf16, #tpu.memory_space<vmem>>, vector<1x1x456x4xbf16>
    %8 = vector.shape_cast %7 : vector<1x1x456x4xbf16> to vector<456x4xbf16>
    %c1_10 = arith.constant 1 : index
    %c0_11 = arith.constant 0 : index
    %c0_12 = arith.constant 0 : index
    %9 = vector.load %arg3[%c1_10, %c0_11, %c0_12] : memref<9x4x128xbf16, #tpu.memory_space<vmem>>, vector<1x4x128xbf16>
    %10 = vector.shape_cast %9 : vector<1x4x128xbf16> to vector<4x128xbf16>
    %cst_13 = arith.constant dense<0.000000e+00> : vector<456x128xf32>
    %11 = tpu.matmul %8, %10, %cst_13 {dimension_numbers = #tpu.dot_dimension_numbers<[1], [0], [0], [1], [0, 0, 1, 1], [], []>} : vector<456x4xbf16>, vector<4x128xbf16>, vector<456x128xf32> -> vector<456x128xf32>
    %12 = arith.addf %6, %11 : vector<456x128xf32>
    %c0_14 = arith.constant 0 : index
    %c0_15 = arith.constant 0 : index
    %c2 = arith.constant 2 : index
    %c0_16 = arith.constant 0 : index
    %13 = vector.load %arg2[%c0_14, %c0_15, %c2, %c0_16] : memref<1x1x496x4xbf16, #tpu.memory_space<vmem>>, vector<1x1x456x4xbf16>
    %14 = vector.shape_cast %13 : vector<1x1x456x4xbf16> to vector<456x4xbf16>
    %c2_17 = arith.constant 2 : index
    %c0_18 = arith.constant 0 : index
    %c0_19 = arith.constant 0 : index
    %15 = vector.load %arg3[%c2_17, %c0_18, %c0_19] : memref<9x4x128xbf16, #tpu.memory_space<vmem>>, vector<1x4x128xbf16>
    %16 = vector.shape_cast %15 : vector<1x4x128xbf16> to vector<4x128xbf16>
    %cst_20 = arith.constant dense<0.000000e+00> : vector<456x128xf32>
    %17 = tpu.matmul %14, %16, %cst_20 {dimension_numbers = #tpu.dot_dimension_numbers<[1], [0], [0], [1], [0, 0, 1, 1], [], []>} : vector<456x4xbf16>, vector<4x128xbf16>, vector<456x128xf32> -> vector<456x128xf32>
    %18 = arith.addf %12, %17 : vector<456x128xf32>
    %c0_21 = arith.constant 0 : index
    %c0_22 = arith.constant 0 : index
    %c19 = arith.constant 19 : index
    %c0_23 = arith.constant 0 : index
    %19 = vector.load %arg2[%c0_21, %c0_22, %c19, %c0_23] : memref<1x1x496x4xbf16, #tpu.memory_space<vmem>>, vector<1x1x456x4xbf16>
    %20 = vector.shape_cast %19 : vector<1x1x456x4xbf16> to vector<456x4xbf16>
    %c3 = arith.constant 3 : index
    %c0_24 = arith.constant 0 : index
    %c0_25 = arith.constant 0 : index
    %21 = vector.load %arg3[%c3, %c0_24, %c0_25] : memref<9x4x128xbf16, #tpu.memory_space<vmem>>, vector<1x4x128xbf16>
    %22 = vector.shape_cast %21 : vector<1x4x128xbf16> to vector<4x128xbf16>
    %cst_26 = arith.constant dense<0.000000e+00> : vector<456x128xf32>
    %23 = tpu.matmul %20, %22, %cst_26 {dimension_numbers = #tpu.dot_dimension_numbers<[1], [0], [0], [1], [0, 0, 1, 1], [], []>} : vector<456x4xbf16>, vector<4x128xbf16>, vector<456x128xf32> -> vector<456x128xf32>
    %24 = arith.addf %18, %23 : vector<456x128xf32>
    %c0_27 = arith.constant 0 : index
    %c0_28 = arith.constant 0 : index
    %c20 = arith.constant 20 : index
    %c0_29 = arith.constant 0 : index
    %25 = vector.load %arg2[%c0_27, %c0_28, %c20, %c0_29] : memref<1x1x496x4xbf16, #tpu.memory_space<vmem>>, vector<1x1x456x4xbf16>
    %26 = vector.shape_cast %25 : vector<1x1x456x4xbf16> to vector<456x4xbf16>
    %c4 = arith.constant 4 : index
    %c0_30 = arith.constant 0 : index
    %c0_31 = arith.constant 0 : index
    %27 = vector.load %arg3[%c4, %c0_30, %c0_31] : memref<9x4x128xbf16, #tpu.memory_space<vmem>>, vector<1x4x128xbf16>
    %28 = vector.shape_cast %27 : vector<1x4x128xbf16> to vector<4x128xbf16>
    %cst_32 = arith.constant dense<0.000000e+00> : vector<456x128xf32>
    %29 = tpu.matmul %26, %28, %cst_32 {dimension_numbers = #tpu.dot_dimension_numbers<[1], [0], [0], [1], [0, 0, 1, 1], [], []>} : vector<456x4xbf16>, vector<4x128xbf16>, vector<456x128xf32> -> vector<456x128xf32>
    %30 = arith.addf %24, %29 : vector<456x128xf32>
    %c0_33 = arith.constant 0 : index
    %c0_34 = arith.constant 0 : index
    %c21 = arith.constant 21 : index
    %c0_35 = arith.constant 0 : index
    %31 = vector.load %arg2[%c0_33, %c0_34, %c21, %c0_35] : memref<1x1x496x4xbf16, #tpu.memory_space<vmem>>, vector<1x1x456x4xbf16>
    %32 = vector.shape_cast %31 : vector<1x1x456x4xbf16> to vector<456x4xbf16>
    %c5 = arith.constant 5 : index
    %c0_36 = arith.constant 0 : index
    %c0_37 = arith.constant 0 : index
    %33 = vector.load %arg3[%c5, %c0_36, %c0_37] : memref<9x4x128xbf16, #tpu.memory_space<vmem>>, vector<1x4x128xbf16>
    %34 = vector.shape_cast %33 : vector<1x4x128xbf16> to vector<4x128xbf16>
    %cst_38 = arith.constant dense<0.000000e+00> : vector<456x128xf32>
    %35 = tpu.matmul %32, %34, %cst_38 {dimension_numbers = #tpu.dot_dimension_numbers<[1], [0], [0], [1], [0, 0, 1, 1], [], []>} : vector<456x4xbf16>, vector<4x128xbf16>, vector<456x128xf32> -> vector<456x128xf32>
    %36 = arith.addf %30, %35 : vector<456x128xf32>
    %c0_39 = arith.constant 0 : index
    %c0_40 = arith.constant 0 : index
    %c38 = arith.constant 38 : index
    %c0_41 = arith.constant 0 : index
    %37 = vector.load %arg2[%c0_39, %c0_40, %c38, %c0_41] : memref<1x1x496x4xbf16, #tpu.memory_space<vmem>>, vector<1x1x456x4xbf16>
    %38 = vector.shape_cast %37 : vector<1x1x456x4xbf16> to vector<456x4xbf16>
    %c6 = arith.constant 6 : index
    %c0_42 = arith.constant 0 : index
    %c0_43 = arith.constant 0 : index
    %39 = vector.load %arg3[%c6, %c0_42, %c0_43] : memref<9x4x128xbf16, #tpu.memory_space<vmem>>, vector<1x4x128xbf16>
    %40 = vector.shape_cast %39 : vector<1x4x128xbf16> to vector<4x128xbf16>
    %cst_44 = arith.constant dense<0.000000e+00> : vector<456x128xf32>
    %41 = tpu.matmul %38, %40, %cst_44 {dimension_numbers = #tpu.dot_dimension_numbers<[1], [0], [0], [1], [0, 0, 1, 1], [], []>} : vector<456x4xbf16>, vector<4x128xbf16>, vector<456x128xf32> -> vector<456x128xf32>
    %42 = arith.addf %36, %41 : vector<456x128xf32>
    %c0_45 = arith.constant 0 : index
    %c0_46 = arith.constant 0 : index
    %c39 = arith.constant 39 : index
    %c0_47 = arith.constant 0 : index
    %43 = vector.load %arg2[%c0_45, %c0_46, %c39, %c0_47] : memref<1x1x496x4xbf16, #tpu.memory_space<vmem>>, vector<1x1x456x4xbf16>
    %44 = vector.shape_cast %43 : vector<1x1x456x4xbf16> to vector<456x4xbf16>
    %c7 = arith.constant 7 : index
    %c0_48 = arith.constant 0 : index
    %c0_49 = arith.constant 0 : index
    %45 = vector.load %arg3[%c7, %c0_48, %c0_49] : memref<9x4x128xbf16, #tpu.memory_space<vmem>>, vector<1x4x128xbf16>
    %46 = vector.shape_cast %45 : vector<1x4x128xbf16> to vector<4x128xbf16>
    %cst_50 = arith.constant dense<0.000000e+00> : vector<456x128xf32>
    %47 = tpu.matmul %44, %46, %cst_50 {dimension_numbers = #tpu.dot_dimension_numbers<[1], [0], [0], [1], [0, 0, 1, 1], [], []>} : vector<456x4xbf16>, vector<4x128xbf16>, vector<456x128xf32> -> vector<456x128xf32>
    %48 = arith.addf %42, %47 : vector<456x128xf32>
    %c0_51 = arith.constant 0 : index
    %c0_52 = arith.constant 0 : index
    %c40 = arith.constant 40 : index
    %c0_53 = arith.constant 0 : index
    %49 = vector.load %arg2[%c0_51, %c0_52, %c40, %c0_53] : memref<1x1x496x4xbf16, #tpu.memory_space<vmem>>, vector<1x1x456x4xbf16>
    %50 = vector.shape_cast %49 : vector<1x1x456x4xbf16> to vector<456x4xbf16>
    %c8 = arith.constant 8 : index
    %c0_54 = arith.constant 0 : index
    %c0_55 = arith.constant 0 : index
    %51 = vector.load %arg3[%c8, %c0_54, %c0_55] : memref<9x4x128xbf16, #tpu.memory_space<vmem>>, vector<1x4x128xbf16>
    %52 = vector.shape_cast %51 : vector<1x4x128xbf16> to vector<4x128xbf16>
    %cst_56 = arith.constant dense<0.000000e+00> : vector<456x128xf32>
    %53 = tpu.matmul %50, %52, %cst_56 {dimension_numbers = #tpu.dot_dimension_numbers<[1], [0], [0], [1], [0, 0, 1, 1], [], []>} : vector<456x4xbf16>, vector<4x128xbf16>, vector<456x128xf32> -> vector<456x128xf32>
    %54 = arith.addf %48, %53 : vector<456x128xf32>
    %c0_57 = arith.constant 0 : index
    %c0_58 = arith.constant 0 : index
    %55 = vector.load %arg4[%c0_57, %c0_58] : memref<456x1xf32, #tpu.memory_space<vmem>>, vector<456x1xf32>
    %56 = vector.broadcast %55 : vector<456x1xf32> to vector<456x128xf32>
    %57 = arith.mulf %54, %56 : vector<456x128xf32>
    %58 = arith.truncf %57 : vector<456x128xf32> to vector<456x128xbf16>
    %c0_59 = arith.constant 0 : index
    %c0_60 = arith.constant 0 : index
    %59 = vector.load %arg5[%c0_59, %c0_60] : memref<456x128xbf16, #tpu.memory_space<vmem>>, vector<456x128xbf16>
    tpu.vector_store %arg5[%c0_59, %c0_60], %58 {strides = array<i32>} : memref<456x128xbf16, #tpu.memory_space<vmem>>, vector<456x128xbf16>,
    %cst_61 = arith.constant dense<0.000000e+00> : vector<128xf32>
    %60 = vector.multi_reduction <add>, %57, %cst_61 [0] : vector<456x128xf32> to vector<128xf32>
    %61 = vector.shape_cast %60 : vector<128xf32> to vector<1x128xf32>
    %c0_62 = arith.constant 0 : index
    %c0_63 = arith.constant 0 : index
    %c0_64 = arith.constant 0 : index
    %62 = vector.load %arg6[%c0_62, %c0_63, %c0_64] : memref<1x2x128xf32, #tpu.memory_space<vmem>>, vector<1x1x128xf32>
    %63 = vector.shape_cast %62 : vector<1x1x128xf32> to vector<1x128xf32>
    %64 = vector.shape_cast %61 : vector<1x128xf32> to vector<1x1x128xf32>
    tpu.vector_store %arg6[%c0_62, %c0_63, %c0_64], %64 {strides = array<i32>} : memref<1x2x128xf32, #tpu.memory_space<vmem>>, vector<1x1x128xf32>,
    %65 = arith.mulf %57, %57 : vector<456x128xf32>
    %cst_65 = arith.constant dense<0.000000e+00> : vector<128xf32>
    %66 = vector.multi_reduction <add>, %65, %cst_65 [0] : vector<456x128xf32> to vector<128xf32>
    %67 = vector.shape_cast %66 : vector<128xf32> to vector<1x128xf32>
    %c0_66 = arith.constant 0 : index
    %c1_67 = arith.constant 1 : index
    %c0_68 = arith.constant 0 : index
    %68 = vector.load %arg6[%c0_66, %c1_67, %c0_68] : memref<1x2x128xf32, #tpu.memory_space<vmem>>, vector<1x1x128xf32>
    %69 = vector.shape_cast %68 : vector<1x1x128xf32> to vector<1x128xf32>
    %70 = vector.shape_cast %67 : vector<1x128xf32> to vector<1x1x128xf32>
    tpu.vector_store %arg6[%c0_66, %c1_67, %c0_68], %70 {strides = array<i32>} : memref<1x2x128xf32, #tpu.memory_space<vmem>>, vector<1x1x128xf32>,
    return
  }
  func.func @transform_0(%arg0: i32, %arg1: i32) -> (i32, i32, i32, i32) {
    %c0_i32 = arith.constant 0 : i32
    %c0_i32_0 = arith.constant 0 : i32
    %c0_i32_1 = arith.constant 0 : i32
    return %arg0, %arg1, %c0_i32, %c0_i32_0 : i32, i32, i32, i32
  }
  func.func @transform_1(%arg0: i32, %arg1: i32) -> (i32, i32, i32) {
    %c0_i32 = arith.constant 0 : i32
    %c0_i32_0 = arith.constant 0 : i32
    %c0_i32_1 = arith.constant 0 : i32
    %c0_i32_2 = arith.constant 0 : i32
    return %c0_i32, %c0_i32_0, %c0_i32_1 : i32, i32, i32
  }
  func.func @transform_2(%arg0: i32, %arg1: i32) -> (i32, i32) {
    %c0_i32 = arith.constant 0 : i32
    %c0_i32_0 = arith.constant 0 : i32
    %c0_i32_1 = arith.constant 0 : i32
    return %c0_i32, %c0_i32_0 : i32, i32
  }
  func.func @transform_3(%arg0: i32, %arg1: i32) -> (i32, i32) {
    %c1_i32 = arith.constant 1 : i32
    %0 = arith.muli %arg0, %c1_i32 : i32
    %1 = arith.addi %0, %arg1 : i32
    %c0_i32 = arith.constant 0 : i32
    %c0_i32_0 = arith.constant 0 : i32
    return %1, %c0_i32 : i32, i32
  }
  func.func @transform_4(%arg0: i32, %arg1: i32) -> (i32, i32, i32) {
    %c1_i32 = arith.constant 1 : i32
    %0 = arith.muli %arg0, %c1_i32 : i32
    %1 = arith.addi %0, %arg1 : i32
    %c0_i32 = arith.constant 0 : i32
    %c0_i32_0 = arith.constant 0 : i32
    %c0_i32_1 = arith.constant 0 : i32
    return %1, %c0_i32, %c0_i32_0 : i32, i32, i32
  }
}

</mosaic_0001>

<bundles_post_ra>
// kernel: conv_block_2d.3
= control target key start
LH: loop header
LB: loop body
LE: loop exit
PB: predicated region body
PF: predicated region fallthrough
CT: control target
= control target key end

     0   :  { %s886_s12 = smov 0   ;;  %s1121_s0 = inlined_call_operand.vmem [shape: bf16[912,128], index: 0, kind: input, shape index: {}]   ;;  %s1122_s1 = inlined_call_operand.vmem [shape: f32[1,128], index: 1, kind: input, shape index: {}]   ;;  %s1123_s2 = inlined_call_operand.vmem [shape: f32[1,128], index: 2, kind: input, shape index: {}]   ;;  %s1124_s3 = inlined_call_operand.vmem [shape: f32[912,128], index: 3, kind: output, shape index: {}]  }
   0x1 LB: > { %s700_s13 = sadd.s32 4294967295, %s864_s12   ;;  %p704_p0 = scmp.ge.s32.totalorder %s864_s12, 1  ;;  %s864_s12 = sphi %s886_s12, %s13_s12  }
   0x2   : > { %p138_p1 = scmp.lt.s32.totalorder %s864_s12, 3 }
   0x4   : > { %p139_p2 = pnand %p704_p0, %p138_p1 }
   0x5   : > { %s162_s14 = smul.u32 (!%p139_p2), 57, %s700_s13  ;;  %v905_v0 = vld [vmem:[%s1122_s1] ss:$0 sm:$0xff] (!%p139_p2) }
   0x6   : > { %142 = sbr.rel (%p139_p2) target bundleno = 107 (0x6b), region = 32  ;;  %v914_v9 = vld [vmem:[%s1123_s2] ss:$0 sm:$0xff] (!%p139_p2) }
   0x7   : > { %p163_p3 = scmp.lt.s32.totalorder (!%p139_p2), %s162_s14, 113 }
   0xd   : > { %s1126_s14 = smov (!%p163_p3, %s162_s14), 113 }
   0xe   : > { %s705_s15 = sshll.u32 %s1126_s14, 2  ;;  %s706_s23 = sshll.u32 %s1126_s14, 3 }
   0xf   : > { %s900_s18 = scalar_lea.vmem %s1121_s0, %s705_s15  ;;  %s936_s26 = scalar_lea.vmem %s1124_s3, %s706_s23 }
  0x10   : > { %v712_v1 = vld [vmem:[%s900_s18] sm:$0xff]   ;;  %v823_v2 = vld [vmem:[%s900_s18 + $0x8] sm:$0xff]   ;;  %v824_v3 = vld [vmem:[%s900_s18 + $0x10] sm:$0xff]  }
  0x11   : > { %v713_v4 = vunpack.c.l.bf16 %v712_v1  ;;  %v714_v5 = vunpack.c.h.bf16 %v712_v1  ;;  %v717_v6 = vunpack.c.l.bf16 %v823_v2  ;;  %v718_v7 = vunpack.c.h.bf16 %v823_v2  ;;  %v825_v8 = vld [vmem:[%s900_s18 + $0x18] sm:$0xff]   ;;  %v826_v37 = vld [vmem:[%s900_s18 + $0x20] sm:$0xff]   ;;  %v827_v41 = vld [vmem:[%s900_s18 + $0x28] sm:$0xff]  }
  0x12   : > { %v721_v10 = vunpack.c.l.bf16 %v824_v3  ;;  %v722_v11 = vunpack.c.h.bf16 %v824_v3  ;;  %v725_v12 = vunpack.c.l.bf16 %v825_v8  ;;  %v726_v13 = vunpack.c.h.bf16 %v825_v8  ;;  %v828_v42 = vld [vmem:[%s900_s18 + $0x30] sm:$0xff]   ;;  %v829_v49 = vld [vmem:[%s900_s18 + $0x38] sm:$0xff]  }
  0x13   : > { %v295_v14 = vmul.f32 %v713_v4, %v905_v0  ;;  %v296_v15 = vmul.f32 %v714_v5, %v905_v0  ;;  %v297_v16 = vmul.f32 %v717_v6, %v905_v0  ;;  %v298_v17 = vmul.f32 %v718_v7, %v905_v0  ;;  %v830_v7 = vld [vmem:[%s900_s18 + $0x40] sm:$0xff]  }
  0x14   : > { %v299_v18 = vmul.f32 %v721_v10, %v905_v0  ;;  %v300_v19 = vmul.f32 %v722_v11, %v905_v0  ;;  %v301_v20 = vmul.f32 %v725_v12, %v905_v0  ;;  %v302_v21 = vmul.f32 %v726_v13, %v905_v0 }
  0x15   : > { %v359_v22 = vadd.f32 %v914_v9, %v295_v14  ;;  %v360_v23 = vadd.f32 %v914_v9, %v296_v15  ;;  %v361_v24 = vadd.f32 %v914_v9, %v297_v16  ;;  %v362_v25 = vadd.f32 %v914_v9, %v298_v17 }
  0x16   : > { %v363_v26 = vadd.f32 %v914_v9, %v299_v18  ;;  %v364_v27 = vadd.f32 %v914_v9, %v300_v19  ;;  %v365_v28 = vadd.f32 %v914_v9, %v301_v20  ;;  %v366_v29 = vadd.f32 %v914_v9, %v302_v21  ;;  %v831_v20 = vld [vmem:[%s900_s18 + $0x48] sm:$0xff]  }
  0x17   : > { %vm416_vm0 = vcmp.ge.f32.partialorder %v359_v22, 0.0  ;;  %v473_v30 = vmul.f32 0.2, %v359_v22  ;;  %vm417_vm1 = vcmp.ge.f32.partialorder %v360_v23, 0.0  ;;  %v474_v31 = vmul.f32 0.2, %v360_v23 }
  0x18   : > { %vm418_vm2 = vcmp.ge.f32.partialorder %v361_v24, 0.0  ;;  %v475_v32 = vmul.f32 0.2, %v361_v24  ;;  %vm419_vm3 = vcmp.ge.f32.partialorder %v362_v25, 0.0  ;;  %v476_v33 = vmul.f32 0.2, %v362_v25 }
  0x19   : > { %v530_v34 = vsel %vm416_vm0, %v359_v22, %v473_v30  ;;  %v531_v35 = vsel %vm417_vm1, %v360_v23, %v474_v31  ;;  %vm420_vm4 = vcmp.ge.f32.partialorder %v363_v26, 0.0  ;;  %v477_v36 = vmul.f32 0.2, %v363_v26 }
  0x1a   : > { %587 = vst [vmem:[%s936_s26] sm:$0xff] %v530_v34  ;;  %588 = vst [vmem:[%s936_s26 + $0x8] sm:$0xff] %v531_v35  ;;  %v532_v38 = vsel %vm418_vm2, %v361_v24, %v475_v32  ;;  %v533_v39 = vsel %vm419_vm3, %v362_v25, %v476_v33  ;;  %vm421_vm5 = vcmp.ge.f32.partialorder %v364_v27, 0.0  ;;  %v478_v40 = vmul.f32 0.2, %v364_v27  ;;  %v832_v25 = vld [vmem:[%s900_s18 + $0x50] sm:$0xff]  }
  0x1b   : > { %589 = vst [vmem:[%s936_s26 + $0x10] sm:$0xff] %v532_v38  ;;  %590 = vst [vmem:[%s936_s26 + $0x18] sm:$0xff] %v533_v39  ;;  %v534_v43 = vsel %vm420_vm4, %v363_v26, %v477_v36  ;;  %vm422_vm6 = vcmp.ge.f32.partialorder %v365_v28, 0.0  ;;  %v479_v44 = vmul.f32 0.2, %v365_v28  ;;  %vm423_vm7 = vcmp.ge.f32.partialorder %v366_v29, 0.0 }
  0x1c   : > { %591 = vst [vmem:[%s936_s26 + $0x20] sm:$0xff] %v534_v43  ;;  %v535_v45 = vsel %vm421_vm5, %v364_v27, %v478_v40  ;;  %v480_v46 = vmul.f32 0.2, %v366_v29  ;;  %v729_v47 = vunpack.c.l.bf16 %v826_v37  ;;  %v730_v48 = vunpack.c.h.bf16 %v826_v37  ;;  %v833_v43 = vld [vmem:[%s900_s18 + $0x58] sm:$0xff]  }
  0x1d   : > { %592 = vst [vmem:[%s936_s26 + $0x28] sm:$0xff] %v535_v45  ;;  %v536_v50 = vsel %vm422_vm6, %v365_v28, %v479_v44  ;;  %v733_v51 = vunpack.c.l.bf16 %v827_v41  ;;  %v734_v52 = vunpack.c.h.bf16 %v827_v41  ;;  %v737_v53 = vunpack.c.l.bf16 %v828_v42 }
  0x1e   : > { %593 = vst [vmem:[%s936_s26 + $0x30] sm:$0xff] %v536_v50  ;;  %v537_v54 = vsel %vm423_vm7, %v366_v29, %v480_v46  ;;  %v303_v55 = vmul.f32 %v729_v47, %v905_v0  ;;  %v304_v56 = vmul.f32 %v730_v48, %v905_v0  ;;  %v738_v57 = vunpack.c.h.bf16 %v828_v42 }
  0x1f   : > { %594 = vst [vmem:[%s936_s26 + $0x38] sm:$0xff] %v537_v54  ;;  %v305_v58 = vmul.f32 %v733_v51, %v905_v0  ;;  %v306_v59 = vmul.f32 %v734_v52, %v905_v0  ;;  %v307_v60 = vmul.f32 %v737_v53, %v905_v0  ;;  %v741_v61 = vunpack.c.l.bf16 %v829_v49  ;;  %v834_v54 = vld [vmem:[%s900_s18 + $0x60] sm:$0xff]  }
  0x20   : > { %v367_v62 = vadd.f32 %v914_v9, %v303_v55  ;;  %v368_v63 = vadd.f32 %v914_v9, %v304_v56  ;;  %v308_v1 = vmul.f32 %v738_v57, %v905_v0  ;;  %v742_v2 = vunpack.c.h.bf16 %v829_v49 }
  0x21   : > { %v369_v3 = vadd.f32 %v914_v9, %v305_v58  ;;  %v370_v4 = vadd.f32 %v914_v9, %v306_v59  ;;  %v371_v5 = vadd.f32 %v914_v9, %v307_v60  ;;  %v309_v6 = vmul.f32 %v741_v61, %v905_v0 }
  0x22   : > { %vm424_vm8 = vcmp.ge.f32.partialorder %v367_v62, 0.0  ;;  %v481_v8 = vmul.f32 0.2, %v367_v62  ;;  %vm425_vm9 = vcmp.ge.f32.partialorder %v368_v63, 0.0  ;;  %v482_v10 = vmul.f32 0.2, %v368_v63 }
  0x23   : > { %vm426_vm10 = vcmp.ge.f32.partialorder %v369_v3, 0.0  ;;  %v483_v11 = vmul.f32 0.2, %v369_v3  ;;  %vm427_vm11 = vcmp.ge.f32.partialorder %v370_v4, 0.0  ;;  %v484_v12 = vmul.f32 0.2, %v370_v4 }
  0x24   : > { %v538_v13 = vsel %vm424_vm8, %v367_v62, %v481_v8  ;;  %v539_v14 = vsel %vm425_vm9, %v368_v63, %v482_v10  ;;  %vm428_vm12 = vcmp.ge.f32.partialorder %v371_v5, 0.0  ;;  %v485_v15 = vmul.f32 0.2, %v371_v5 }
  0x25   : > { %595 = vst [vmem:[%s936_s26 + $0x40] sm:$0xff] %v538_v13  ;;  %596 = vst [vmem:[%s936_s26 + $0x48] sm:$0xff] %v539_v14  ;;  %v540_v16 = vsel %vm426_vm10, %v369_v3, %v483_v11  ;;  %v541_v17 = vsel %vm427_vm11, %v370_v4, %v484_v12  ;;  %v372_v18 = vadd.f32 %v914_v9, %v308_v1  ;;  %v745_v23 = vunpack.c.l.bf16 %v830_v7  ;;  %v835_v1 = vld [vmem:[%s900_s18 + $0x68] sm:$0xff]  }
  0x26   : > { %v373_v19 = vadd.f32 %v914_v9, %v309_v6  ;;  %597 = vst [vmem:[%s936_s26 + $0x50] sm:$0xff] %v540_v16  ;;  %598 = vst [vmem:[%s936_s26 + $0x58] sm:$0xff] %v541_v17  ;;  %v542_v21 = vsel %vm428_vm12, %v371_v5, %v485_v15  ;;  %v310_v22 = vmul.f32 %v742_v2, %v905_v0  ;;  %v746_v24 = vunpack.c.h.bf16 %v830_v7  ;;  %v836_v2 = vld [vmem:[%s900_s18 + $0x70] sm:$0xff]  }
  0x27   : > { %599 = vst [vmem:[%s936_s26 + $0x60] sm:$0xff] %v542_v21  ;;  %vm429_vm13 = vcmp.ge.f32.partialorder %v372_v18, 0.0  ;;  %v486_v26 = vmul.f32 0.2, %v372_v18  ;;  %v311_v29 = vmul.f32 %v745_v23, %v905_v0  ;;  %v749_v31 = vunpack.c.l.bf16 %v831_v20  ;;  %v837_v21 = vld [vmem:[%s900_s18 + $0x78] sm:$0xff]  }
  0x28   : > { %vm430_vm14 = vcmp.ge.f32.partialorder %v373_v19, 0.0  ;;  %v487_v27 = vmul.f32 0.2, %v373_v19  ;;  %v374_v28 = vadd.f32 %v914_v9, %v310_v22  ;;  %v312_v30 = vmul.f32 %v746_v24, %v905_v0 }
  0x29   : > { %v543_v32 = vsel %vm429_vm13, %v372_v18, %v486_v26  ;;  %v750_v34 = vunpack.c.h.bf16 %v831_v20  ;;  %v753_v35 = vunpack.c.l.bf16 %v832_v25  ;;  %v375_v37 = vadd.f32 %v914_v9, %v311_v29 }
  0x2a   : > { %v544_v33 = vsel %vm430_vm14, %v373_v19, %v487_v27  ;;  %600 = vst [vmem:[%s936_s26 + $0x68] sm:$0xff] %v543_v32  ;;  %vm431_vm15 = vcmp.ge.f32.partialorder %v374_v28, 0.0  ;;  %v488_v36 = vmul.f32 0.2, %v374_v28  ;;  %v376_v38 = vadd.f32 %v914_v9, %v312_v30 }
  0x2b   : > { %601 = vst [vmem:[%s936_s26 + $0x70] sm:$0xff] %v544_v33  ;;  %v313_v39 = vmul.f32 %v749_v31, %v905_v0  ;;  %v314_v40 = vmul.f32 %v750_v34, %v905_v0  ;;  %v315_v41 = vmul.f32 %v753_v35, %v905_v0  ;;  %v754_v42 = vunpack.c.h.bf16 %v832_v25  ;;  %v838_v35 = vld [vmem:[%s900_s18 + $0x80] sm:$0xff]  }
  0x2c   : > { %v545_v44 = vsel %vm431_vm15, %v374_v28, %v488_v36  ;;  %vm432_vm0 = vcmp.ge.f32.partialorder %v375_v37, 0.0  ;;  %v489_v45 = vmul.f32 0.2, %v375_v37  ;;  %vm433_vm1 = vcmp.ge.f32.partialorder %v376_v38, 0.0 }
  0x2d   : > { %602 = vst [vmem:[%s936_s26 + $0x78] sm:$0xff] %v545_v44  ;;  %v490_v46 = vmul.f32 0.2, %v376_v38  ;;  %v377_v47 = vadd.f32 %v914_v9, %v313_v39  ;;  %v378_v48 = vadd.f32 %v914_v9, %v314_v40  ;;  %v379_v49 = vadd.f32 %v914_v9, %v315_v41 }
  0x2e   : > { %v546_v50 = vsel %vm432_vm0, %v375_v37, %v489_v45  ;;  %v316_v51 = vmul.f32 %v754_v42, %v905_v0  ;;  %v757_v52 = vunpack.c.l.bf16 %v833_v43  ;;  %v758_v53 = vunpack.c.h.bf16 %v833_v43  ;;  %v839_v42 = vld [vmem:[%s900_s18 + $0x88] sm:$0xff]  }
  0x2f   : > { %603 = vst [vmem:[%s936_s26 + $0x80] sm:$0xff] %v546_v50  ;;  %v547_v55 = vsel %vm433_vm1, %v376_v38, %v490_v46  ;;  %vm434_vm2 = vcmp.ge.f32.partialorder %v377_v47, 0.0  ;;  %v491_v56 = vmul.f32 0.2, %v377_v47  ;;  %vm435_vm3 = vcmp.ge.f32.partialorder %v378_v48, 0.0 }
  0x30   : > { %604 = vst [vmem:[%s936_s26 + $0x88] sm:$0xff] %v547_v55  ;;  %v492_v57 = vmul.f32 0.2, %v378_v48  ;;  %vm436_vm4 = vcmp.ge.f32.partialorder %v379_v49, 0.0  ;;  %v493_v58 = vmul.f32 0.2, %v379_v49  ;;  %v380_v59 = vadd.f32 %v914_v9, %v316_v51 }
  0x31   : > { %v548_v60 = vsel %vm434_vm2, %v377_v47, %v491_v56  ;;  %v317_v61 = vmul.f32 %v757_v52, %v905_v0  ;;  %v318_v62 = vmul.f32 %v758_v53, %v905_v0  ;;  %v761_v63 = vunpack.c.l.bf16 %v834_v54 }
  0x32   : > { %605 = vst [vmem:[%s936_s26 + $0x90] sm:$0xff] %v548_v60  ;;  %v549_v3 = vsel %vm435_vm3, %v378_v48, %v492_v57  ;;  %v550_v4 = vsel %vm436_vm4, %v379_v49, %v493_v58  ;;  %vm437_vm5 = vcmp.ge.f32.partialorder %v380_v59, 0.0  ;;  %v494_v5 = vmul.f32 0.2, %v380_v59 }
  0x33   : > { %606 = vst [vmem:[%s936_s26 + $0x98] sm:$0xff] %v549_v3  ;;  %607 = vst [vmem:[%s936_s26 + $0xa0] sm:$0xff] %v550_v4  ;;  %v381_v6 = vadd.f32 %v914_v9, %v317_v61  ;;  %v382_v7 = vadd.f32 %v914_v9, %v318_v62  ;;  %v319_v8 = vmul.f32 %v761_v63, %v905_v0  ;;  %v762_v10 = vunpack.c.h.bf16 %v834_v54  ;;  %v840_v54 = vld [vmem:[%s900_s18 + $0x90] sm:$0xff]   ;;  %v841_v3 = vld [vmem:[%s900_s18 + $0x98] sm:$0xff]  }
  0x34   : > { %v551_v11 = vsel %vm437_vm5, %v380_v59, %v494_v5  ;;  %v765_v12 = vunpack.c.l.bf16 %v835_v1  ;;  %v766_v13 = vunpack.c.h.bf16 %v835_v1  ;;  %v769_v14 = vunpack.c.l.bf16 %v836_v2 }
  0x35   : > { %608 = vst [vmem:[%s936_s26 + $0xa8] sm:$0xff] %v551_v11  ;;  %vm438_vm6 = vcmp.ge.f32.partialorder %v381_v6, 0.0  ;;  %v495_v15 = vmul.f32 0.2, %v381_v6  ;;  %vm439_vm7 = vcmp.ge.f32.partialorder %v382_v7, 0.0  ;;  %v383_v17 = vadd.f32 %v914_v9, %v319_v8 }
  0x36   : > { %v496_v16 = vmul.f32 0.2, %v382_v7  ;;  %v320_v18 = vmul.f32 %v762_v10, %v905_v0  ;;  %v321_v19 = vmul.f32 %v765_v12, %v905_v0  ;;  %v322_v20 = vmul.f32 %v766_v13, %v905_v0 }
  0x37   : > { %v552_v22 = vsel %vm438_vm6, %v381_v6, %v495_v15  ;;  %v323_v24 = vmul.f32 %v769_v14, %v905_v0  ;;  %v770_v25 = vunpack.c.h.bf16 %v836_v2  ;;  %vm440_vm8 = vcmp.ge.f32.partialorder %v383_v17, 0.0 }
  0x38   : > { %v553_v23 = vsel %vm439_vm7, %v382_v7, %v496_v16  ;;  %609 = vst [vmem:[%s936_s26 + $0xb0] sm:$0xff] %v552_v22  ;;  %v497_v26 = vmul.f32 0.2, %v383_v17  ;;  %v384_v27 = vadd.f32 %v914_v9, %v320_v18  ;;  %v385_v28 = vadd.f32 %v914_v9, %v321_v19 }
  0x39   : > { %610 = vst [vmem:[%s936_s26 + $0xb8] sm:$0xff] %v553_v23  ;;  %v386_v29 = vadd.f32 %v914_v9, %v322_v20  ;;  %v387_v30 = vadd.f32 %v914_v9, %v323_v24  ;;  %v324_v31 = vmul.f32 %v770_v25, %v905_v0  ;;  %v773_v32 = vunpack.c.l.bf16 %v837_v21  ;;  %v842_v20 = vld [vmem:[%s900_s18 + $0xa0] sm:$0xff]   ;;  %v843_v25 = vld [vmem:[%s900_s18 + $0xa8] sm:$0xff]  }
  0x3a   : > { %v554_v33 = vsel %vm440_vm8, %v383_v17, %v497_v26  ;;  %vm441_vm9 = vcmp.ge.f32.partialorder %v384_v27, 0.0  ;;  %v498_v34 = vmul.f32 0.2, %v384_v27  ;;  %vm442_vm10 = vcmp.ge.f32.partialorder %v385_v28, 0.0 }
  0x3b   : > { %611 = vst [vmem:[%s936_s26 + $0xc0] sm:$0xff] %v554_v33  ;;  %v499_v36 = vmul.f32 0.2, %v385_v28  ;;  %vm443_vm11 = vcmp.ge.f32.partialorder %v386_v29, 0.0  ;;  %v500_v37 = vmul.f32 0.2, %v386_v29  ;;  %v388_v40 = vadd.f32 %v914_v9, %v324_v31 }
  0x3c   : > { %vm444_vm12 = vcmp.ge.f32.partialorder %v387_v30, 0.0  ;;  %v555_v38 = vsel %vm441_vm9, %v384_v27, %v498_v34  ;;  %v501_v39 = vmul.f32 0.2, %v387_v30  ;;  %v325_v41 = vmul.f32 %v773_v32, %v905_v0 }
  0x3d   : > { %612 = vst [vmem:[%s936_s26 + $0xc8] sm:$0xff] %v555_v38  ;;  %v556_v43 = vsel %vm442_vm10, %v385_v28, %v499_v36  ;;  %v557_v44 = vsel %vm443_vm11, %v386_v29, %v500_v37  ;;  %v774_v45 = vunpack.c.h.bf16 %v837_v21  ;;  %v777_v46 = vunpack.c.l.bf16 %v838_v35  ;;  %v844_v36 = vld [vmem:[%s900_s18 + $0xb0] sm:$0xff]  }
  0x3e   : > { %613 = vst [vmem:[%s936_s26 + $0xd0] sm:$0xff] %v556_v43  ;;  %614 = vst [vmem:[%s936_s26 + $0xd8] sm:$0xff] %v557_v44  ;;  %v558_v47 = vsel %vm444_vm12, %v387_v30, %v501_v39  ;;  %vm445_vm13 = vcmp.ge.f32.partialorder %v388_v40, 0.0  ;;  %v502_v48 = vmul.f32 0.2, %v388_v40  ;;  %v389_v49 = vadd.f32 %v914_v9, %v325_v41  ;;  %v845_v44 = vld [vmem:[%s900_s18 + $0xb8] sm:$0xff]  }
  0x3f   : > { %615 = vst [vmem:[%s936_s26 + $0xe0] sm:$0xff] %v558_v47  ;;  %v326_v50 = vmul.f32 %v774_v45, %v905_v0  ;;  %v327_v51 = vmul.f32 %v777_v46, %v905_v0  ;;  %v778_v52 = vunpack.c.h.bf16 %v838_v35  ;;  %v781_v53 = vunpack.c.l.bf16 %v839_v42 }
  0x40   : > { %v559_v55 = vsel %vm445_vm13, %v388_v40, %v502_v48  ;;  %vm446_vm14 = vcmp.ge.f32.partialorder %v389_v49, 0.0  ;;  %v503_v56 = vmul.f32 0.2, %v389_v49  ;;  %v782_v57 = vunpack.c.h.bf16 %v839_v42 }
  0x41   : > { %616 = vst [vmem:[%s936_s26 + $0xe8] sm:$0xff] %v559_v55  ;;  %v390_v58 = vadd.f32 %v914_v9, %v326_v50  ;;  %v391_v59 = vadd.f32 %v914_v9, %v327_v51  ;;  %v328_v60 = vmul.f32 %v778_v52, %v905_v0  ;;  %v329_v61 = vmul.f32 %v781_v53, %v905_v0 }
  0x42   : > { %v560_v62 = vsel %vm446_vm14, %v389_v49, %v503_v56  ;;  %v330_v63 = vmul.f32 %v782_v57, %v905_v0  ;;  %v785_v1 = vunpack.c.l.bf16 %v840_v54  ;;  %v786_v2 = vunpack.c.h.bf16 %v840_v54  ;;  %v846_v56 = vld [vmem:[%s900_s18 + $0xc0] sm:$0xff]  }
  0x43   : > { %617 = vst [vmem:[%s936_s26 + $0xf0] sm:$0xff] %v560_v62  ;;  %vm447_vm15 = vcmp.ge.f32.partialorder %v390_v58, 0.0  ;;  %v504_v4 = vmul.f32 0.2, %v390_v58  ;;  %vm448_vm0 = vcmp.ge.f32.partialorder %v391_v59, 0.0  ;;  %v392_v6 = vadd.f32 %v914_v9, %v328_v60 }
  0x44   : > { %v505_v5 = vmul.f32 0.2, %v391_v59  ;;  %v393_v7 = vadd.f32 %v914_v9, %v329_v61  ;;  %v394_v8 = vadd.f32 %v914_v9, %v330_v63  ;;  %v331_v10 = vmul.f32 %v785_v1, %v905_v0 }
  0x45   : > { %v561_v11 = vsel %vm447_vm15, %v390_v58, %v504_v4  ;;  %v332_v13 = vmul.f32 %v786_v2, %v905_v0  ;;  %v789_v14 = vunpack.c.l.bf16 %v841_v3  ;;  %vm449_vm1 = vcmp.ge.f32.partialorder %v392_v6, 0.0  ;;  %v847_v2 = vld [vmem:[%s900_s18 + $0xc8] sm:$0xff]  }
  0x46   : > { %v562_v12 = vsel %vm448_vm0, %v391_v59, %v505_v5  ;;  %618 = vst [vmem:[%s936_s26 + $0xf8] sm:$0xff] %v561_v11  ;;  %v506_v15 = vmul.f32 0.2, %v392_v6  ;;  %vm450_vm2 = vcmp.ge.f32.partialorder %v393_v7, 0.0  ;;  %v507_v16 = vmul.f32 0.2, %v393_v7 }
  0x47   : > { %619 = vst [vmem:[%s936_s26 + $0x100] sm:$0xff] %v562_v12  ;;  %vm451_vm3 = vcmp.ge.f32.partialorder %v394_v8, 0.0  ;;  %v508_v17 = vmul.f32 0.2, %v394_v8  ;;  %v395_v18 = vadd.f32 %v914_v9, %v331_v10  ;;  %v396_v19 = vadd.f32 %v914_v9, %v332_v13 }
  0x48   : > { %v563_v21 = vsel %vm449_vm1, %v392_v6, %v506_v15  ;;  %v564_v22 = vsel %vm450_vm2, %v393_v7, %v507_v16  ;;  %v333_v23 = vmul.f32 %v789_v14, %v905_v0  ;;  %v790_v24 = vunpack.c.h.bf16 %v841_v3 }
  0x49   : > { %620 = vst [vmem:[%s936_s26 + $0x108] sm:$0xff] %v563_v21  ;;  %621 = vst [vmem:[%s936_s26 + $0x110] sm:$0xff] %v564_v22  ;;  %v565_v26 = vsel %vm451_vm3, %v394_v8, %v508_v17  ;;  %vm452_vm4 = vcmp.ge.f32.partialorder %v395_v18, 0.0  ;;  %v509_v27 = vmul.f32 0.2, %v395_v18  ;;  %vm453_vm5 = vcmp.ge.f32.partialorder %v396_v19, 0.0 }
  0x4a   : > { %622 = vst [vmem:[%s936_s26 + $0x118] sm:$0xff] %v565_v26  ;;  %v510_v28 = vmul.f32 0.2, %v396_v19  ;;  %v397_v29 = vadd.f32 %v914_v9, %v333_v23  ;;  %v334_v30 = vmul.f32 %v790_v24, %v905_v0  ;;  %v793_v31 = vunpack.c.l.bf16 %v842_v20 }
  0x4b   : > { %v566_v32 = vsel %vm452_vm4, %v395_v18, %v509_v27  ;;  %v794_v33 = vunpack.c.h.bf16 %v842_v20  ;;  %v797_v34 = vunpack.c.l.bf16 %v843_v25  ;;  %v798_v35 = vunpack.c.h.bf16 %v843_v25  ;;  %v848_v25 = vld [vmem:[%s900_s18 + $0xd0] sm:$0xff]  }
  0x4c   : > { %623 = vst [vmem:[%s936_s26 + $0x120] sm:$0xff] %v566_v32  ;;  %v567_v37 = vsel %vm453_vm5, %v396_v19, %v510_v28  ;;  %vm454_vm6 = vcmp.ge.f32.partialorder %v397_v29, 0.0  ;;  %v511_v38 = vmul.f32 0.2, %v397_v29  ;;  %v398_v39 = vadd.f32 %v914_v9, %v334_v30  ;;  %v849_v32 = vld [vmem:[%s900_s18 + $0xd8] sm:$0xff]  }
  0x4d   : > { %624 = vst [vmem:[%s936_s26 + $0x128] sm:$0xff] %v567_v37  ;;  %v335_v40 = vmul.f32 %v793_v31, %v905_v0  ;;  %v336_v41 = vmul.f32 %v794_v33, %v905_v0  ;;  %v337_v42 = vmul.f32 %v797_v34, %v905_v0  ;;  %v338_v43 = vmul.f32 %v798_v35, %v905_v0 }
  0x4e   : > { %v568_v45 = vsel %vm454_vm6, %v397_v29, %v511_v38  ;;  %vm455_vm7 = vcmp.ge.f32.partialorder %v398_v39, 0.0  ;;  %v512_v46 = vmul.f32 0.2, %v398_v39  ;;  %v801_v47 = vunpack.c.l.bf16 %v844_v36 }
  0x4f   : > { %625 = vst [vmem:[%s936_s26 + $0x130] sm:$0xff] %v568_v45  ;;  %v399_v48 = vadd.f32 %v914_v9, %v335_v40  ;;  %v400_v49 = vadd.f32 %v914_v9, %v336_v41  ;;  %v401_v50 = vadd.f32 %v914_v9, %v337_v42  ;;  %v402_v51 = vadd.f32 %v914_v9, %v338_v43 }
  0x50   : > { %v569_v52 = vsel %vm455_vm7, %v398_v39, %v512_v46  ;;  %v339_v53 = vmul.f32 %v801_v47, %v905_v0  ;;  %v802_v54 = vunpack.c.h.bf16 %v844_v36  ;;  %v805_v55 = vunpack.c.l.bf16 %v845_v44  ;;  %v230_v39 = vld [vmem:[%s900_s18 + $0xe0] sm:$0xf] }
  0x51   : > { %626 = vst [vmem:[%s936_s26 + $0x138] sm:$0xff] %v569_v52  ;;  %vm456_vm8 = vcmp.ge.f32.partialorder %v399_v48, 0.0  ;;  %v513_v57 = vmul.f32 0.2, %v399_v48  ;;  %vm457_vm9 = vcmp.ge.f32.partialorder %v400_v49, 0.0  ;;  %vm458_vm10 = vcmp.ge.f32.partialorder %v401_v50, 0.0 }
  0x52   : > { %v514_v58 = vmul.f32 0.2, %v400_v49  ;;  %v515_v59 = vmul.f32 0.2, %v401_v50  ;;  %vm459_vm11 = vcmp.ge.f32.partialorder %v402_v51, 0.0  ;;  %v403_v63 = vadd.f32 %v914_v9, %v339_v53 }
  0x53   : > { %v516_v60 = vmul.f32 0.2, %v402_v51  ;;  %v570_v61 = vsel %vm456_vm8, %v399_v48, %v513_v57  ;;  %v340_v1 = vmul.f32 %v802_v54, %v905_v0  ;;  %v341_v5 = vmul.f32 %v805_v55, %v905_v0 }
  0x54   : > { %v571_v62 = vsel %vm457_vm9, %v400_v49, %v514_v58  ;;  %627 = vst [vmem:[%s936_s26 + $0x140] sm:$0xff] %v570_v61  ;;  %v572_v3 = vsel %vm458_vm10, %v401_v50, %v515_v59  ;;  %v806_v6 = vunpack.c.h.bf16 %v845_v44  ;;  %vm460_vm12 = vcmp.ge.f32.partialorder %v403_v63, 0.0 }
  0x55   : > { %628 = vst [vmem:[%s936_s26 + $0x148] sm:$0xff] %v571_v62  ;;  %v573_v4 = vsel %vm459_vm11, %v402_v51, %v516_v60  ;;  %629 = vst [vmem:[%s936_s26 + $0x150] sm:$0xff] %v572_v3  ;;  %v517_v7 = vmul.f32 0.2, %v403_v63  ;;  %v404_v8 = vadd.f32 %v914_v9, %v340_v1  ;;  %v809_v10 = vunpack.c.l.bf16 %v846_v56 }
  0x56   : > { %630 = vst [vmem:[%s936_s26 + $0x158] sm:$0xff] %v573_v4  ;;  %v405_v11 = vadd.f32 %v914_v9, %v341_v5  ;;  %v342_v12 = vmul.f32 %v806_v6, %v905_v0  ;;  %v810_v13 = vunpack.c.h.bf16 %v846_v56  ;;  %v813_v14 = vunpack.c.l.bf16 %v847_v2 }
  0x57   : > { %v574_v15 = vsel %vm460_vm12, %v403_v63, %v517_v7  ;;  %vm461_vm13 = vcmp.ge.f32.partialorder %v404_v8, 0.0  ;;  %v518_v16 = vmul.f32 0.2, %v404_v8  ;;  %v343_v17 = vmul.f32 %v809_v10, %v905_v0 }
  0x58   : > { %631 = vst [vmem:[%s936_s26 + $0x160] sm:$0xff] %v574_v15  ;;  %vm462_vm14 = vcmp.ge.f32.partialorder %v405_v11, 0.0  ;;  %v519_v18 = vmul.f32 0.2, %v405_v11  ;;  %v406_v19 = vadd.f32 %v914_v9, %v342_v12  ;;  %v344_v20 = vmul.f32 %v810_v13, %v905_v0 }
  0x59   : > { %v575_v21 = vsel %vm461_vm13, %v404_v8, %v518_v16  ;;  %v407_v22 = vadd.f32 %v914_v9, %v343_v17  ;;  %v345_v23 = vmul.f32 %v813_v14, %v905_v0  ;;  %v814_v24 = vunpack.c.h.bf16 %v847_v2 }
  0x5a   : > { %632 = vst [vmem:[%s936_s26 + $0x168] sm:$0xff] %v575_v21  ;;  %v576_v26 = vsel %vm462_vm14, %v405_v11, %v519_v18  ;;  %vm463_vm15 = vcmp.ge.f32.partialorder %v406_v19, 0.0  ;;  %v520_v27 = vmul.f32 0.2, %v406_v19  ;;  %v408_v28 = vadd.f32 %v914_v9, %v344_v20 }
  0x5b   : > { %633 = vst [vmem:[%s936_s26 + $0x170] sm:$0xff] %v576_v26  ;;  %vm464_vm0 = vcmp.ge.f32.partialorder %v407_v22, 0.0  ;;  %v521_v29 = vmul.f32 0.2, %v407_v22  ;;  %v409_v30 = vadd.f32 %v914_v9, %v345_v23  ;;  %v346_v31 = vmul.f32 %v814_v24, %v905_v0 }
  0x5c   : > { %v577_v33 = vsel %vm463_vm15, %v406_v19, %v520_v27  ;;  %vm465_vm1 = vcmp.ge.f32.partialorder %v408_v28, 0.0  ;;  %v522_v34 = vmul.f32 0.2, %v408_v28  ;;  %v817_v35 = vunpack.c.l.bf16 %v848_v25 }
  0x5d   : > { %634 = vst [vmem:[%s936_s26 + $0x178] sm:$0xff] %v577_v33  ;;  %v578_v36 = vsel %vm464_vm0, %v407_v22, %v521_v29  ;;  %vm466_vm2 = vcmp.ge.f32.partialorder %v409_v30, 0.0  ;;  %v523_v37 = vmul.f32 0.2, %v409_v30  ;;  %v410_v38 = vadd.f32 %v914_v9, %v346_v31 }
  0x5e   : > { %635 = vst [vmem:[%s936_s26 + $0x180] sm:$0xff] %v578_v36  ;;  %v579_v40 = vsel %vm465_vm1, %v408_v28, %v522_v34  ;;  %v347_v41 = vmul.f32 %v817_v35, %v905_v0  ;;  %v818_v42 = vunpack.c.h.bf16 %v848_v25  ;;  %v821_v43 = vunpack.c.l.bf16 %v849_v32 }
  0x5f   : > { %636 = vst [vmem:[%s936_s26 + $0x188] sm:$0xff] %v579_v40  ;;  %v580_v44 = vsel %vm466_vm2, %v409_v30, %v523_v37  ;;  %vm467_vm3 = vcmp.ge.f32.partialorder %v410_v38, 0.0  ;;  %v524_v45 = vmul.f32 0.2, %v410_v38  ;;  %v822_v46 = vunpack.c.h.bf16 %v849_v32 }
  0x60   : > { %637 = vst [vmem:[%s936_s26 + $0x190] sm:$0xff] %v580_v44  ;;  %v411_v47 = vadd.f32 %v914_v9, %v347_v41  ;;  %v348_v48 = vmul.f32 %v818_v42, %v905_v0  ;;  %v349_v49 = vmul.f32 %v821_v43, %v905_v0  ;;  %v287_v50 = vunpack.c.l.bf16 %v230_v39 }
  0x61   : > { %v581_v51 = vsel %vm467_vm3, %v410_v38, %v524_v45  ;;  %v350_v52 = vmul.f32 %v822_v46, %v905_v0 }
  0x62   : > { %638 = vst [vmem:[%s936_s26 + $0x198] sm:$0xff] %v581_v51  ;;  %vm468_vm4 = vcmp.ge.f32.partialorder %v411_v47, 0.0  ;;  %v525_v53 = vmul.f32 0.2, %v411_v47  ;;  %v412_v54 = vadd.f32 %v914_v9, %v348_v48  ;;  %v413_v55 = vadd.f32 %v914_v9, %v349_v49 }
  0x63   : > { %v414_v56 = vadd.f32 %v914_v9, %v350_v52  ;;  %v351_v57 = vmul.f32 %v905_v0, %v287_v50 }
  0x64   : > { %v582_v58 = vsel %vm468_vm4, %v411_v47, %v525_v53  ;;  %vm469_vm5 = vcmp.ge.f32.partialorder %v412_v54, 0.0  ;;  %v526_v59 = vmul.f32 0.2, %v412_v54  ;;  %vm470_vm6 = vcmp.ge.f32.partialorder %v413_v55, 0.0 }
  0x65   : > { %639 = vst [vmem:[%s936_s26 + $0x1a0] sm:$0xff] %v582_v58  ;;  %v527_v60 = vmul.f32 0.2, %v413_v55  ;;  %vm471_vm7 = vcmp.ge.f32.partialorder %v414_v56, 0.0  ;;  %v528_v61 = vmul.f32 0.2, %v414_v56  ;;  %v415_v62 = vadd.f32 %v914_v9, %v351_v57 }
  0x66   : > { %v583_v63 = vsel %vm469_vm5, %v412_v54, %v526_v59 }
  0x67   : > { %640 = vst [vmem:[%s936_s26 + $0x1a8] sm:$0xff] %v583_v63  ;;  %v584_v1 = vsel %vm470_vm6, %v413_v55, %v527_v60  ;;  %v585_v2 = vsel %vm471_vm7, %v414_v56, %v528_v61  ;;  %vm472_vm8 = vcmp.ge.f32.partialorder %v415_v62, 0.0  ;;  %v529_v3 = vmul.f32 0.2, %v415_v62 }
  0x68   : > { %641 = vst [vmem:[%s936_s26 + $0x1b0] sm:$0xff] %v584_v1  ;;  %642 = vst [vmem:[%s936_s26 + $0x1b8] sm:$0xff] %v585_v2 }
  0x69   : > { %v586_v0 = vsel %vm472_vm8, %v415_v62, %v529_v3 }
  0x6a   : > { %643 = vst [vmem:[%s936_s26 + $0x1c0] sm:$0xff] %v586_v0 }
  0x6b PF: > { %s13_s12 = sadd.s32 1, %s864_s12  }
  0x6c   : > { %p10_p4 = scmp.ge.s32.totalorder %s13_s12, 4  }
  0x6e   :  { %12 = sbr.rel (!%p10_p4) target bundleno = 1 (0x1), region = 62 }

// kernel: conv_block_2d.2
= control target key start
LH: loop header
LB: loop body
LE: loop exit
PB: predicated region body
PF: predicated region fallthrough
CT: control target
= control target key end

     0   :  { %s9696_s15 = smov 0   ;;  %s9698_s16 = smov 0   ;;  %s11933_s0 = inlined_call_operand.vmem [shape: bf16[2,1,496,4], index: 0, kind: input, shape index: {}]   ;;  %s11934_s1 = inlined_call_operand.vmem [shape: bf16[9,4,128], index: 1, kind: input, shape index: {}]   ;;  %s11935_s2 = inlined_call_operand.vmem [shape: f32[456,1], index: 2, kind: input, shape index: {}]   ;;  %s11936_s3 = inlined_call_operand.vmem [shape: bf16[912,128], index: 3, kind: output, shape index: {0}]   ;;  %s11937_s4 = inlined_call_operand.vmem [shape: f32[2,2,128], index: 4, kind: output, shape index: {1}]  }
   0x1   :  { %s9700_s17 = smov 0  }
   0x2 LB: > { %s27_s18 = sadd.s32 1, %s9662_s16  ;;  %p6515_p0 = scmp.ge.s32.totalorder %s9666_s17, 1  ;;  %s9666_s17 = sphi %s9700_s17, %s15_s17   ;;  %s9662_s16 = sphi %s9698_s16, %s12085_s16   ;;  %s9658_s15 = sphi %s9696_s15, %s12084_s15  }
   0x3   : > { %p29_p1 = scmp.ge.s32.totalorder %s27_s18, 2  ;;  %p187_p2 = scmp.lt.s32.totalorder %s9666_s17, 3 }
   0x5   : > { %s12087_s18 = smov (%p29_p1, %s27_s18), 0  ;;  %p188_p3 = pnand %p6515_p0, %p187_p2 }
   0x7   : > { %191 = sbr.rel (%p188_p3) target bundleno = 1300 (0x514), region = 32 }
   0xe   : > { %vm773_vm0 = vcmask 1041408   ;;  %v6698_v0 = vld [vmem:[%s11934_s1 + $0x8] sm:$0x3]  ;;  %p223_p4 = scmp.lt.s32.totalorder %s9658_s15, 1  ;;  %v9668_v1 = vmov 0.0   ;;  %vm9669_vm1 = vmmov 0  }
   0xf   : > { %7934 = vmatprep.subr.bf16.mxu0 %v9668_v1  ;;  %v9722_v2 = vsel %vm773_vm0, %v6698_v0, 0  ;;  %7936 = vmatprep.mubr.msk.bf16.mxu0 %vm9669_vm1, %v9668_v1  ;;  %v6519_v3 = vld [vmem:[%s11934_s1 + $0x2] sm:$0x3]  ;;  %v6729_v5 = vld [vmem:[%s11934_s1 + $0xa] sm:$0x3]  ;;  %vm685_vm2 = vcmask 31744  }
  0x10   : > { %7935 = vmatpush3.bf16.msra.mxu0 %v9722_v2  ;;  %7462 = vmatprep.subr.bf16.mxu1 %v9668_v1  ;;  %s9729_s21 = scalar_select %p223_p4, %s9658_s15, 1  ;;  %v775_v4 = vsel %vm773_vm0, %v6519_v3, 0  ;;  %vm2726_vm3 = vcmask 1045504   ;;  %v3415_v9 = vsel %vm773_vm0, %v6729_v5, 0  ;;  %vm453_vm4 = vsmask.f32 7424 }
  0x11   : > { %8052 = vmatprep.subr.bf16.mxu0 %v9668_v1  ;;  %7464 = vmatprep.mubr.msk.bf16.mxu1 %vm9669_vm1, %v9668_v1  ;;  %v304_v25 = vld [vmem:[%s11934_s1] sm:$0x3]  ;;  %vm3201_vm5 = vsmask.f32 5376  ;;  %vm3943_vm6 = vcmask 1044480   ;;  %vm1374_vm7 = vcmask 1046528  }
  0x12   : > { %s9395_s24 = smul.u32 248, %s9729_s21  ;;  %7463 = vmatpush3.bf16.msra.mxu1 %v775_v4  ;;  %v1102_v30 = vsel %vm773_vm0, %v304_v25, 0  ;;  %vm4418_vm8 = vsmask.f32 4352  ;;  %vm2048_vm9 = vsmask.f32 6400 }
  0x13   : > { %7580 = vmatprep.subr.bf16.mxu1 %v9668_v1  ;;  %s233_s10 = smul.u32 57, %s9658_s15  ;;  %s6518_s13 = sshll.u32 %s9729_s21, 1 }
  0x14   : > { %s9746_s29 = scalar_lea.vmem %s11933_s0, %s9395_s24  ;;  %s244_s20 = scalar_lea.vmem %s11937_s4, %s6518_s13 }
  0x15   : > { %v1844_v6 = vld [vmem:[%s9746_s29 + $0xc] sm:$0xf]  ;;  %v9750_v7 = vld [vmem:[%s9746_s29 + $0x10] sm:$0xff]   ;;  %v2720_v8 = vld [vmem:[%s9746_s29 + $0x8] sm:$0xc]  ;;  %p234_p5 = scmp.lt.s32.totalorder %s233_s10, 113 }
  0x16   : > { %v9754_v10 = vcombine.low %v2720_v8, %v1844_v6  ;;  %v247_v11 = vld [vmem:[%s9746_s29] sm:$0xf]  ;;  %v248_v12 = vld [vmem:[%s9746_s29 + $0x4] sm:$0xf]  ;;  %v2728_v13 = vrot.slane %v9750_v7, 2  ;;  %v9429_v15 = vld [vmem:[%s9746_s29 + $0x8] sm:$0xff]  }
  0x17   : > { %v9759_v14 = vcombine.low %v247_v11, %v248_v12  ;;  %v9764_v17 = vld [vmem:[%s9746_s29 + $0x18] sm:$0xff]   ;;  %v462_v20 = vshll.u32 %v9429_v15, 16  ;;  %v9431_v21 = vld [vmem:[%s9746_s29 + $0x10] sm:$0xff]   ;;  %v466_v28 = vshrl.u32 %v9429_v15, 16  ;;  %v9783_v33 = vld [vmem:[%s9746_s29 + $0x20] sm:$0xff]   ;;  %s12089_s10 = smov (!%p234_p5, %s233_s10), 113 }
  0x18   : > { %v2727_v16 = vrot.slane %v9754_v10, 2  ;;  %v2730_v26 = vrot.slane %v9764_v17, 2  ;;  %v470_v29 = vshll.u32 %v9431_v21, 16  ;;  %v9433_v36 = vld [vmem:[%s9746_s29 + $0x18] sm:$0xff]   ;;  %v2732_v37 = vrot.slane %v9783_v33, 2  ;;  %v9797_v42 = vld [vmem:[%s9746_s29 + $0x28] sm:$0xff]  }
  0x19   : > { %v455_v18 = vshrl.u32 %v9759_v14, 16  ;;  %v457_v19 = vshll.u32 %v9759_v14, 16  ;;  %v464_v24 = vrot.slane %v462_v20, 1  ;;  %v474_v39 = vshrl.u32 %v9431_v21, 16  ;;  %v9435_v45 = vld [vmem:[%s9746_s29 + $0x20] sm:$0xff]   ;;  %v9810_v51 = vld [vmem:[%s9746_s29 + $0x30] sm:$0xff]  }
  0x1a   : > { %v2729_v22 = vsel %vm2726_vm3, %v2727_v16, %v2728_v13  ;;  %v2731_v32 = vsel %vm2726_vm3, %v2728_v13, %v2730_v26  ;;  %v472_v35 = vrot.slane %v470_v29, 1  ;;  %v478_v40 = vshll.u32 %v9433_v36, 16  ;;  %v9437_v54 = vld [vmem:[%s9746_s29 + $0x28] sm:$0xff]   ;;  %v9823_v60 = vld [vmem:[%s9746_s29 + $0x38] sm:$0xff]   ;;  %v9828_v63 = vld [vmem:[%s9746_s29 + $0x30] sm:$0xff]   ;;  %s6517_s15 = sshll.u32 %s12089_s10, 2 }
  0x1b   : > { %7937 = vmatmul.mubr.msk.bf16.vlgmr.msra.gmra.mrb[0].mxu0 %vm685_vm2, %v2729_v22  ;;  %v459_v23 = vrot.slane %v457_v19, 1  ;;  %v468_v34 = vor.u32 %v466_v28, %v464_v24  ;;  %v2733_v41 = vsel %vm2726_vm3, %v2730_v26, %v2732_v37  ;;  %v2734_v46 = vrot.slane %v9797_v42, 2  ;;  %v9839_v8 = vld [vmem:[%s9746_s29 + $0x40] sm:$0xff]   ;;  %v9844_v12 = vld [vmem:[%s9746_s29 + $0x38] sm:$0xff]   ;;  %v9854_v19 = vld [vmem:[%s9746_s29 + $0x48] sm:$0xff]  }
  0x1c   : > { %8053 = vmatpush3.bf16.msra.mxu0 %v3415_v9  ;;  %7940 = vmatprep.mubr.msk.bf16.mxu0 %vm9669_vm1, %v9668_v1  ;;  %v476_v43 = vor.u32 %v474_v39, %v472_v35  ;;  %v480_v44 = vrot.slane %v478_v40, 1  ;;  %v482_v48 = vshrl.u32 %v9433_v36, 16  ;;  %v486_v49 = vshll.u32 %v9435_v45, 16  ;;  %v9871_v28 = vld [vmem:[%s9746_s29 + $0x50] sm:$0xff]   ;;  %v9890_v39 = vld [vmem:[%s9746_s29 + $0x58] sm:$0xff]  }
  0x1d   : > { %v460_v27 = vor.u32 %v459_v23, %v455_v18  ;;  %8170 = vmatprep.subr.bf16.mxu0 %v9668_v1  ;;  %v473_v38 = vsel %vm453_vm4, %v468_v34, %v472_v35  ;;  %v2735_v50 = vsel %vm2726_vm3, %v2732_v37, %v2734_v46  ;;  %v2736_v55 = vrot.slane %v9810_v51, 2  ;;  %v9861_v23 = vld [vmem:[%s9746_s29 + $0x40] sm:$0xff]  }
  0x1e   : > { %v481_v47 = vsel %vm453_vm4, %v476_v43, %v480_v44  ;;  %v484_v52 = vor.u32 %v482_v48, %v480_v44  ;;  %v488_v53 = vrot.slane %v486_v49, 1  ;;  %v490_v57 = vshrl.u32 %v9435_v45, 16  ;;  %v9895_v43 = vld [vmem:[%s9746_s29 + $0x50] sm:$0xff]   ;;  %v9907_v49 = vld [vmem:[%s9746_s29 + $0x60] sm:$0xff]  }
  0x1f   : > { %v465_v31 = vsel %vm453_vm4, %v460_v27, %v464_v24  ;;  %v494_v58 = vshll.u32 %v9437_v54, 16  ;;  %v2737_v59 = vsel %vm2726_vm3, %v2734_v46, %v2736_v55  ;;  %v2738_v0 = vrot.slane %v9823_v60, 2 }
  0x20   : > { %7465 = vmatmul.mubr.msk.bf16.vlgmr.msra.gmra.mrb[0].mxu1 %vm685_vm2, %v465_v31  ;;  %v489_v56 = vsel %vm453_vm4, %v484_v52, %v488_v53  ;;  %v492_v61 = vor.u32 %v490_v57, %v488_v53  ;;  %v498_v4 = vshrl.u32 %v9437_v54, 16  ;;  %v502_v5 = vshll.u32 %v9828_v63, 16  ;;  %v9912_v53 = vld [vmem:[%s9746_s29 + $0x58] sm:$0xff]  }
  0x21   : > { %7581 = vmatpush3.bf16.msra.mxu1 %v1102_v30  ;;  %7468 = vmatprep.mubr.msk.bf16.mxu1 %vm9669_vm1, %v9668_v1  ;;  %v496_v62 = vrot.slane %v494_v58, 1  ;;  %v2739_v6 = vsel %vm2726_vm3, %v2736_v55, %v2738_v0  ;;  %v2740_v13 = vrot.slane %v9839_v8, 2  ;;  %v506_v16 = vshrl.u32 %v9828_v63, 16 }
  0x22   : > { %7698 = vmatprep.subr.bf16.mxu1 %v9668_v1  ;;  %v504_v11 = vrot.slane %v502_v5, 1  ;;  %v510_v18 = vshll.u32 %v9844_v12, 16  ;;  %v2742_v24 = vrot.slane %v9854_v19, 2  ;;  %v514_v26 = vshrl.u32 %v9844_v12, 16 }
  0x23   : > { %7941 = vmatmul.mubr.msk.bf16.gmra.mrb[4].mxu0 %vm685_vm2, %v2731_v32  ;;  %v497_v3 = vsel %vm453_vm4, %v492_v61, %v496_v62  ;;  %v500_v9 = vor.u32 %v498_v4, %v496_v62  ;;  %v2741_v20 = vsel %vm2726_vm3, %v2738_v0, %v2740_v13  ;;  %v518_v27 = vshll.u32 %v9861_v23, 16  ;;  %v9878_v32 = vld [vmem:[%s9746_s29 + $0x48] sm:$0xff]   ;;  %v9929_v0 = vld [vmem:[%s9746_s29 + $0x60] sm:$0xff]  }
  0x24   : > { %7944 = vmatprep.mubr.msk.bf16.mxu0 %vm9669_vm1, %v9668_v1  ;;  %v508_v21 = vor.u32 %v506_v16, %v504_v11  ;;  %v512_v22 = vrot.slane %v510_v18, 1  ;;  %v2743_v29 = vsel %vm2726_vm3, %v2740_v13, %v2742_v24  ;;  %v2744_v34 = vrot.slane %v9871_v28, 2  ;;  %v9946_v16 = vld [vmem:[%s9746_s29 + $0x68] sm:$0xff]  }
  0x25   : > { %v505_v15 = vsel %vm453_vm4, %v500_v9, %v504_v11  ;;  %v520_v31 = vrot.slane %v518_v27, 1  ;;  %v522_v36 = vshrl.u32 %v9861_v23, 16  ;;  %v526_v37 = vshll.u32 %v9878_v32, 16  ;;  %v9941_v11 = vld [vmem:[%s9746_s29 + $0x70] sm:$0xff]  }
  0x26   : > { %v513_v25 = vsel %vm453_vm4, %v508_v21, %v512_v22  ;;  %v516_v30 = vor.u32 %v514_v26, %v512_v22  ;;  %v2746_v44 = vrot.slane %v9890_v39, 2  ;;  %v530_v46 = vshrl.u32 %v9878_v32, 16 }
  0x27   : > { %v524_v40 = vor.u32 %v522_v36, %v520_v31  ;;  %v2748_v54 = vrot.slane %v9907_v49, 2  ;;  %v542_v57 = vshll.u32 %v9912_v53, 16  ;;  %v546_v5 = vshrl.u32 %v9912_v53, 16  ;;  %v9973_v36 = vld [vmem:[%s9746_s29 + $0x80] sm:$0xff]  }
  0x28   : > { %7469 = vmatmul.mubr.msk.bf16.gmra.mrb[4].mxu1 %vm685_vm2, %v473_v38  ;;  %v521_v35 = vsel %vm453_vm4, %v516_v30, %v520_v31  ;;  %v2745_v38 = vsel %vm2726_vm3, %v2742_v24, %v2744_v34  ;;  %v2747_v48 = vsel %vm2726_vm3, %v2744_v34, %v2746_v44  ;;  %v2752_v18 = vrot.slane %v9941_v11, 2 }
  0x29   : > { %7472 = vmatprep.mubr.msk.bf16.mxu1 %vm9669_vm1, %v9668_v1  ;;  %v2749_v58 = vsel %vm2726_vm3, %v2746_v44, %v2748_v54  ;;  %v544_v62 = vrot.slane %v542_v57, 1  ;;  %v554_v21 = vshrl.u32 %v9929_v0, 16  ;;  %v558_v22 = vshll.u32 %v9946_v16, 16 }
  0x2a   : > { %v562_v34 = vshrl.u32 %v9946_v16, 16  ;;  %v11938_v44 = vrot.slane %v9973_v36, 2 }
  0x2b   : > { %7945 = vmatmul.mubr.msk.bf16.gmra.mrb[8].mxu0 %vm685_vm2, %v2733_v41  ;;  %v528_v41 = vrot.slane %v526_v37, 1  ;;  %v548_v13 = vor.u32 %v546_v5, %v544_v62  ;;  %v560_v27 = vrot.slane %v558_v22, 1 }
  0x2c   : > { %7948 = vmatprep.mubr.msk.bf16.mxu0 %vm9669_vm1, %v9668_v1 }
  0x2d   : > { %v529_v45 = vsel %vm453_vm4, %v524_v40, %v528_v41 }
  0x30   : > { %7473 = vmatmul.mubr.msk.bf16.gmra.mrb[8].mxu1 %vm685_vm2, %v481_v47  ;;  %v534_v47 = vshll.u32 %v9895_v43, 16 }
  0x31   : > { %7476 = vmatprep.mubr.msk.bf16.mxu1 %vm9669_vm1, %v9668_v1 }
  0x32   : > { %v536_v52 = vrot.slane %v534_v47, 1  ;;  %v3203_v47 = vshrl.u32 %v9754_v10, 16 }
  0x33   : > { %7949 = vmatmul.mubr.msk.bf16.gmra.mrb[12].mxu0 %vm685_vm2, %v2735_v50  ;;  %v532_v50 = vor.u32 %v530_v46, %v528_v41  ;;  %v9980_v41 = vld [vmem:[%s9746_s29 + $0x78] sm:$0xff]   ;;  %v11979_v46 = vshll.u32 %v9750_v7, 16 }
  0x34   : > { %7952 = vmatprep.mubr.msk.bf16.mxu0 %vm9669_vm1, %v9668_v1 }
  0x35   : > { %v537_v55 = vsel %vm453_vm4, %v532_v50, %v536_v52 }
  0x38   : > { %7477 = vmatmul.mubr.msk.bf16.gmra.mrb[12].mxu1 %vm685_vm2, %v489_v56  ;;  %v538_v56 = vshrl.u32 %v9895_v43, 16 }
  0x39   : > { %7480 = vmatprep.mubr.msk.bf16.mxu1 %vm9669_vm1, %v9668_v1 }
  0x3a   : > { %v540_v61 = vor.u32 %v538_v56, %v536_v52  ;;  %v3205_v56 = vrot.slane %v3203_v47, 2 }
  0x3b   : > { %7953 = vmatmul.mubr.msk.bf16.gmra.mrb[16].mxu0 %vm685_vm2, %v2737_v59  ;;  %v9924_v59 = vld [vmem:[%s9746_s29 + $0x68] sm:$0xff]  }
  0x3c   : > { %7956 = vmatprep.mubr.msk.bf16.mxu0 %vm9669_vm1, %v9668_v1  ;;  %v545_v4 = vsel %vm453_vm4, %v540_v61, %v544_v62 }
  0x40   : > { %7481 = vmatmul.mubr.msk.bf16.gmra.mrb[16].mxu1 %vm685_vm2, %v497_v3  ;;  %v2750_v3 = vrot.slane %v9924_v59, 2 }
  0x41   : > { %7484 = vmatprep.mubr.msk.bf16.mxu1 %vm9669_vm1, %v9668_v1 }
  0x42   : > { %v2751_v9 = vsel %vm2726_vm3, %v2748_v54, %v2750_v3  ;;  %v2753_v24 = vsel %vm2726_vm3, %v2750_v3, %v2752_v18  ;;  %v574_v54 = vshll.u32 %v9980_v41, 16  ;;  %v10004_v3 = vld [vmem:[%s9746_s29 + $0x80] sm:$0xff]  }
  0x43   : > { %7957 = vmatmul.mubr.msk.bf16.gmra.mrb[20].mxu0 %vm685_vm2, %v2739_v6  ;;  %v550_v6 = vshll.u32 %v9929_v0, 16 }
  0x44   : > { %7960 = vmatprep.mubr.msk.bf16.mxu0 %vm9669_vm1, %v9668_v1  ;;  %v576_v62 = vrot.slane %v574_v54, 1 }
  0x48   : > { %7485 = vmatmul.mubr.msk.bf16.gmra.mrb[20].mxu1 %vm685_vm2, %v505_v15  ;;  %v552_v15 = vrot.slane %v550_v6, 1  ;;  %v11976_v6 = vshrl.u32 %v9764_v17, 16 }
  0x49   : > { %7488 = vmatprep.mubr.msk.bf16.mxu1 %vm9669_vm1, %v9668_v1 }
  0x4a   : > { %v556_v26 = vor.u32 %v554_v21, %v552_v15  ;;  %v3214_v22 = vrot.slane %v11976_v6, 2  ;;  %v10401_v6 = vld [vmem:[%s9746_s29 + $0x28] sm:$0xff]  }
  0x4b   : > { %7961 = vmatmul.mubr.msk.bf16.gmra.mrb[24].mxu0 %vm685_vm2, %v2741_v20  ;;  %v553_v20 = vsel %vm453_vm4, %v548_v13, %v552_v15  ;;  %v578_v15 = vshrl.u32 %v9980_v41, 16 }
  0x4c   : > { %7964 = vmatprep.mubr.msk.bf16.mxu0 %vm9669_vm1, %v9668_v1  ;;  %v561_v31 = vsel %vm453_vm4, %v556_v26, %v560_v27 }
  0x50   : > { %7489 = vmatmul.mubr.msk.bf16.gmra.mrb[24].mxu1 %vm685_vm2, %v513_v25  ;;  %v9958_v25 = vld [vmem:[%s9746_s29 + $0x78] sm:$0xff]  }
  0x51   : > { %7492 = vmatprep.mubr.msk.bf16.mxu1 %vm9669_vm1, %v9668_v1  ;;  %v2754_v30 = vrot.slane %v9958_v25, 2 }
  0x53   : > { %7965 = vmatmul.mubr.msk.bf16.gmra.mrb[28].mxu0 %vm685_vm2, %v2743_v29  ;;  %v9963_v29 = vld [vmem:[%s9746_s29 + $0x70] sm:$0xff]   ;;  %v2755_v37 = vsel %vm2726_vm3, %v2752_v18, %v2754_v30  ;;  %v582_v18 = vshll.u32 %v10004_v3, 16 }
  0x54   : > { %7968 = vmatprep.mubr.msk.bf16.mxu0 %vm9669_vm1, %v9668_v1  ;;  %v570_v52 = vshrl.u32 %v9963_v29, 16 }
  0x58   : > { %7493 = vmatmul.mubr.msk.bf16.gmra.mrb[28].mxu1 %vm685_vm2, %v521_v35  ;;  %v566_v35 = vshll.u32 %v9963_v29, 16 }
  0x59   : > { %7496 = vmatprep.mubr.msk.bf16.mxu1 %vm9669_vm1, %v9668_v1 }
  0x5a   : > { %v568_v40 = vrot.slane %v566_v35, 1  ;;  %v11974_v35 = vshrl.u32 %v9783_v33, 16 }
  0x5b   : > { %7969 = vmatmul.mubr.msk.bf16.gmra.mrb[32].mxu0 %vm685_vm2, %v2745_v38  ;;  %v564_v38 = vor.u32 %v562_v34, %v560_v27  ;;  %v580_v27 = vor.u32 %v578_v15, %v576_v62 }
  0x5c   : > { %7972 = vmatprep.mubr.msk.bf16.mxu0 %vm9669_vm1, %v9668_v1  ;;  %v572_v61 = vor.u32 %v570_v52, %v568_v40 }
  0x5d   : > { %v569_v50 = vsel %vm453_vm4, %v564_v38, %v568_v40  ;;  %v586_v40 = vshrl.u32 %v10004_v3, 16 }
  0x5e   : > { %v577_v13 = vsel %vm453_vm4, %v572_v61, %v576_v62 }
  0x60   : > { %7497 = vmatmul.mubr.msk.bf16.gmra.mrb[32].mxu1 %vm685_vm2, %v529_v45  ;;  %v11982_v45 = vshrl.u32 %v9750_v7, 16 }
  0x61   : > { %7500 = vmatprep.mubr.msk.bf16.mxu1 %vm9669_vm1, %v9668_v1 }
  0x63   : > { %7973 = vmatmul.mubr.msk.bf16.gmra.mrb[36].mxu0 %vm685_vm2, %v2747_v48  ;;  %v3206_v48 = vshll.u32 %v9754_v10, 16  ;;  %v3211_v10 = vrot.slane %v11979_v46, 3  ;;  %v10411_v46 = vld [vmem:[%s9746_s29 + $0xc0] sm:$0xff]  }
  0x64   : > { %7976 = vmatprep.mubr.msk.bf16.mxu0 %vm9669_vm1, %v9668_v1  ;;  %12015 = vst [vmem:[#allocation6_spill] sm:$0xff] %v10411_v46 }
  0x65   : > { %v3208_v57 = vrot.slane %v3206_v48, 3 }
  0x68   : > { %7501 = vmatmul.mubr.msk.bf16.gmra.mrb[36].mxu1 %vm685_vm2, %v537_v55  ;;  %v2757_v55 = vsel %vm2726_vm3, %v2754_v30, %v11938_v44  ;;  %v584_v30 = vrot.slane %v582_v18, 1  ;;  %v11942_v44 = vshll.u32 %v9871_v28, 16 }
  0x69   : > { %7504 = vmatprep.mubr.msk.bf16.mxu1 %vm9669_vm1, %v9668_v1 }
  0x6a   : > { %v585_v38 = vsel %vm453_vm4, %v580_v27, %v584_v30  ;;  %v588_v54 = vor.u32 %v586_v40, %v584_v30 }
  0x6b   : > { %7977 = vmatmul.mubr.msk.bf16.gmra.mrb[40].mxu0 %vm685_vm2, %v2749_v58  ;;  %v3210_v58 = vrot.slane %v11982_v45, 2  ;;  %v10428_v45 = vld [vmem:[%s9746_s29 + $0xc8] sm:$0xff]  }
  0x6c   : > { %7980 = vmatprep.mubr.msk.bf16.mxu0 %vm9669_vm1, %v9668_v1  ;;  %12016 = vst [vmem:[#allocation7_spill] sm:$0xff] %v10428_v45 }
  0x6d   : > { %v3212_v5 = vor.u32 %v3211_v10, %v3210_v58  ;;  %v11970_v58 = vshrl.u32 %v9797_v42, 16  ;;  %v11957_v10 = vshll.u32 %v9797_v42, 16 }
  0x6f   : > { %v3223_v15 = vrot.slane %v11957_v10, 3 }
  0x70   : > { %7505 = vmatmul.mubr.msk.bf16.gmra.mrb[40].mxu1 %vm685_vm2, %v545_v4  ;;  %v3209_v4 = vor.u32 %v3208_v57, %v3205_v56  ;;  %v10047_v56 = vld [vmem:[%s9746_s29 + $0x90] sm:$0xff]  }
  0x71   : > { %7508 = vmatprep.mubr.msk.bf16.mxu1 %vm9669_vm1, %v9668_v1  ;;  %v602_v30 = vshrl.u32 %v10047_v56, 16 }
  0x72   : > { %v3213_v21 = vsel %vm3201_vm5, %v3209_v4, %v3212_v5  ;;  %v598_v4 = vshll.u32 %v10047_v56, 16 }
  0x73   : > { %7981 = vmatmul.mubr.msk.bf16.gmra.mrb[44].mxu0 %vm685_vm2, %v2751_v9  ;;  %v11975_v9 = vshll.u32 %v9764_v17, 16 }
  0x74   : > { %7984 = vmatprep.mubr.msk.bf16.mxu0 %vm9669_vm1, %v9668_v1 }
  0x78   : > { %7509 = vmatmul.mubr.msk.bf16.gmra.mrb[44].mxu1 %vm685_vm2, %v553_v20  ;;  %v6760_v20 = vld [vmem:[%s11934_s1 + $0xc] sm:$0x3] }
  0x79   : > { %7512 = vmatprep.mubr.msk.bf16.mxu1 %vm9669_vm1, %v9668_v1  ;;  %v4089_v26 = vsel %vm773_vm0, %v6760_v20, 0  ;;  %v600_v20 = vrot.slane %v598_v4, 1 }
  0x7b   : > { %7985 = vmatmul.mubr.msk.bf16.gmra.mrb[48].mxu0 %vm685_vm2, %v2753_v24  ;;  %v3215_v24 = vrot.slane %v11975_v9, 3  ;;  %v10391_v9 = vld [vmem:[%s9746_s29 + $0xb8] sm:$0xff]  }
  0x7c   : > { %7988 = vmatprep.mubr.msk.bf16.mxu0 %vm9669_vm1, %v9668_v1  ;;  %12014 = vst [vmem:[#allocation5_spill] sm:$0xff] %v10391_v9 }
  0x7d   : > { %v3216_v34 = vor.u32 %v3215_v24, %v3214_v22  ;;  %v11954_v24 = vshrl.u32 %v9810_v51, 16 }
  0x7f   : > { %v3217_v48 = vsel %vm3201_vm5, %v3212_v5, %v3216_v34  ;;  %v3226_v40 = vrot.slane %v11954_v24, 2 }
  0x80   : > { %7513 = vmatmul.mubr.msk.bf16.gmra.mrb[48].mxu1 %vm685_vm2, %v561_v31  ;;  %v10027_v31 = vld [vmem:[%s9746_s29 + $0x88] sm:$0xff]  }
  0x81   : > { %7516 = vmatprep.mubr.msk.bf16.mxu1 %vm9669_vm1, %v9668_v1  ;;  %v590_v47 = vshll.u32 %v10027_v31, 16  ;;  %v594_v62 = vshrl.u32 %v10027_v31, 16 }
  0x83   : > { %7989 = vmatmul.mubr.msk.bf16.gmra.mrb[52].mxu0 %vm685_vm2, %v2755_v37  ;;  %v11971_v37 = vshll.u32 %v9783_v33, 16 }
  0x84   : > { %7992 = vmatprep.mubr.msk.bf16.mxu0 %vm9669_vm1, %v9668_v1 }
  0x85   : > { %v3219_v52 = vrot.slane %v11971_v37, 3  ;;  %v10371_v37 = vld [vmem:[%s9746_s29 + $0xb0] sm:$0xff]  }
  0x86   : > { %12013 = vst [vmem:[#allocation4_spill] sm:$0xff] %v10371_v37 }
  0x88   : > { %7517 = vmatmul.mubr.msk.bf16.gmra.mrb[52].mxu1 %vm685_vm2, %v569_v50  ;;  %v3218_v50 = vrot.slane %v11974_v35, 2 }
  0x89   : > { %7520 = vmatprep.mubr.msk.bf16.mxu1 %vm9669_vm1, %v9668_v1 }
  0x8a   : > { %v3220_v57 = vor.u32 %v3219_v52, %v3218_v50  ;;  %v10085_v52 = vld [vmem:[%s9746_s29 + $0xa0] sm:$0xff]  }
  0x8b   : > { %7993 = vmatmul.mubr.msk.bf16.gmra.mrb[56].mxu0 %vm685_vm2, %v2757_v55  ;;  %v592_v55 = vrot.slane %v590_v47, 1  ;;  %v614_v4 = vshll.u32 %v10085_v52, 16 }
  0x8c   : > { %8054 = vmatprep.mubr.msk.bf16.mxu0 %vm9669_vm1, %v9668_v1  ;;  %v3221_v5 = vsel %vm3201_vm5, %v3216_v34, %v3220_v57 }
  0x8d   : > { %v593_v61 = vsel %vm453_vm4, %v588_v54, %v592_v55  ;;  %v596_v18 = vor.u32 %v594_v62, %v592_v55  ;;  %v11951_v55 = vshrl.u32 %v9823_v60, 16 }
  0x8f   : > { %v601_v27 = vsel %vm453_vm4, %v596_v18, %v600_v20 }
  0x90   : > { %7521 = vmatmul.mubr.msk.bf16.gmra.mrb[56].mxu1 %vm685_vm2, %v577_v13  ;;  %v3222_v13 = vrot.slane %v11970_v58, 2 }
  0x91   : > { %7524 = vmatprep.mubr.msk.bf16.mxu1 %vm9669_vm1, %v9668_v1 }
  0x92   : > { %v3224_v22 = vor.u32 %v3223_v15, %v3222_v13  ;;  %v3230_v13 = vrot.slane %v11951_v55, 2 }
  0x93   : > { %8055 = vmatmul.mubr.msk.bf16.vlgmr.msra.gmra.mrb[0].mxu0 %vm685_vm2, %v3213_v21  ;;  %v10066_v21 = vld [vmem:[%s9746_s29 + $0x98] sm:$0xff]  }
  0x94   : > { %8171 = vmatpush3.bf16.msra.mxu0 %v4089_v26  ;;  %8058 = vmatprep.mubr.msk.bf16.mxu0 %vm9669_vm1, %v9668_v1  ;;  %v11953_v26 = vshll.u32 %v9810_v51, 16  ;;  %v606_v34 = vshll.u32 %v10066_v21, 16  ;;  %v610_v62 = vshrl.u32 %v10066_v21, 16 }
  0x95   : > { %8288 = vmatprep.subr.bf16.mxu0 %v9668_v1 }
  0x96   : > { %v3227_v47 = vrot.slane %v11953_v26, 3  ;;  %v608_v50 = vrot.slane %v606_v34, 1  ;;  %v11943_v34 = vshll.u32 %v9839_v8, 16 }
  0x98   : > { %7525 = vmatmul.mubr.msk.bf16.gmra.mrb[60].mxu1 %vm685_vm2, %v585_v38  ;;  %v3225_v38 = vsel %vm3201_vm5, %v3220_v57, %v3224_v22  ;;  %v3228_v54 = vor.u32 %v3227_v47, %v3226_v40  ;;  %v11949_v57 = vshll.u32 %v9823_v60, 16  ;;  %v612_v18 = vor.u32 %v610_v62, %v608_v50 }
  0x99   : > { %7528 = vmatprep.mubr.msk.bf16.mxu1 %vm9669_vm1, %v9668_v1  ;;  %v618_v40 = vshrl.u32 %v10085_v52, 16 }
  0x9a   : > { %v3231_v15 = vrot.slane %v11949_v57, 3 }
  0x9b   : > { %8059 = vmatmul.mubr.msk.bf16.gmra.mrb[4].mxu0 %vm685_vm2, %v3217_v48  ;;  %v604_v48 = vor.u32 %v602_v30, %v600_v20  ;;  %v616_v20 = vrot.slane %v614_v4, 1  ;;  %v11946_v30 = vshrl.u32 %v9839_v8, 16 }
  0x9c   : > { %8062 = vmatprep.mubr.msk.bf16.mxu0 %vm9669_vm1, %v9668_v1 }
  0x9d   : > { %v620_v62 = vor.u32 %v618_v40, %v616_v20 }
  0xa0   : > { %7529 = vmatmul.mubr.msk.bf16.gmra.mrb[64].mxu1 %vm685_vm2, %v593_v61  ;;  %v609_v61 = vsel %vm453_vm4, %v604_v48, %v608_v50  ;;  %v3234_v50 = vrot.slane %v11946_v30, 2 }
  0xa1   : > { %7532 = vmatprep.mubr.msk.bf16.mxu1 %vm9669_vm1, %v9668_v1 }
  0xa3   : > { %8063 = vmatmul.mubr.msk.bf16.gmra.mrb[8].mxu0 %vm685_vm2, %v3221_v5  ;;  %v3229_v5 = vsel %vm3201_vm5, %v3224_v22, %v3228_v54  ;;  %v3232_v22 = vor.u32 %v3231_v15, %v3230_v13  ;;  %v11940_v13 = vshrl.u32 %v9854_v19, 16  ;;  %v11939_v15 = vshll.u32 %v9854_v19, 16 }
  0xa4   : > { %8066 = vmatprep.mubr.msk.bf16.mxu0 %vm9669_vm1, %v9668_v1 }
  0xa5   : > { %v3233_v48 = vsel %vm3201_vm5, %v3228_v54, %v3232_v22 }
  0xa8   : > { %7533 = vmatmul.mubr.msk.bf16.gmra.mrb[68].mxu1 %vm685_vm2, %v601_v27  ;;  %v10104_v27 = vld [vmem:[%s9746_s29 + $0xa8] sm:$0xff]  }
  0xa9   : > { %7536 = vmatprep.mubr.msk.bf16.mxu1 %vm9669_vm1, %v9668_v1  ;;  %v622_v47 = vshll.u32 %v10104_v27, 16 }
  0xab   : > { %8067 = vmatmul.mubr.msk.bf16.gmra.mrb[12].mxu0 %vm685_vm2, %v3225_v38  ;;  %v617_v38 = vsel %vm453_vm4, %v612_v18, %v616_v20  ;;  %v624_v4 = vrot.slane %v622_v47, 1  ;;  %v3238_v47 = vrot.slane %v11940_v13, 2 }
  0xac   : > { %8070 = vmatprep.mubr.msk.bf16.mxu0 %vm9669_vm1, %v9668_v1 }
  0xad   : > { %v625_v18 = vsel %vm453_vm4, %v620_v62, %v624_v4  ;;  %v10142_v62 = vld [vmem:[%s9746_s29 + $0xb8] sm:$0xff]  }
  0xb0   : > { %7537 = vmatmul.mubr.msk.bf16.gmra.mrb[72].mxu1 %vm685_vm2, %v609_v61  ;;  %v3235_v61 = vrot.slane %v11943_v34, 3  ;;  %v642_v34 = vshrl.u32 %v10142_v62, 16 }
  0xb1   : > { %7540 = vmatprep.mubr.msk.bf16.mxu1 %vm9669_vm1, %v9668_v1 }
  0xb2   : > { %v3236_v54 = vor.u32 %v3235_v61, %v3234_v50 }
  0xb3   : > { %8071 = vmatmul.mubr.msk.bf16.gmra.mrb[16].mxu0 %vm685_vm2, %v3229_v5  ;;  %v10123_v5 = vld [vmem:[%s9746_s29 + $0xb0] sm:$0xff]  }
  0xb4   : > { %8074 = vmatprep.mubr.msk.bf16.mxu0 %vm9669_vm1, %v9668_v1  ;;  %v630_v20 = vshll.u32 %v10123_v5, 16  ;;  %v3237_v40 = vsel %vm3201_vm5, %v3232_v22, %v3236_v54  ;;  %v634_v13 = vshrl.u32 %v10123_v5, 16 }
  0xb6   : > { %v632_v61 = vrot.slane %v630_v20, 1 }
  0xb8   : > { %7541 = vmatmul.mubr.msk.bf16.gmra.mrb[76].mxu1 %vm685_vm2, %v617_v38  ;;  %v626_v38 = vshrl.u32 %v10104_v27, 16 }
  0xb9   : > { %7544 = vmatprep.mubr.msk.bf16.mxu1 %vm9669_vm1, %v9668_v1 }
  0xba   : > { %v628_v50 = vor.u32 %v626_v38, %v624_v4  ;;  %v638_v4 = vshll.u32 %v10142_v62, 16 }
  0xbb   : > { %8075 = vmatmul.mubr.msk.bf16.gmra.mrb[20].mxu0 %vm685_vm2, %v3233_v48  ;;  %v3239_v48 = vrot.slane %v11939_v15, 3 }
  0xbc   : > { %8078 = vmatprep.mubr.msk.bf16.mxu0 %vm9669_vm1, %v9668_v1  ;;  %v633_v15 = vsel %vm453_vm4, %v628_v50, %v632_v61  ;;  %v10161_v50 = vld [vmem:[%s9746_s29 + $0xc0] sm:$0xff]  }
  0xbd   : > { %v3240_v22 = vor.u32 %v3239_v48, %v3238_v47  ;;  %v636_v47 = vor.u32 %v634_v13, %v632_v61  ;;  %v640_v48 = vrot.slane %v638_v4, 1  ;;  %v646_v13 = vshll.u32 %v10161_v50, 16 }
  0xbe   : > { %v650_v30 = vshrl.u32 %v10161_v50, 16 }
  0xbf   : > { %v3241_v38 = vsel %vm3201_vm5, %v3236_v54, %v3240_v22 }
  0xc0   : > { %7545 = vmatmul.mubr.msk.bf16.gmra.mrb[80].mxu1 %vm685_vm2, %v625_v18  ;;  %v11941_v18 = vshrl.u32 %v9871_v28, 16 }
  0xc1   : > { %7548 = vmatprep.mubr.msk.bf16.mxu1 %vm9669_vm1, %v9668_v1 }
  0xc2   : > { %v3242_v20 = vrot.slane %v11941_v18, 2  ;;  %v11945_v18 = vshll.u32 %v9890_v39, 16 }
  0xc3   : > { %8079 = vmatmul.mubr.msk.bf16.gmra.mrb[24].mxu0 %vm685_vm2, %v3237_v40  ;;  %v3243_v40 = vrot.slane %v11942_v44, 3  ;;  %v641_v44 = vsel %vm453_vm4, %v636_v47, %v640_v48  ;;  %v10180_v47 = vld [vmem:[%s9746_s29 + $0xc8] sm:$0xff]  }
  0xc4   : > { %8082 = vmatprep.mubr.msk.bf16.mxu0 %vm9669_vm1, %v9668_v1  ;;  %v658_v57 = vshrl.u32 %v10180_v47, 16 }
  0xc5   : > { %v3244_v54 = vor.u32 %v3243_v40, %v3242_v20  ;;  %v644_v20 = vor.u32 %v642_v34, %v640_v48  ;;  %v648_v40 = vrot.slane %v646_v13, 1  ;;  %v654_v34 = vshll.u32 %v10180_v47, 16 }
  0xc7   : > { %v3245_v61 = vsel %vm3201_vm5, %v3240_v22, %v3244_v54  ;;  %v11947_v22 = vshrl.u32 %v9907_v49, 16 }
  0xc8   : > { %7549 = vmatmul.mubr.msk.bf16.gmra.mrb[84].mxu1 %vm685_vm2, %v633_v15  ;;  %v11944_v15 = vshrl.u32 %v9890_v39, 16 }
  0xc9   : > { %7552 = vmatprep.mubr.msk.bf16.mxu1 %vm9669_vm1, %v9668_v1  ;;  %v3250_v13 = vrot.slane %v11947_v22, 2  ;;  %v11952_v22 = vshll.u32 %v9924_v59, 16 }
  0xca   : > { %v3246_v4 = vrot.slane %v11944_v15, 2  ;;  %v11948_v15 = vshll.u32 %v9907_v49, 16 }
  0xcb   : > { %8083 = vmatmul.mubr.msk.bf16.gmra.mrb[28].mxu0 %vm685_vm2, %v3241_v38  ;;  %v3247_v38 = vrot.slane %v11945_v18, 3  ;;  %v649_v18 = vsel %vm453_vm4, %v644_v20, %v648_v40  ;;  %v10199_v20 = vld [vmem:[%s9746_s29 + $0xd0] sm:$0xff]  }
  0xcc   : > { %8086 = vmatprep.mubr.msk.bf16.mxu0 %vm9669_vm1, %v9668_v1 }
  0xd0   : > { %7553 = vmatmul.mubr.msk.bf16.gmra.mrb[88].mxu1 %vm685_vm2, %v641_v44  ;;  %v3248_v44 = vor.u32 %v3247_v38, %v3246_v4  ;;  %v652_v4 = vor.u32 %v650_v30, %v648_v40  ;;  %v656_v38 = vrot.slane %v654_v34, 1  ;;  %v662_v30 = vshll.u32 %v10199_v20, 16 }
  0xd1   : > { %7556 = vmatprep.mubr.msk.bf16.mxu1 %vm9669_vm1, %v9668_v1 }
  0xd2   : > { %v3249_v48 = vsel %vm3201_vm5, %v3244_v54, %v3248_v44  ;;  %v11950_v54 = vshrl.u32 %v9924_v59, 16 }
  0xd3   : > { %8087 = vmatmul.mubr.msk.bf16.gmra.mrb[32].mxu0 %vm685_vm2, %v3245_v61  ;;  %v3251_v61 = vrot.slane %v11948_v15, 3  ;;  %v657_v15 = vsel %vm453_vm4, %v652_v4, %v656_v38  ;;  %v10218_v4 = vld [vmem:[%s9746_s29 + $0xd8] sm:$0xff]  }
  0xd4   : > { %8090 = vmatprep.mubr.msk.bf16.mxu0 %vm9669_vm1, %v9668_v1  ;;  %v3254_v34 = vrot.slane %v11950_v54, 2  ;;  %v11956_v54 = vshll.u32 %v9941_v11, 16  ;;  %v670_v26 = vshll.u32 %v10218_v4, 16  ;;  %v674_v10 = vshrl.u32 %v10218_v4, 16 }
  0xd8   : > { %7557 = vmatmul.mubr.msk.bf16.gmra.mrb[92].mxu1 %vm685_vm2, %v649_v18  ;;  %v3252_v18 = vor.u32 %v3251_v61, %v3250_v13  ;;  %v660_v13 = vor.u32 %v658_v57, %v656_v38  ;;  %v664_v61 = vrot.slane %v662_v30, 1  ;;  %v10229_v57 = vld [vmem:[%s9746_s29 + $0xe0] sm:$0xf]  ;;  %v305_v38 = vld [vmem:[%s9746_s29 + $0xe4] sm:$0x1] }
  0xd9   : > { %7560 = vmatprep.mubr.msk.bf16.mxu1 %vm9669_vm1, %v9668_v1  ;;  %v10241_v24 = vcombine.low %v10229_v57, %v305_v38 }
  0xda   : > { %v3253_v40 = vsel %vm3201_vm5, %v3248_v44, %v3252_v18  ;;  %v11955_v44 = vshrl.u32 %v9941_v11, 16  ;;  %v665_v55 = vsel %vm453_vm4, %v660_v13, %v664_v61  ;;  %v672_v13 = vrot.slane %v670_v26, 1 }
  0xdb   : > { %8091 = vmatmul.mubr.msk.bf16.gmra.mrb[36].mxu0 %vm685_vm2, %v3249_v48  ;;  %v3255_v48 = vrot.slane %v11952_v22, 3  ;;  %v666_v22 = vshrl.u32 %v10199_v20, 16 }
  0xdc   : > { %8094 = vmatprep.mubr.msk.bf16.mxu0 %vm9669_vm1, %v9668_v1 }
  0xe0   : > { %7561 = vmatmul.mubr.msk.bf16.gmra.mrb[96].mxu1 %vm685_vm2, %v657_v15  ;;  %v3256_v15 = vor.u32 %v3255_v48, %v3254_v34  ;;  %v3259_v34 = vrot.slane %v11956_v54, 3  ;;  %v668_v48 = vor.u32 %v666_v22, %v664_v61  ;;  %v678_v22 = vshll.u32 %v10241_v24, 16 }
  0xe1   : > { %7564 = vmatprep.mubr.msk.bf16.mxu1 %vm9669_vm1, %v9668_v1 }
  0xe2   : > { %v3257_v30 = vsel %vm3201_vm5, %v3252_v18, %v3256_v15  ;;  %v11967_v18 = vshrl.u32 %v9958_v25, 16  ;;  %v673_v54 = vsel %vm453_vm4, %v668_v48, %v672_v13 }
  0xe3   : > { %8095 = vmatmul.mubr.msk.bf16.gmra.mrb[40].mxu0 %vm685_vm2, %v3253_v40  ;;  %v3258_v40 = vrot.slane %v11955_v44, 2  ;;  %v11958_v44 = vshll.u32 %v9958_v25, 16 }
  0xe4   : > { %8098 = vmatprep.mubr.msk.bf16.mxu0 %vm9669_vm1, %v9668_v1  ;;  %v3262_v61 = vrot.slane %v11967_v18, 2  ;;  %v10351_v18 = vld [vmem:[%s9746_s29 + $0xa8] sm:$0xff]  }
  0xe5   : > { %v3263_v38 = vrot.slane %v11958_v44, 3  ;;  %12012 = vst [vmem:[#allocation3_spill] sm:$0xff] %v10351_v18 }
  0xe8   : > { %7565 = vmatmul.mubr.msk.bf16.gmra.mrb[100].mxu1 %vm685_vm2, %v665_v55  ;;  %v3260_v55 = vor.u32 %v3259_v34, %v3258_v40  ;;  %v680_v40 = vrot.slane %v678_v22, 1  ;;  %v11959_v34 = vshll.u32 %v9973_v36, 16 }
  0xe9   : > { %7568 = vmatprep.mubr.msk.bf16.mxu1 %vm9669_vm1, %v9668_v1 }
  0xea   : > { %v3261_v26 = vsel %vm3201_vm5, %v3256_v15, %v3260_v55  ;;  %v11966_v15 = vshrl.u32 %v9973_v36, 16  ;;  %v3267_v22 = vrot.slane %v11959_v34, 3 }
  0xeb   : > { %8099 = vmatmul.mubr.msk.bf16.gmra.mrb[44].mxu0 %vm685_vm2, %v3257_v30  ;;  %v676_v30 = vor.u32 %v674_v10, %v672_v13  ;;  %v682_v10 = vshrl.u32 %v10241_v24, 16 }
  0xec   : > { %8102 = vmatprep.mubr.msk.bf16.mxu0 %vm9669_vm1, %v9668_v1  ;;  %v3266_v13 = vrot.slane %v11966_v15, 2 }
  0xed   : > { %v681_v48 = vsel %vm453_vm4, %v676_v30, %v680_v40 }
  0xf0   : > { %7569 = vmatmul.mubr.msk.bf16.gmra.mrb[104].mxu1 %vm685_vm2, %v673_v54  ;;  %v3264_v54 = vor.u32 %v3263_v38, %v3262_v61  ;;  %v684_v61 = vor.u32 %v682_v10, %v680_v40  ;;  %v10289_v40 = vld [vmem:[%s9746_s29 + $0x90] sm:$0xff]   ;;  %v6608_v10 = vld [vmem:[%s11934_s1 + $0x4] sm:$0x3] }
  0xf1   : > { %7572 = vmatprep.mubr.msk.bf16.mxu1 %vm9669_vm1, %v9668_v1 }
  0xf2   : > { %v3265_v44 = vsel %vm3201_vm5, %v3260_v55, %v3264_v54  ;;  %v3268_v55 = vor.u32 %v3267_v22, %v3266_v13  ;;  %v11963_v13 = vshrl.u32 %v10289_v40, 16  ;;  %v11962_v22 = vshll.u32 %v10289_v40, 16 }
  0xf3   : > { %8103 = vmatmul.mubr.msk.bf16.gmra.mrb[48].mxu0 %vm685_vm2, %v3261_v26  ;;  %v10273_v26 = vld [vmem:[%s9746_s29 + $0x88] sm:$0xff]  }
  0xf4   : > { %8106 = vmatprep.mubr.msk.bf16.mxu0 %vm9669_vm1, %v9668_v1  ;;  %v11961_v38 = vshrl.u32 %v10273_v26, 16  ;;  %v11960_v30 = vshll.u32 %v10273_v26, 16 }
  0xf6   : > { %v3270_v34 = vrot.slane %v11961_v38, 2  ;;  %v3275_v38 = vrot.slane %v11962_v22, 3 }
  0xf8   : > { %7573 = vmatmul.mubr.msk.bf16.gmra.mrb[108].mxu1 %vm685_vm2, %v681_v48  ;;  %v3269_v48 = vsel %vm3201_vm5, %v3264_v54, %v3268_v55 }
  0xf9   : > { %7576 = vmatprep.mubr.msk.bf16.mxu1 %vm9669_vm1, %v9668_v1 }
  0xfb   : > { %8107 = vmatmul.mubr.msk.bf16.gmra.mrb[52].mxu0 %vm685_vm2, %v3265_v44  ;;  %v3271_v44 = vrot.slane %v11960_v30, 3  ;;  %v3274_v30 = vrot.slane %v11963_v13, 2  ;;  %v10331_v13 = vld [vmem:[%s9746_s29 + $0xa0] sm:$0xff]  }
  0xfc   : > { %8110 = vmatprep.mubr.msk.bf16.mxu0 %vm9669_vm1, %v9668_v1  ;;  %12011 = vst [vmem:[#allocation2_spill] sm:$0xff] %v10331_v13 }
  0xfd   : > { %v3272_v54 = vor.u32 %v3271_v44, %v3270_v34  ;;  %v10310_v34 = vld [vmem:[%s9746_s29 + $0x98] sm:$0xff]  }
  0xfe   : > { %v11965_v44 = vshll.u32 %v10310_v34, 16 }
 0x100   : > { %7577 = vmatmul.mubr.msk.bf16.gmra.mrb[112].mxu1 %vm685_vm2, %v684_v61  ;;  %v1520_v61 = vsel %vm773_vm0, %v6608_v10, 0  ;;  %v10321_v10 = vld [vmem:[%s9746_s29 + $0x8] sm:$0xff]   ;;  %v3279_v22 = vrot.slane %v11965_v44, 3 }
 0x101   : > { %7582 = vmatprep.mubr.msk.bf16.mxu1 %vm9669_vm1, %v9668_v1 }
 0x103   : > { %8111 = vmatmul.mubr.msk.bf16.gmra.mrb[56].mxu0 %vm685_vm2, %v3269_v48  ;;  %v3273_v48 = vsel %vm3201_vm5, %v3268_v55, %v3272_v54  ;;  %v11964_v55 = vshrl.u32 %v10310_v34, 16 }
 0x104   : > { %8114 = vmatprep.mubr.msk.bf16.mxu0 %vm9669_vm1, %v9668_v1 }
 0x108   : > { %7583 = vmatmul.mubr.msk.bf16.vlgmr.msra.gmra.mrb[0].mxu1 %vm685_vm2, %v9759_v14  ;;  %v3276_v14 = vor.u32 %v3275_v38, %v3274_v30  ;;  %v11968_v30 = vshrl.u32 %v10331_v13, 16 }
 0x109   : > { %7699 = vmatpush3.bf16.msra.mxu1 %v1520_v61  ;;  %7586 = vmatprep.mubr.msk.bf16.mxu1 %vm9669_vm1, %v9668_v1 }
 0x10a   : > { %7816 = vmatprep.subr.bf16.mxu1 %v9668_v1  ;;  %v3277_v61 = vsel %vm3201_vm5, %v3272_v54, %v3276_v14  ;;  %v11969_v54 = vshll.u32 %v10331_v13, 16 }
 0x10b   : > { %8115 = vmatmul.mubr.msk.bf16.gmra.mrb[60].mxu0 %vm685_vm2, %v3273_v48  ;;  %v3278_v48 = vrot.slane %v11964_v55, 2  ;;  %v10341_v55 = vld [vmem:[%s9746_s29 + $0x10] sm:$0xff]  }
 0x10c   : > { %8118 = vmatprep.mubr.msk.bf16.mxu0 %vm9669_vm1, %v9668_v1  ;;  %v3283_v15 = vrot.slane %v11969_v54, 3 }
 0x10d   : > { %v3280_v38 = vor.u32 %v3279_v22, %v3278_v48  ;;  %v11973_v48 = vshll.u32 %v10351_v18, 16 }
 0x10f   : > { %v3281_v44 = vsel %vm3201_vm5, %v3276_v14, %v3280_v38  ;;  %v11972_v14 = vshrl.u32 %v10351_v18, 16  ;;  %v3287_v58 = vrot.slane %v11973_v48, 3 }
 0x110   : > { %7587 = vmatmul.mubr.msk.bf16.gmra.mrb[4].mxu1 %vm685_vm2, %v10321_v10 }
 0x111   : > { %7590 = vmatprep.mubr.msk.bf16.mxu1 %vm9669_vm1, %v9668_v1 }
 0x113   : > { %8119 = vmatmul.mubr.msk.bf16.gmra.mrb[64].mxu0 %vm685_vm2, %v3277_v61  ;;  %v3282_v61 = vrot.slane %v11968_v30, 2  ;;  %v10361_v30 = vld [vmem:[%s9746_s29 + $0x18] sm:$0xff]  }
 0x114   : > { %8122 = vmatprep.mubr.msk.bf16.mxu0 %vm9669_vm1, %v9668_v1 }
 0x115   : > { %v3284_v22 = vor.u32 %v3283_v15, %v3282_v61  ;;  %v11977_v61 = vshll.u32 %v10371_v37, 16 }
 0x117   : > { %v3285_v54 = vsel %vm3201_vm5, %v3280_v38, %v3284_v22  ;;  %v11978_v38 = vshrl.u32 %v10371_v37, 16  ;;  %v3291_v35 = vrot.slane %v11977_v61, 3 }
 0x118   : > { %7591 = vmatmul.mubr.msk.bf16.gmra.mrb[8].mxu1 %vm685_vm2, %v10341_v55 }
 0x119   : > { %7594 = vmatprep.mubr.msk.bf16.mxu1 %vm9669_vm1, %v9668_v1 }
 0x11b   : > { %8123 = vmatmul.mubr.msk.bf16.gmra.mrb[68].mxu0 %vm685_vm2, %v3281_v44  ;;  %v3286_v44 = vrot.slane %v11972_v14, 2  ;;  %v10381_v14 = vld [vmem:[%s9746_s29 + $0x20] sm:$0xff]  }
 0x11c   : > { %8126 = vmatprep.mubr.msk.bf16.mxu0 %vm9669_vm1, %v9668_v1 }
 0x11d   : > { %v3288_v15 = vor.u32 %v3287_v58, %v3286_v44  ;;  %v11981_v44 = vshrl.u32 %v10391_v9, 16 }
 0x11f   : > { %v3289_v48 = vsel %vm3201_vm5, %v3284_v22, %v3288_v15  ;;  %v11980_v22 = vshll.u32 %v10391_v9, 16 }
 0x120   : > { %7595 = vmatmul.mubr.msk.bf16.gmra.mrb[12].mxu1 %vm685_vm2, %v10361_v30 }
 0x121   : > { %7598 = vmatprep.mubr.msk.bf16.mxu1 %vm9669_vm1, %v9668_v1 }
 0x123   : > { %8127 = vmatmul.mubr.msk.bf16.gmra.mrb[72].mxu0 %vm685_vm2, %v3285_v54  ;;  %v3290_v54 = vrot.slane %v11978_v38, 2  ;;  %v3294_v38 = vrot.slane %v11981_v44, 2 }
 0x124   : > { %8130 = vmatprep.mubr.msk.bf16.mxu0 %vm9669_vm1, %v9668_v1 }
 0x125   : > { %v3292_v58 = vor.u32 %v3291_v35, %v3290_v54  ;;  %v11984_v54 = vshrl.u32 %v10411_v46, 16 }
 0x127   : > { %v3293_v61 = vsel %vm3201_vm5, %v3288_v15, %v3292_v58  ;;  %v11983_v15 = vshll.u32 %v10411_v46, 16  ;;  %v3298_v44 = vrot.slane %v11984_v54, 2  ;;  %v10445_v54 = vld [vmem:[%s9746_s29 + $0xd0] sm:$0xff]  }
 0x128   : > { %7599 = vmatmul.mubr.msk.bf16.gmra.mrb[16].mxu1 %vm685_vm2, %v10381_v14  ;;  %12017 = vst [vmem:[#allocation8_spill] sm:$0xff] %v10445_v54 }
 0x129   : > { %7602 = vmatprep.mubr.msk.bf16.mxu1 %vm9669_vm1, %v9668_v1 }
 0x12b   : > { %8131 = vmatmul.mubr.msk.bf16.gmra.mrb[76].mxu0 %vm685_vm2, %v3289_v48  ;;  %v3295_v48 = vrot.slane %v11980_v22, 3 }
 0x12c   : > { %8134 = vmatprep.mubr.msk.bf16.mxu0 %vm9669_vm1, %v9668_v1 }
 0x12d   : > { %v3296_v35 = vor.u32 %v3295_v48, %v3294_v38 }
 0x12f   : > { %v3297_v22 = vsel %vm3201_vm5, %v3292_v58, %v3296_v35  ;;  %v11985_v58 = vshll.u32 %v10428_v45, 16 }
 0x130   : > { %7603 = vmatmul.mubr.msk.bf16.gmra.mrb[20].mxu1 %vm685_vm2, %v10401_v6 }
 0x131   : > { %7606 = vmatprep.mubr.msk.bf16.mxu1 %vm9669_vm1, %v9668_v1 }
 0x133   : > { %8135 = vmatmul.mubr.msk.bf16.gmra.mrb[80].mxu0 %vm685_vm2, %v3293_v61  ;;  %v3299_v61 = vrot.slane %v11983_v15, 3 }
 0x134   : > { %8138 = vmatprep.mubr.msk.bf16.mxu0 %vm9669_vm1, %v9668_v1 }
 0x135   : > { %v3300_v38 = vor.u32 %v3299_v61, %v3298_v44 }
 0x137   : > { %v3301_v48 = vsel %vm3201_vm5, %v3296_v35, %v3300_v38  ;;  %v11987_v35 = vshll.u32 %v10445_v54, 16 }
 0x138   : > { %7607 = vmatmul.mubr.msk.bf16.gmra.mrb[24].mxu1 %vm685_vm2, %v9828_v63  ;;  %v11986_v63 = vshrl.u32 %v10428_v45, 16  ;;  %v3792_v45 = vld [vmem:[%s9746_s29 + $0xe8] sm:$0xf] }
 0x139   : > { %7610 = vmatprep.mubr.msk.bf16.mxu1 %vm9669_vm1, %v9668_v1 }
 0x13a   : > { %v3302_v15 = vrot.slane %v11986_v63, 2  ;;  %v10462_v63 = vld [vmem:[%s9746_s29 + $0xd8] sm:$0xff]  }
 0x13b   : > { %8139 = vmatmul.mubr.msk.bf16.gmra.mrb[84].mxu0 %vm685_vm2, %v3297_v22  ;;  %v3303_v22 = vrot.slane %v11985_v58, 3  ;;  %12018 = vst [vmem:[#allocation9_spill] sm:$0xff] %v10462_v63 }
 0x13c   : > { %8142 = vmatprep.mubr.msk.bf16.mxu0 %vm9669_vm1, %v9668_v1 }
 0x13d   : > { %v3304_v44 = vor.u32 %v3303_v22, %v3302_v15  ;;  %v11989_v15 = vshrl.u32 %v10462_v63, 16 }
 0x13f   : > { %v3305_v61 = vsel %vm3201_vm5, %v3300_v38, %v3304_v44  ;;  %v11990_v38 = vshll.u32 %v10462_v63, 16 }
 0x140   : > { %7611 = vmatmul.mubr.msk.bf16.gmra.mrb[28].mxu1 %vm685_vm2, %v9844_v12  ;;  %v11988_v12 = vshrl.u32 %v10445_v54, 16 }
 0x141   : > { %7614 = vmatprep.mubr.msk.bf16.mxu1 %vm9669_vm1, %v9668_v1 }
 0x142   : > { %v3306_v58 = vrot.slane %v11988_v12, 2  ;;  %v10479_v12 = vld [vmem:[%s9746_s29 + $0xe0] sm:$0xff]  }
 0x143   : > { %8143 = vmatmul.mubr.msk.bf16.gmra.mrb[88].mxu0 %vm685_vm2, %v3301_v48  ;;  %v3307_v48 = vrot.slane %v11987_v35, 3  ;;  %v3310_v35 = vrot.slane %v11989_v15, 2  ;;  %12019 = vst [vmem:[#allocation10_spill] sm:$0xff] %v10479_v12  ;;  %v3195_v15 = vld [vmem:[%s9746_s29 + $0xec] sm:$0x7] }
 0x144   : > { %8146 = vmatprep.mubr.msk.bf16.mxu0 %vm9669_vm1, %v9668_v1 }
 0x148   : > { %7615 = vmatmul.mubr.msk.bf16.gmra.mrb[32].mxu1 %vm685_vm2, %v9861_v23  ;;  %v3308_v23 = vor.u32 %v3307_v48, %v3306_v58  ;;  %v1899_v48 = vld [vmem:[%s9746_s29 + $0xe8] sm:$0xf] }
 0x149   : > { %7618 = vmatprep.mubr.msk.bf16.mxu1 %vm9669_vm1, %v9668_v1  ;;  %v6730_v54 = vcombine.low %v1899_v48, %v3195_v15 }
 0x14a   : > { %v3309_v22 = vsel %vm3201_vm5, %v3304_v44, %v3308_v23  ;;  %v11995_v44 = vshll.u32 %v10479_v12, 16 }
 0x14b   : > { %8147 = vmatmul.mubr.msk.bf16.gmra.mrb[92].mxu0 %vm685_vm2, %v3305_v61  ;;  %v3311_v61 = vrot.slane %v11990_v38, 3 }
 0x14c   : > { %8150 = vmatprep.mubr.msk.bf16.mxu0 %vm9669_vm1, %v9668_v1 }
 0x14d   : > { %v3312_v58 = vor.u32 %v3311_v61, %v3310_v35 }
 0x14f   : > { %v3313_v38 = vsel %vm3201_vm5, %v3308_v23, %v3312_v58  ;;  %v3322_v23 = vshll.u32 %v6730_v54, 16 }
 0x150   : > { %7619 = vmatmul.mubr.msk.bf16.gmra.mrb[36].mxu1 %vm685_vm2, %v9878_v32  ;;  %v11996_v32 = vshrl.u32 %v10479_v12, 16  ;;  %v3790_v12 = vld [vmem:[%s9746_s29 + $0xe0] sm:$0xf] }
 0x151   : > { %7622 = vmatprep.mubr.msk.bf16.mxu1 %vm9669_vm1, %v9668_v1  ;;  %v3324_v48 = vrot.slane %v3322_v23, 3 }
 0x152   : > { %v3314_v63 = vrot.slane %v11996_v32, 2  ;;  %v3788_v32 = vld [vmem:[%s9746_s29 + $0xd8] sm:$0xf] }
 0x153   : > { %8151 = vmatmul.mubr.msk.bf16.gmra.mrb[96].mxu0 %vm685_vm2, %v3309_v22  ;;  %v3315_v22 = vrot.slane %v11995_v44, 3  ;;  %v3786_v44 = vld [vmem:[%s9746_s29 + $0xd0] sm:$0xf] }
 0x154   : > { %8154 = vmatprep.mubr.msk.bf16.mxu0 %vm9669_vm1, %v9668_v1 }
 0x155   : > { %v3316_v35 = vor.u32 %v3315_v22, %v3314_v63  ;;  %v3741_v22 = vld [vmem:[%s9746_s29 + $0x1c] sm:$0xf] }
 0x157   : > { %v3317_v15 = vsel %vm3201_vm5, %v3312_v58, %v3316_v35  ;;  %v3740_v58 = vld [vmem:[%s9746_s29 + $0x18] sm:$0xf] }
 0x158   : > { %7623 = vmatmul.mubr.msk.bf16.gmra.mrb[40].mxu1 %vm685_vm2, %v9895_v43  ;;  %v3319_v43 = vshrl.u32 %v6730_v54, 16 }
 0x159   : > { %7626 = vmatprep.mubr.msk.bf16.mxu1 %vm9669_vm1, %v9668_v1 }
 0x15a   : > { %v3321_v61 = vrot.slane %v3319_v43, 2 }
 0x15b   : > { %8155 = vmatmul.mubr.msk.bf16.gmra.mrb[100].mxu0 %vm685_vm2, %v3313_v38  ;;  %v3739_v38 = vld [vmem:[%s9746_s29 + $0x14] sm:$0xf] }
 0x15c   : > { %8158 = vmatprep.mubr.msk.bf16.mxu0 %vm9669_vm1, %v9668_v1  ;;  %v3325_v63 = vor.u32 %v3324_v48, %v3321_v61  ;;  %v6819_v61 = vld [vmem:[%s11934_s1 + $0xe] sm:$0x3] }
 0x15e   : > { %v3326_v54 = vsel %vm3201_vm5, %v3316_v35, %v3325_v63  ;;  %v10526_v35 = vcombine.low %v3740_v58, %v3741_v22 }
 0x160   : > { %7627 = vmatmul.mubr.msk.bf16.gmra.mrb[44].mxu1 %vm685_vm2, %v9912_v53  ;;  %v3738_v53 = vld [vmem:[%s9746_s29 + $0x10] sm:$0x8]  ;;  %v3945_v23 = vrot.slane %v10526_v35, 3 }
 0x161   : > { %7630 = vmatprep.mubr.msk.bf16.mxu1 %vm9669_vm1, %v9668_v1 }
 0x163   : > { %8159 = vmatmul.mubr.msk.bf16.gmra.mrb[104].mxu0 %vm685_vm2, %v3317_v15  ;;  %v3743_v15 = vld [vmem:[%s9746_s29 + $0x24] sm:$0xf] }
 0x164   : > { %8162 = vmatprep.mubr.msk.bf16.mxu0 %vm9669_vm1, %v9668_v1 }
 0x168   : > { %7631 = vmatmul.mubr.msk.bf16.gmra.mrb[48].mxu1 %vm685_vm2, %v9929_v0  ;;  %v10524_v0 = vcombine.low %v3738_v53, %v3739_v38  ;;  %v3745_v38 = vld [vmem:[%s9746_s29 + $0x2c] sm:$0xf] }
 0x169   : > { %7634 = vmatprep.mubr.msk.bf16.mxu1 %vm9669_vm1, %v9668_v1 }
 0x16a   : > { %v3944_v43 = vrot.slane %v10524_v0, 3 }
 0x16b   : > { %8163 = vmatmul.mubr.msk.bf16.gmra.mrb[108].mxu0 %vm685_vm2, %v3326_v54  ;;  %v4767_v54 = vsel %vm773_vm0, %v6819_v61, 0 }
 0x16c   : > { %8166 = vmatprep.mubr.msk.bf16.mxu0 %vm9669_vm1, %v9668_v1  ;;  %v3946_v48 = vsel %vm3943_vm6, %v3944_v43, %v3945_v23 }
 0x170   : > { %7635 = vmatmul.mubr.msk.bf16.gmra.mrb[52].mxu1 %vm685_vm2, %v9946_v16  ;;  %v3742_v16 = vld [vmem:[%s9746_s29 + $0x20] sm:$0xf] }
 0x171   : > { %7638 = vmatprep.mubr.msk.bf16.mxu1 %vm9669_vm1, %v9668_v1 }
 0x173   : > { %8167 = vmatmul.mubr.msk.bf16.gmra.mrb[112].mxu0 %vm685_vm2, %v3325_v63  ;;  %v10543_v63 = vcombine.low %v3742_v16, %v3743_v15  ;;  %v3746_v16 = vld [vmem:[%s9746_s29 + $0x30] sm:$0xf]  ;;  %v3747_v15 = vld [vmem:[%s9746_s29 + $0x34] sm:$0xf] }
 0x174   : > { %8172 = vmatprep.mubr.msk.bf16.mxu0 %vm9669_vm1, %v9668_v1 }
 0x175   : > { %v3947_v53 = vrot.slane %v10543_v63, 3 }
 0x177   : > { %v3948_v58 = vsel %vm3943_vm6, %v3945_v23, %v3947_v53  ;;  %v10571_v23 = vcombine.low %v3746_v16, %v3747_v15  ;;  %v3752_v15 = vld [vmem:[%s9746_s29 + $0x48] sm:$0xf] }
 0x178   : > { %7639 = vmatmul.mubr.msk.bf16.gmra.mrb[56].mxu1 %vm685_vm2, %v9963_v29  ;;  %v3744_v29 = vld [vmem:[%s9746_s29 + $0x28] sm:$0xf] }
 0x179   : > { %7642 = vmatprep.mubr.msk.bf16.mxu1 %vm9669_vm1, %v9668_v1  ;;  %v10558_v22 = vcombine.low %v3744_v29, %v3745_v38  ;;  %v3951_v61 = vrot.slane %v10571_v23, 3  ;;  %v3750_v38 = vld [vmem:[%s9746_s29 + $0x40] sm:$0xf] }
 0x17b   : > { %8173 = vmatmul.mubr.msk.bf16.vlgmr.msra.gmra.mrb[0].mxu0 %vm685_vm2, %v3946_v48  ;;  %v3949_v43 = vrot.slane %v10558_v22, 3  ;;  %v3748_v48 = vld [vmem:[%s9746_s29 + $0x38] sm:$0xf] }
 0x17c   : > { %8289 = vmatpush3.bf16.msra.mxu0 %v4767_v54  ;;  %8176 = vmatprep.mubr.msk.bf16.mxu0 %vm9669_vm1, %v9668_v1  ;;  %v3749_v54 = vld [vmem:[%s9746_s29 + $0x3c] sm:$0xf] }
 0x17d   : > { %8406 = vmatprep.subr.bf16.mxu0 %v9668_v1 }
 0x180   : > { %7643 = vmatmul.mubr.msk.bf16.gmra.mrb[60].mxu1 %vm685_vm2, %v9980_v41  ;;  %v3950_v41 = vsel %vm3943_vm6, %v3947_v53, %v3949_v43  ;;  %v10584_v53 = vcombine.low %v3748_v48, %v3749_v54  ;;  %v3754_v54 = vld [vmem:[%s9746_s29 + $0x50] sm:$0xf] }
 0x181   : > { %7646 = vmatprep.mubr.msk.bf16.mxu1 %vm9669_vm1, %v9668_v1 }
 0x182   : > { %v3953_v29 = vrot.slane %v10584_v53, 3 }
 0x183   : > { %8177 = vmatmul.mubr.msk.bf16.gmra.mrb[4].mxu0 %vm685_vm2, %v3948_v58  ;;  %v3751_v58 = vld [vmem:[%s9746_s29 + $0x44] sm:$0xf] }
 0x184   : > { %8180 = vmatprep.mubr.msk.bf16.mxu0 %vm9669_vm1, %v9668_v1 }
 0x188   : > { %7647 = vmatmul.mubr.msk.bf16.gmra.mrb[64].mxu1 %vm685_vm2, %v10004_v3  ;;  %v3952_v3 = vsel %vm3943_vm6, %v3949_v43, %v3951_v61  ;;  %v10597_v43 = vcombine.low %v3750_v38, %v3751_v58  ;;  %v3756_v58 = vld [vmem:[%s9746_s29 + $0x58] sm:$0xf] }
 0x189   : > { %7650 = vmatprep.mubr.msk.bf16.mxu1 %vm9669_vm1, %v9668_v1 }
 0x18a   : > { %v3955_v16 = vrot.slane %v10597_v43, 3 }
 0x18b   : > { %8181 = vmatmul.mubr.msk.bf16.gmra.mrb[8].mxu0 %vm685_vm2, %v3950_v41  ;;  %v3753_v41 = vld [vmem:[%s9746_s29 + $0x4c] sm:$0xf] }
 0x18c   : > { %8184 = vmatprep.mubr.msk.bf16.mxu0 %vm9669_vm1, %v9668_v1 }
 0x190   : > { %7651 = vmatmul.mubr.msk.bf16.gmra.mrb[68].mxu1 %vm685_vm2, %v10027_v31  ;;  %v3954_v31 = vsel %vm3943_vm6, %v3951_v61, %v3953_v29  ;;  %v10610_v61 = vcombine.low %v3752_v15, %v3753_v41  ;;  %v3758_v41 = vld [vmem:[%s9746_s29 + $0x60] sm:$0xf] }
 0x191   : > { %7654 = vmatprep.mubr.msk.bf16.mxu1 %vm9669_vm1, %v9668_v1 }
 0x192   : > { %v3957_v48 = vrot.slane %v10610_v61, 3 }
 0x193   : > { %8185 = vmatmul.mubr.msk.bf16.gmra.mrb[12].mxu0 %vm685_vm2, %v3952_v3  ;;  %v3755_v3 = vld [vmem:[%s9746_s29 + $0x54] sm:$0xf] }
 0x194   : > { %8188 = vmatprep.mubr.msk.bf16.mxu0 %vm9669_vm1, %v9668_v1 }
 0x198   : > { %7655 = vmatmul.mubr.msk.bf16.gmra.mrb[72].mxu1 %vm685_vm2, %v10047_v56  ;;  %v3956_v56 = vsel %vm3943_vm6, %v3953_v29, %v3955_v16  ;;  %v10623_v29 = vcombine.low %v3754_v54, %v3755_v3  ;;  %v3760_v3 = vld [vmem:[%s9746_s29 + $0x68] sm:$0xf] }
 0x199   : > { %7658 = vmatprep.mubr.msk.bf16.mxu1 %vm9669_vm1, %v9668_v1 }
 0x19a   : > { %v3959_v38 = vrot.slane %v10623_v29, 3 }
 0x19b   : > { %8189 = vmatmul.mubr.msk.bf16.gmra.mrb[16].mxu0 %vm685_vm2, %v3954_v31  ;;  %v3757_v31 = vld [vmem:[%s9746_s29 + $0x5c] sm:$0xf] }
 0x19c   : > { %8192 = vmatprep.mubr.msk.bf16.mxu0 %vm9669_vm1, %v9668_v1 }
 0x1a0   : > { %7659 = vmatmul.mubr.msk.bf16.gmra.mrb[76].mxu1 %vm685_vm2, %v10066_v21  ;;  %v3958_v21 = vsel %vm3943_vm6, %v3955_v16, %v3957_v48  ;;  %v10636_v16 = vcombine.low %v3756_v58, %v3757_v31  ;;  %v3762_v31 = vld [vmem:[%s9746_s29 + $0x70] sm:$0xf] }
 0x1a1   : > { %7662 = vmatprep.mubr.msk.bf16.mxu1 %vm9669_vm1, %v9668_v1 }
 0x1a2   : > { %v3961_v15 = vrot.slane %v10636_v16, 3 }
 0x1a3   : > { %8193 = vmatmul.mubr.msk.bf16.gmra.mrb[20].mxu0 %vm685_vm2, %v3956_v56  ;;  %v3759_v56 = vld [vmem:[%s9746_s29 + $0x64] sm:$0xf] }
 0x1a4   : > { %8196 = vmatprep.mubr.msk.bf16.mxu0 %vm9669_vm1, %v9668_v1 }
 0x1a8   : > { %7663 = vmatmul.mubr.msk.bf16.gmra.mrb[80].mxu1 %vm685_vm2, %v10085_v52  ;;  %v3960_v52 = vsel %vm3943_vm6, %v3957_v48, %v3959_v38  ;;  %v10649_v48 = vcombine.low %v3758_v41, %v3759_v56  ;;  %v3764_v56 = vld [vmem:[%s9746_s29 + $0x78] sm:$0xf] }
 0x1a9   : > { %7666 = vmatprep.mubr.msk.bf16.mxu1 %vm9669_vm1, %v9668_v1 }
 0x1aa   : > { %v3963_v54 = vrot.slane %v10649_v48, 3 }
 0x1ab   : > { %8197 = vmatmul.mubr.msk.bf16.gmra.mrb[24].mxu0 %vm685_vm2, %v3958_v21  ;;  %v3761_v21 = vld [vmem:[%s9746_s29 + $0x6c] sm:$0xf] }
 0x1ac   : > { %8200 = vmatprep.mubr.msk.bf16.mxu0 %vm9669_vm1, %v9668_v1 }
 0x1b0   : > { %7667 = vmatmul.mubr.msk.bf16.gmra.mrb[84].mxu1 %vm685_vm2, %v10104_v27  ;;  %v3962_v27 = vsel %vm3943_vm6, %v3959_v38, %v3961_v15  ;;  %v10662_v38 = vcombine.low %v3760_v3, %v3761_v21  ;;  %v3766_v21 = vld [vmem:[%s9746_s29 + $0x80] sm:$0xf] }
 0x1b1   : > { %7670 = vmatprep.mubr.msk.bf16.mxu1 %vm9669_vm1, %v9668_v1 }
 0x1b2   : > { %v3965_v58 = vrot.slane %v10662_v38, 3 }
 0x1b3   : > { %8201 = vmatmul.mubr.msk.bf16.gmra.mrb[28].mxu0 %vm685_vm2, %v3960_v52  ;;  %v3763_v52 = vld [vmem:[%s9746_s29 + $0x74] sm:$0xf] }
 0x1b4   : > { %8204 = vmatprep.mubr.msk.bf16.mxu0 %vm9669_vm1, %v9668_v1 }
 0x1b8   : > { %7671 = vmatmul.mubr.msk.bf16.gmra.mrb[88].mxu1 %vm685_vm2, %v10123_v5  ;;  %v3964_v5 = vsel %vm3943_vm6, %v3961_v15, %v3963_v54  ;;  %v10675_v15 = vcombine.low %v3762_v31, %v3763_v52  ;;  %v3768_v52 = vld [vmem:[%s9746_s29 + $0x88] sm:$0xf] }
 0x1b9   : > { %7674 = vmatprep.mubr.msk.bf16.mxu1 %vm9669_vm1, %v9668_v1 }
 0x1ba   : > { %v3967_v41 = vrot.slane %v10675_v15, 3 }
 0x1bb   : > { %8205 = vmatmul.mubr.msk.bf16.gmra.mrb[32].mxu0 %vm685_vm2, %v3962_v27  ;;  %v3765_v27 = vld [vmem:[%s9746_s29 + $0x7c] sm:$0xf] }
 0x1bc   : > { %8208 = vmatprep.mubr.msk.bf16.mxu0 %vm9669_vm1, %v9668_v1 }
 0x1c0   : > { %7675 = vmatmul.mubr.msk.bf16.gmra.mrb[92].mxu1 %vm685_vm2, %v10142_v62  ;;  %v3966_v62 = vsel %vm3943_vm6, %v3963_v54, %v3965_v58  ;;  %v10688_v54 = vcombine.low %v3764_v56, %v3765_v27  ;;  %v1368_v56 = vld [vmem:[%s9746_s29] sm:$0xe]  ;;  %v6578_v27 = vcombine.low %v10229_v57, %v10229_v57 }
 0x1c1   : > { %7678 = vmatprep.mubr.msk.bf16.mxu1 %vm9669_vm1, %v9668_v1 }
 0x1c2   : > { %v3969_v3 = vrot.slane %v10688_v54, 3 }
 0x1c3   : > { %8209 = vmatmul.mubr.msk.bf16.gmra.mrb[36].mxu0 %vm685_vm2, %v3964_v5  ;;  %v3767_v5 = vld [vmem:[%s9746_s29 + $0x84] sm:$0xf] }
 0x1c4   : > { %8212 = vmatprep.mubr.msk.bf16.mxu0 %vm9669_vm1, %v9668_v1 }
 0x1c8   : > { %7679 = vmatmul.mubr.msk.bf16.gmra.mrb[96].mxu1 %vm685_vm2, %v10161_v50  ;;  %v3968_v50 = vsel %vm3943_vm6, %v3965_v58, %v3967_v41  ;;  %v10701_v58 = vcombine.low %v3766_v21, %v3767_v5  ;;  %v9551_v21 = vld [vmem:[%s9746_s29 + $0x4] sm:$0xf]  ;;  %v3771_v5 = vld [vmem:[%s9746_s29 + $0x94] sm:$0xf] }
 0x1c9   : > { %7682 = vmatprep.mubr.msk.bf16.mxu1 %vm9669_vm1, %v9668_v1 }
 0x1ca   : > { %v3971_v31 = vrot.slane %v10701_v58, 3 }
 0x1cb   : > { %8213 = vmatmul.mubr.msk.bf16.gmra.mrb[40].mxu0 %vm685_vm2, %v3966_v62  ;;  %v3769_v62 = vld [vmem:[%s9746_s29 + $0x8c] sm:$0xf] }
 0x1cc   : > { %8216 = vmatprep.mubr.msk.bf16.mxu0 %vm9669_vm1, %v9668_v1 }
 0x1d0   : > { %7683 = vmatmul.mubr.msk.bf16.gmra.mrb[100].mxu1 %vm685_vm2, %v10180_v47  ;;  %v3970_v47 = vsel %vm3943_vm6, %v3967_v41, %v3969_v3  ;;  %v10714_v41 = vcombine.low %v3768_v52, %v3769_v62  ;;  %v1376_v62 = vrot.slane %v10321_v10, 1 }
 0x1d1   : > { %7686 = vmatprep.mubr.msk.bf16.mxu1 %vm9669_vm1, %v9668_v1 }
 0x1d3   : > { %8217 = vmatmul.mubr.msk.bf16.gmra.mrb[44].mxu0 %vm685_vm2, %v3968_v50  ;;  %v3973_v50 = vrot.slane %v10714_v41, 3 }
 0x1d4   : > { %8220 = vmatprep.mubr.msk.bf16.mxu0 %vm9669_vm1, %v9668_v1 }
 0x1d8   : > { %7687 = vmatmul.mubr.msk.bf16.gmra.mrb[104].mxu1 %vm685_vm2, %v10199_v20  ;;  %v3972_v20 = vsel %vm3943_vm6, %v3969_v3, %v3971_v31  ;;  %v3770_v3 = vld [vmem:[%s9746_s29 + $0x90] sm:$0xf] }
 0x1d9   : > { %7690 = vmatprep.mubr.msk.bf16.mxu1 %vm9669_vm1, %v9668_v1  ;;  %v10730_v52 = vcombine.low %v3770_v3, %v3771_v5  ;;  %v1378_v5 = vrot.slane %v10341_v55, 1 }
 0x1db   : > { %8221 = vmatmul.mubr.msk.bf16.gmra.mrb[48].mxu0 %vm685_vm2, %v3970_v47  ;;  %v3974_v47 = vsel %vm3943_vm6, %v3971_v31, %v3973_v50  ;;  %v3975_v31 = vrot.slane %v10730_v52, 3 }
 0x1dc   : > { %8224 = vmatprep.mubr.msk.bf16.mxu0 %vm9669_vm1, %v9668_v1 }
 0x1e0   : > { %7691 = vmatmul.mubr.msk.bf16.gmra.mrb[108].mxu1 %vm685_vm2, %v10218_v4  ;;  %v6609_v4 = vcombine.low %v1368_v56, %v9551_v21  ;;  %v3773_v21 = vld [vmem:[%s9746_s29 + $0x9c] sm:$0xf] }
 0x1e1   : > { %7694 = vmatprep.mubr.msk.bf16.mxu1 %vm9669_vm1, %v9668_v1 }
 0x1e2   : > { %v1375_v57 = vrot.slane %v6609_v4, 1  ;;  %v3976_v4 = vsel %vm3943_vm6, %v3973_v50, %v3975_v31  ;;  %v1379_v50 = vsel %vm1374_vm7, %v1376_v62, %v1378_v5 }
 0x1e3   : > { %8225 = vmatmul.mubr.msk.bf16.gmra.mrb[52].mxu0 %vm685_vm2, %v3972_v20  ;;  %v6639_v20 = vld [vmem:[%s11934_s1 + $0x6] sm:$0x3] }
 0x1e4   : > { %8228 = vmatprep.mubr.msk.bf16.mxu0 %vm9669_vm1, %v9668_v1  ;;  %v1377_v56 = vsel %vm1374_vm7, %v1375_v57, %v1376_v62  ;;  %v2397_v10 = vsel %vm773_vm0, %v6639_v20, 0  ;;  %v3774_v57 = vld [vmem:[%s9746_s29 + $0xa0] sm:$0xf]  ;;  %v3775_v20 = vld [vmem:[%s9746_s29 + $0xa4] sm:$0xf] }
 0x1e5   : > { %v10763_v55 = vcombine.low %v3774_v57, %v3775_v20  ;;  %v3778_v20 = vld [vmem:[%s9746_s29 + $0xb0] sm:$0xf] }
 0x1e7   : > { %v3979_v62 = vrot.slane %v10763_v55, 3 }
 0x1e8   : > { %7695 = vmatmul.mubr.msk.bf16.gmra.mrb[112].mxu1 %vm685_vm2, %v6578_v27  ;;  %v3772_v27 = vld [vmem:[%s9746_s29 + $0x98] sm:$0xf] }
 0x1e9   : > { %7700 = vmatprep.mubr.msk.bf16.mxu1 %vm9669_vm1, %v9668_v1  ;;  %v10748_v3 = vcombine.low %v3772_v27, %v3773_v21  ;;  %v1380_v27 = vrot.slane %v10361_v30, 1  ;;  %v1382_v30 = vrot.slane %v10381_v14, 1  ;;  %v1384_v14 = vrot.slane %v10401_v6, 1  ;;  %v9552_v6 = vld [vmem:[%s9746_s29 + $0x30] sm:$0xff]  }
 0x1eb   : > { %8229 = vmatmul.mubr.msk.bf16.gmra.mrb[56].mxu0 %vm685_vm2, %v3974_v47  ;;  %v3977_v47 = vrot.slane %v10748_v3, 3  ;;  %v1381_v21 = vsel %vm1374_vm7, %v1378_v5, %v1380_v27  ;;  %v1383_v57 = vsel %vm1374_vm7, %v1380_v27, %v1382_v30 }
 0x1ec   : > { %8232 = vmatprep.mubr.msk.bf16.mxu0 %vm9669_vm1, %v9668_v1 }
 0x1f0   : > { %7701 = vmatmul.mubr.msk.bf16.vlgmr.msra.gmra.mrb[0].mxu1 %vm685_vm2, %v1377_v56  ;;  %v3978_v56 = vsel %vm3943_vm6, %v3975_v31, %v3977_v47  ;;  %v3777_v31 = vld [vmem:[%s9746_s29 + $0xac] sm:$0xf] }
 0x1f1   : > { %7817 = vmatpush3.bf16.msra.mxu1 %v2397_v10  ;;  %7704 = vmatprep.mubr.msk.bf16.mxu1 %vm9669_vm1, %v9668_v1  ;;  %v3776_v10 = vld [vmem:[%s9746_s29 + $0xa8] sm:$0xf] }
 0x1f2   : > { %8524 = vmatprep.subr.bf16.mxu1 %v9668_v1 }
 0x1f3   : > { %8233 = vmatmul.mubr.msk.bf16.gmra.mrb[60].mxu0 %vm685_vm2, %v3976_v4  ;;  %v3980_v4 = vsel %vm3943_vm6, %v3977_v47, %v3979_v62  ;;  %v3779_v47 = vld [vmem:[%s9746_s29 + $0xb4] sm:$0xf] }
 0x1f4   : > { %8236 = vmatprep.mubr.msk.bf16.mxu0 %vm9669_vm1, %v9668_v1 }
 0x1f8   : > { %7705 = vmatmul.mubr.msk.bf16.gmra.mrb[4].mxu1 %vm685_vm2, %v1379_v50  ;;  %v10777_v50 = vcombine.low %v3776_v10, %v3777_v31  ;;  %v1385_v10 = vsel %vm1374_vm7, %v1382_v30, %v1384_v14  ;;  %v3780_v31 = vld [vmem:[%s9746_s29 + $0xb8] sm:$0xf] }
 0x1f9   : > { %7708 = vmatprep.mubr.msk.bf16.mxu1 %vm9669_vm1, %v9668_v1 }
 0x1fa   : > { %v3981_v5 = vrot.slane %v10777_v50, 3 }
 0x1fb   : > { %8237 = vmatmul.mubr.msk.bf16.gmra.mrb[64].mxu0 %vm685_vm2, %v3978_v56 }
 0x1fc   : > { %8240 = vmatprep.mubr.msk.bf16.mxu0 %vm9669_vm1, %v9668_v1  ;;  %v3982_v56 = vsel %vm3943_vm6, %v3979_v62, %v3981_v5  ;;  %v3781_v62 = vld [vmem:[%s9746_s29 + $0xbc] sm:$0xf] }
 0x200   : > { %7709 = vmatmul.mubr.msk.bf16.gmra.mrb[8].mxu1 %vm685_vm2, %v1381_v21  ;;  %v10791_v21 = vcombine.low %v3778_v20, %v3779_v47  ;;  %v1386_v20 = vrot.slane %v9552_v6, 1 }
 0x201   : > { %7712 = vmatprep.mubr.msk.bf16.mxu1 %vm9669_vm1, %v9668_v1 }
 0x202   : > { %v3983_v27 = vrot.slane %v10791_v21, 3  ;;  %v1387_v47 = vsel %vm1374_vm7, %v1384_v14, %v1386_v20 }
 0x203   : > { %8241 = vmatmul.mubr.msk.bf16.gmra.mrb[68].mxu0 %vm685_vm2, %v3980_v4 }
 0x204   : > { %8244 = vmatprep.mubr.msk.bf16.mxu0 %vm9669_vm1, %v9668_v1  ;;  %v3984_v4 = vsel %vm3943_vm6, %v3981_v5, %v3983_v27  ;;  %v3783_v5 = vld [vmem:[%s9746_s29 + $0xc4] sm:$0xf] }
 0x208   : > { %7713 = vmatmul.mubr.msk.bf16.gmra.mrb[12].mxu1 %vm685_vm2, %v1383_v57  ;;  %v10805_v57 = vcombine.low %v3780_v31, %v3781_v62  ;;  %v9553_v62 = vld [vmem:[%s9746_s29 + $0x38] sm:$0xff]  }
 0x209   : > { %7716 = vmatprep.mubr.msk.bf16.mxu1 %vm9669_vm1, %v9668_v1 }
 0x20a   : > { %v3985_v30 = vrot.slane %v10805_v57, 3 }
 0x20b   : > { %8245 = vmatmul.mubr.msk.bf16.gmra.mrb[72].mxu0 %vm685_vm2, %v3982_v56  ;;  %v3782_v56 = vld [vmem:[%s9746_s29 + $0xc0] sm:$0xf] }
 0x20c   : > { %8248 = vmatprep.mubr.msk.bf16.mxu0 %vm9669_vm1, %v9668_v1  ;;  %v10819_v31 = vcombine.low %v3782_v56, %v3783_v5 }
 0x20e   : > { %v3987_v14 = vrot.slane %v10819_v31, 3 }
 0x210   : > { %7717 = vmatmul.mubr.msk.bf16.gmra.mrb[16].mxu1 %vm685_vm2, %v1385_v10  ;;  %v3986_v10 = vsel %vm3943_vm6, %v3983_v27, %v3985_v30  ;;  %v3785_v27 = vld [vmem:[%s9746_s29 + $0xcc] sm:$0xf]  ;;  %v3988_v56 = vsel %vm3943_vm6, %v3985_v30, %v3987_v14  ;;  %v3787_v30 = vld [vmem:[%s9746_s29 + $0xd4] sm:$0xf] }
 0x211   : > { %7720 = vmatprep.mubr.msk.bf16.mxu1 %vm9669_vm1, %v9668_v1 }
 0x213   : > { %8249 = vmatmul.mubr.msk.bf16.gmra.mrb[76].mxu0 %vm685_vm2, %v3984_v4  ;;  %v1388_v4 = vrot.slane %v9553_v62, 1 }
 0x214   : > { %8252 = vmatprep.mubr.msk.bf16.mxu0 %vm9669_vm1, %v9668_v1 }
 0x215   : > { %v1389_v6 = vsel %vm1374_vm7, %v1386_v20, %v1388_v4 }
 0x218   : > { %7721 = vmatmul.mubr.msk.bf16.gmra.mrb[20].mxu1 %vm685_vm2, %v1387_v47  ;;  %v3784_v47 = vld [vmem:[%s9746_s29 + $0xc8] sm:$0xf] }
 0x219   : > { %7724 = vmatprep.mubr.msk.bf16.mxu1 %vm9669_vm1, %v9668_v1  ;;  %v10833_v5 = vcombine.low %v3784_v47, %v3785_v27  ;;  %v10847_v27 = vcombine.low %v3786_v44, %v3787_v30 }
 0x21b   : > { %8253 = vmatmul.mubr.msk.bf16.gmra.mrb[80].mxu0 %vm685_vm2, %v3986_v10  ;;  %v9554_v10 = vld [vmem:[%s9746_s29 + $0x40] sm:$0xff]   ;;  %v3989_v20 = vrot.slane %v10833_v5, 3 }
 0x21c   : > { %8256 = vmatprep.mubr.msk.bf16.mxu0 %vm9669_vm1, %v9668_v1  ;;  %v1390_v62 = vrot.slane %v9554_v10, 1 }
 0x21d   : > { %v3990_v47 = vsel %vm3943_vm6, %v3987_v14, %v3989_v20  ;;  %v3789_v14 = vld [vmem:[%s9746_s29 + $0xdc] sm:$0xf] }
 0x21e   : > { %v10861_v30 = vcombine.low %v3788_v32, %v3789_v14 }
 0x220   : > { %7725 = vmatmul.mubr.msk.bf16.gmra.mrb[24].mxu1 %vm685_vm2, %v1389_v6  ;;  %v1391_v6 = vsel %vm1374_vm7, %v1388_v4, %v1390_v62  ;;  %v3991_v4 = vrot.slane %v10847_v27, 3 }
 0x221   : > { %7728 = vmatprep.mubr.msk.bf16.mxu1 %vm9669_vm1, %v9668_v1 }
 0x222   : > { %v3992_v44 = vsel %vm3943_vm6, %v3989_v20, %v3991_v4  ;;  %v3791_v20 = vld [vmem:[%s9746_s29 + $0xe4] sm:$0xf] }
 0x223   : > { %8257 = vmatmul.mubr.msk.bf16.gmra.mrb[84].mxu0 %vm685_vm2, %v3988_v56  ;;  %v9555_v56 = vld [vmem:[%s9746_s29 + $0x48] sm:$0xff]   ;;  %v10875_v14 = vcombine.low %v3790_v12, %v3791_v20 }
 0x224   : > { %8260 = vmatprep.mubr.msk.bf16.mxu0 %vm9669_vm1, %v9668_v1  ;;  %v1392_v10 = vrot.slane %v9555_v56, 1 }
 0x228   : > { %7729 = vmatmul.mubr.msk.bf16.gmra.mrb[28].mxu1 %vm685_vm2, %v1391_v6  ;;  %v1393_v6 = vsel %vm1374_vm7, %v1390_v62, %v1392_v10  ;;  %v3993_v62 = vrot.slane %v10861_v30, 3 }
 0x229   : > { %7732 = vmatprep.mubr.msk.bf16.mxu1 %vm9669_vm1, %v9668_v1 }
 0x22a   : > { %v3994_v32 = vsel %vm3943_vm6, %v3991_v4, %v3993_v62  ;;  %v3793_v4 = vld [vmem:[%s9746_s29 + $0xec] sm:$0xf] }
 0x22b   : > { %8261 = vmatmul.mubr.msk.bf16.gmra.mrb[88].mxu0 %vm685_vm2, %v3990_v47  ;;  %v9556_v47 = vld [vmem:[%s9746_s29 + $0x50] sm:$0xff]   ;;  %v10889_v20 = vcombine.low %v3792_v45, %v3793_v4 }
 0x22c   : > { %8264 = vmatprep.mubr.msk.bf16.mxu0 %vm9669_vm1, %v9668_v1  ;;  %v1394_v56 = vrot.slane %v9556_v47, 1 }
 0x230   : > { %7733 = vmatmul.mubr.msk.bf16.gmra.mrb[32].mxu1 %vm685_vm2, %v1393_v6  ;;  %v1395_v6 = vsel %vm1374_vm7, %v1392_v10, %v1394_v56  ;;  %v3995_v10 = vrot.slane %v10875_v14, 3 }
 0x231   : > { %7736 = vmatprep.mubr.msk.bf16.mxu1 %vm9669_vm1, %v9668_v1 }
 0x232   : > { %v3996_v12 = vsel %vm3943_vm6, %v3993_v62, %v3995_v10  ;;  %v3795_v62 = vld [vmem:[%s9746_s29 + $0xf4] sm:$0x7] }
 0x233   : > { %8265 = vmatmul.mubr.msk.bf16.gmra.mrb[92].mxu0 %vm685_vm2, %v3992_v44  ;;  %v9557_v44 = vld [vmem:[%s9746_s29 + $0x58] sm:$0xff]  }
 0x234   : > { %8268 = vmatprep.mubr.msk.bf16.mxu0 %vm9669_vm1, %v9668_v1  ;;  %v1396_v47 = vrot.slane %v9557_v44, 1 }
 0x238   : > { %7737 = vmatmul.mubr.msk.bf16.gmra.mrb[36].mxu1 %vm685_vm2, %v1395_v6  ;;  %v1397_v6 = vsel %vm1374_vm7, %v1394_v56, %v1396_v47  ;;  %v3997_v56 = vrot.slane %v10889_v20, 3 }
 0x239   : > { %7740 = vmatprep.mubr.msk.bf16.mxu1 %vm9669_vm1, %v9668_v1 }
 0x23a   : > { %v3998_v45 = vsel %vm3943_vm6, %v3995_v10, %v3997_v56  ;;  %v9560_v10 = vld [vmem:[%s9746_s29 + $0x70] sm:$0xff]  }
 0x23b   : > { %8269 = vmatmul.mubr.msk.bf16.gmra.mrb[96].mxu0 %vm685_vm2, %v3994_v32  ;;  %v9558_v32 = vld [vmem:[%s9746_s29 + $0x60] sm:$0xff]  }
 0x23c   : > { %8272 = vmatprep.mubr.msk.bf16.mxu0 %vm9669_vm1, %v9668_v1  ;;  %v1398_v44 = vrot.slane %v9558_v32, 1 }
 0x23e   : > { %v1399_v46 = vsel %vm1374_vm7, %v1396_v47, %v1398_v44 }
 0x240   : > { %7741 = vmatmul.mubr.msk.bf16.gmra.mrb[40].mxu1 %vm685_vm2, %v1397_v6  ;;  %v10900_v6 = vld [vmem:[%s9746_s29 + $0xf0] sm:$0xf] }
 0x241   : > { %7744 = vmatprep.mubr.msk.bf16.mxu1 %vm9669_vm1, %v9668_v1  ;;  %v6789_v4 = vcombine.low %v10900_v6, %v3795_v62  ;;  %v1402_v62 = vrot.slane %v9560_v10, 1 }
 0x243   : > { %8273 = vmatmul.mubr.msk.bf16.gmra.mrb[100].mxu0 %vm685_vm2, %v3996_v12  ;;  %v9559_v12 = vld [vmem:[%s9746_s29 + $0x68] sm:$0xff]   ;;  %v3999_v47 = vrot.slane %v6789_v4, 3  ;;  %v4423_v4 = vshll.u32 %v10524_v0, 16 }
 0x244   : > { %8276 = vmatprep.mubr.msk.bf16.mxu0 %vm9669_vm1, %v9668_v1  ;;  %v1400_v32 = vrot.slane %v9559_v12, 1 }
 0x245   : > { %v4425_v37 = vrot.slane %v4423_v4, 4 }
 0x246   : > { %v1401_v9 = vsel %vm1374_vm7, %v1398_v44, %v1400_v32  ;;  %v4428_v44 = vshrl.u32 %v10526_v35, 16 }
 0x248   : > { %7745 = vmatmul.mubr.msk.bf16.gmra.mrb[44].mxu1 %vm685_vm2, %v1399_v46  ;;  %v4000_v46 = vsel %vm3943_vm6, %v3997_v56, %v3999_v47  ;;  %v1403_v56 = vsel %vm1374_vm7, %v1400_v32, %v1402_v62  ;;  %v4430_v10 = vrot.slane %v4428_v44, 3  ;;  %v4437_v32 = vshrl.u32 %v10543_v63, 16  ;;  %v6850_v44 = vld [vmem:[%s11934_s1 + $0x10] sm:$0x3] }
 0x249   : > { %7748 = vmatprep.mubr.msk.bf16.mxu1 %vm9669_vm1, %v9668_v1 }
 0x24b   : > { %8277 = vmatmul.mubr.msk.bf16.gmra.mrb[104].mxu0 %vm685_vm2, %v3998_v45  ;;  %v4420_v45 = vshrl.u32 %v10524_v0, 16 }
 0x24c   : > { %8280 = vmatprep.mubr.msk.bf16.mxu0 %vm9669_vm1, %v9668_v1 }
 0x24d   : > { %v4422_v12 = vrot.slane %v4420_v45, 3  ;;  %v4440_v45 = vshll.u32 %v10543_v63, 16 }
 0x24f   : > { %v4426_v0 = vor.u32 %v4425_v37, %v4422_v12  ;;  %v5209_v37 = vsel %vm773_vm0, %v6850_v44, 0  ;;  %v4446_v12 = vshrl.u32 %v10558_v22, 16 }
 0x250   : > { %7749 = vmatmul.mubr.msk.bf16.gmra.mrb[48].mxu1 %vm685_vm2, %v1401_v9  ;;  %v4431_v9 = vshll.u32 %v10526_v35, 16 }
 0x251   : > { %7752 = vmatprep.mubr.msk.bf16.mxu1 %vm9669_vm1, %v9668_v1 }
 0x252   : > { %v4433_v18 = vrot.slane %v4431_v9, 4  ;;  %v4439_v9 = vrot.slane %v4437_v32, 3  ;;  %v4448_v32 = vrot.slane %v4446_v12, 3 }
 0x253   : > { %8281 = vmatmul.mubr.msk.bf16.gmra.mrb[108].mxu0 %vm685_vm2, %v4000_v46  ;;  %v9561_v46 = vld [vmem:[%s9746_s29 + $0x78] sm:$0xff]  }
 0x254   : > { %8284 = vmatprep.mubr.msk.bf16.mxu0 %vm9669_vm1, %v9668_v1  ;;  %v1404_v13 = vrot.slane %v9561_v46, 1  ;;  %v4434_v35 = vor.u32 %v4433_v18, %v4430_v10  ;;  %v9562_v18 = vld [vmem:[%s9746_s29 + $0x80] sm:$0xff]   ;;  %v4449_v10 = vshll.u32 %v10558_v22, 16 }
 0x255   : > { %v1406_v63 = vrot.slane %v9562_v18, 1  ;;  %v9564_v18 = vld [vmem:[%s9746_s29 + $0x90] sm:$0xff]  }
 0x256   : > { %v1405_v4 = vsel %vm1374_vm7, %v1402_v62, %v1404_v13  ;;  %v1410_v12 = vrot.slane %v9564_v18, 1  ;;  %v4482_v18 = vshrl.u32 %v10610_v61, 16 }
 0x257   : > { %v1407_v46 = vsel %vm1374_vm7, %v1404_v13, %v1406_v63  ;;  %v4455_v13 = vshrl.u32 %v10571_v23, 16 }
 0x258   : > { %7753 = vmatmul.mubr.msk.bf16.gmra.mrb[52].mxu1 %vm685_vm2, %v1403_v56  ;;  %v4442_v56 = vrot.slane %v4440_v45, 4  ;;  %v4451_v45 = vrot.slane %v4449_v10, 4  ;;  %v4467_v10 = vshll.u32 %v10584_v53, 16 }
 0x259   : > { %7756 = vmatprep.mubr.msk.bf16.mxu1 %vm9669_vm1, %v9668_v1 }
 0x25a   : > { %v4443_v62 = vor.u32 %v4442_v56, %v4439_v9  ;;  %v4452_v22 = vor.u32 %v4451_v45, %v4448_v32  ;;  %v4457_v56 = vrot.slane %v4455_v13, 3  ;;  %v4469_v32 = vrot.slane %v4467_v10, 4  ;;  %v9565_v45 = vld [vmem:[%s9746_s29 + $0x98] sm:$0xff]  }
 0x25b   : > { %8285 = vmatmul.mubr.msk.bf16.gmra.mrb[112].mxu0 %vm685_vm2, %v3999_v47  ;;  %v4435_v47 = vsel %vm4418_vm8, %v4426_v0, %v4434_v35  ;;  %v4476_v13 = vshll.u32 %v10597_v43, 16  ;;  %v4484_v10 = vrot.slane %v4482_v18, 3 }
 0x25c   : > { %8290 = vmatprep.mubr.msk.bf16.mxu0 %vm9669_vm1, %v9668_v1  ;;  %v4444_v0 = vsel %vm4418_vm8, %v4434_v35, %v4443_v62  ;;  %v4453_v9 = vsel %vm4418_vm8, %v4443_v62, %v4452_v22 }
 0x260   : > { %7757 = vmatmul.mubr.msk.bf16.gmra.mrb[56].mxu1 %vm685_vm2, %v1405_v4  ;;  %v9563_v4 = vld [vmem:[%s9746_s29 + $0x88] sm:$0xff]  }
 0x261   : > { %7760 = vmatprep.mubr.msk.bf16.mxu1 %vm9669_vm1, %v9668_v1  ;;  %v1408_v44 = vrot.slane %v9563_v4, 1  ;;  %v1412_v4 = vrot.slane %v9565_v45, 1  ;;  %v4494_v45 = vshll.u32 %v10623_v29, 16 }
 0x263   : > { %8291 = vmatmul.mubr.msk.bf16.vlgmr.msra.gmra.mrb[0].mxu0 %vm685_vm2, %v4435_v47  ;;  %v4458_v47 = vshll.u32 %v10571_v23, 16  ;;  %v1409_v35 = vsel %vm1374_vm7, %v1406_v63, %v1408_v44  ;;  %v4464_v63 = vshrl.u32 %v10584_v53, 16  ;;  %v1411_v62 = vsel %vm1374_vm7, %v1408_v44, %v1410_v12 }
 0x264   : > { %8407 = vmatpush3.bf16.msra.mxu0 %v5209_v37  ;;  %8294 = vmatprep.mubr.msk.bf16.mxu0 %vm9669_vm1, %v9668_v1  ;;  %v4473_v44 = vshrl.u32 %v10597_v43, 16 }
 0x265   : > { %v4460_v37 = vrot.slane %v4458_v47, 4 }
 0x267   : > { %v4461_v23 = vor.u32 %v4460_v37, %v4457_v56  ;;  %v9566_v56 = vld [vmem:[%s9746_s29 + $0xa0] sm:$0xff]  }
 0x268   : > { %7761 = vmatmul.mubr.msk.bf16.gmra.mrb[60].mxu1 %vm685_vm2, %v1407_v46  ;;  %v1414_v37 = vrot.slane %v9566_v56, 1 }
 0x269   : > { %7764 = vmatprep.mubr.msk.bf16.mxu1 %vm9669_vm1, %v9668_v1  ;;  %v4462_v46 = vsel %vm4418_vm8, %v4452_v22, %v4461_v23  ;;  %v1413_v22 = vsel %vm1374_vm7, %v1410_v12, %v1412_v4  ;;  %v4485_v12 = vshll.u32 %v10610_v61, 16 }
 0x26b   : > { %8295 = vmatmul.mubr.msk.bf16.gmra.mrb[4].mxu0 %vm685_vm2, %v4444_v0  ;;  %v4466_v0 = vrot.slane %v4464_v63, 3 }
 0x26c   : > { %8298 = vmatprep.mubr.msk.bf16.mxu0 %vm9669_vm1, %v9668_v1 }
 0x26d   : > { %v4470_v53 = vor.u32 %v4469_v32, %v4466_v0  ;;  %v4491_v32 = vshrl.u32 %v10623_v29, 16 }
 0x26f   : > { %v4471_v47 = vsel %vm4418_vm8, %v4461_v23, %v4470_v53  ;;  %v1415_v23 = vsel %vm1374_vm7, %v1412_v4, %v1414_v37 }
 0x270   : > { %7765 = vmatmul.mubr.msk.bf16.gmra.mrb[64].mxu1 %vm685_vm2, %v1409_v35  ;;  %v4475_v35 = vrot.slane %v4473_v44, 3  ;;  %v4493_v44 = vrot.slane %v4491_v32, 3  ;;  %v9570_v32 = vld [vmem:[%s9746_s29 + $0xc0] sm:$0xff]  }
 0x271   : > { %7768 = vmatprep.mubr.msk.bf16.mxu1 %vm9669_vm1, %v9668_v1 }
 0x273   : > { %8299 = vmatmul.mubr.msk.bf16.gmra.mrb[8].mxu0 %vm685_vm2, %v4453_v9  ;;  %v4478_v9 = vrot.slane %v4476_v13, 4  ;;  %v4496_v13 = vrot.slane %v4494_v45, 4  ;;  %v1422_v45 = vrot.slane %v9570_v32, 1  ;;  %v9573_v32 = vld [vmem:[%s9746_s29 + $0xd8] sm:$0xff]  }
 0x274   : > { %8302 = vmatprep.mubr.msk.bf16.mxu0 %vm9669_vm1, %v9668_v1 }
 0x275   : > { %v4479_v43 = vor.u32 %v4478_v9, %v4475_v35  ;;  %v4497_v29 = vor.u32 %v4496_v13, %v4493_v44  ;;  %v4500_v35 = vshrl.u32 %v10636_v16, 16  ;;  %v4503_v9 = vshll.u32 %v10636_v16, 16 }
 0x277   : > { %v4480_v63 = vsel %vm4418_vm8, %v4470_v53, %v4479_v43  ;;  %v4505_v18 = vrot.slane %v4503_v9, 4  ;;  %v4527_v9 = vshrl.u32 %v10675_v15, 16 }
 0x278   : > { %7769 = vmatmul.mubr.msk.bf16.gmra.mrb[68].mxu1 %vm685_vm2, %v1411_v62  ;;  %v4487_v62 = vrot.slane %v4485_v12, 4  ;;  %v9569_v12 = vld [vmem:[%s9746_s29 + $0xb8] sm:$0xff]  }
 0x279   : > { %7772 = vmatprep.mubr.msk.bf16.mxu1 %vm9669_vm1, %v9668_v1 }
 0x27a   : > { %v4488_v61 = vor.u32 %v4487_v62, %v4484_v10  ;;  %v4512_v10 = vshll.u32 %v10649_v48, 16 }
 0x27b   : > { %8303 = vmatmul.mubr.msk.bf16.gmra.mrb[12].mxu0 %vm685_vm2, %v4462_v46  ;;  %v9567_v46 = vld [vmem:[%s9746_s29 + $0xa8] sm:$0xff]  }
 0x27c   : > { %8306 = vmatprep.mubr.msk.bf16.mxu0 %vm9669_vm1, %v9668_v1  ;;  %v1416_v0 = vrot.slane %v9567_v46, 1  ;;  %v4489_v53 = vsel %vm4418_vm8, %v4479_v43, %v4488_v61  ;;  %v4502_v43 = vrot.slane %v4500_v35, 3 }
 0x27e   : > { %v1417_v4 = vsel %vm1374_vm7, %v1414_v37, %v1416_v0  ;;  %v4498_v37 = vsel %vm4418_vm8, %v4488_v61, %v4497_v29  ;;  %v4506_v16 = vor.u32 %v4505_v18, %v4502_v43  ;;  %v4514_v61 = vrot.slane %v4512_v10, 4 }
 0x27f   : > { %v4529_v18 = vrot.slane %v4527_v9, 3  ;;  %v4539_v10 = vshll.u32 %v10688_v54, 16  ;;  %v9574_v9 = vld [vmem:[%s9746_s29 + $0xc] sm:$0xf] }
 0x280   : > { %7773 = vmatmul.mubr.msk.bf16.gmra.mrb[72].mxu1 %vm685_vm2, %v1413_v22  ;;  %v9568_v22 = vld [vmem:[%s9746_s29 + $0xb0] sm:$0xff]   ;;  %v4507_v46 = vsel %vm4418_vm8, %v4497_v29, %v4506_v16  ;;  %v9571_v29 = vld [vmem:[%s9746_s29 + $0xc8] sm:$0xff]  }
 0x281   : > { %7776 = vmatprep.mubr.msk.bf16.mxu1 %vm9669_vm1, %v9668_v1  ;;  %v1424_v35 = vrot.slane %v9571_v29, 1  ;;  %v1843_v29 = vld [vmem:[%s9746_s29 + $0x8] sm:$0xe] }
 0x283   : > { %8307 = vmatmul.mubr.msk.bf16.gmra.mrb[16].mxu0 %vm685_vm2, %v4471_v47  ;;  %v1418_v47 = vrot.slane %v9568_v22, 1 }
 0x284   : > { %8310 = vmatprep.mubr.msk.bf16.mxu0 %vm9669_vm1, %v9668_v1 }
 0x285   : > { %v1419_v56 = vsel %vm1374_vm7, %v1416_v0, %v1418_v47 }
 0x288   : > { %7777 = vmatmul.mubr.msk.bf16.gmra.mrb[76].mxu1 %vm685_vm2, %v1415_v23  ;;  %v1420_v23 = vrot.slane %v9569_v12, 1 }
 0x289   : > { %7780 = vmatprep.mubr.msk.bf16.mxu1 %vm9669_vm1, %v9668_v1 }
 0x28a   : > { %v1421_v62 = vsel %vm1374_vm7, %v1418_v47, %v1420_v23  ;;  %v1423_v44 = vsel %vm1374_vm7, %v1420_v23, %v1422_v45  ;;  %v9572_v23 = vld [vmem:[%s9746_s29 + $0xd0] sm:$0xff]  }
 0x28b   : > { %8311 = vmatmul.mubr.msk.bf16.gmra.mrb[20].mxu0 %vm685_vm2, %v4480_v63  ;;  %v4509_v63 = vshrl.u32 %v10649_v48, 16 }
 0x28c   : > { %8314 = vmatprep.mubr.msk.bf16.mxu0 %vm9669_vm1, %v9668_v1 }
 0x28d   : > { %v4511_v0 = vrot.slane %v4509_v63, 3  ;;  %v4536_v63 = vshrl.u32 %v10688_v54, 16 }
 0x28f   : > { %v4515_v48 = vor.u32 %v4514_v61, %v4511_v0  ;;  %v4538_v0 = vrot.slane %v4536_v63, 3  ;;  %v4541_v61 = vrot.slane %v4539_v10, 4 }
 0x290   : > { %7781 = vmatmul.mubr.msk.bf16.gmra.mrb[80].mxu1 %vm685_vm2, %v1417_v4  ;;  %v4518_v4 = vshrl.u32 %v10662_v38, 16 }
 0x291   : > { %7784 = vmatprep.mubr.msk.bf16.mxu1 %vm9669_vm1, %v9668_v1  ;;  %v4516_v13 = vsel %vm4418_vm8, %v4506_v16, %v4515_v48  ;;  %v1426_v16 = vrot.slane %v9572_v23, 1  ;;  %v4542_v54 = vor.u32 %v4541_v61, %v4538_v0  ;;  %v12021_v0 = vshll.u32 %v9750_v7, 16 }
 0x292   : > { %v4520_v22 = vrot.slane %v4518_v4, 3  ;;  %v4548_v4 = vshll.u32 %v10701_v58, 16 }
 0x293   : > { %8315 = vmatmul.mubr.msk.bf16.gmra.mrb[24].mxu0 %vm685_vm2, %v4489_v53  ;;  %v4521_v53 = vshll.u32 %v10662_v38, 16  ;;  %v2063_v61 = vrot.slane %v12021_v0, 2 }
 0x294   : > { %8318 = vmatprep.mubr.msk.bf16.mxu0 %vm9669_vm1, %v9668_v1 }
 0x295   : > { %v4523_v47 = vrot.slane %v4521_v53, 4 }
 0x297   : > { %v4524_v38 = vor.u32 %v4523_v47, %v4520_v22  ;;  %v4550_v22 = vrot.slane %v4548_v4, 4  ;;  %v1430_v47 = vrot.slane %v10241_v24, 1 }
 0x298   : > { %7785 = vmatmul.mubr.msk.bf16.gmra.mrb[84].mxu1 %vm685_vm2, %v1419_v56  ;;  %v4530_v56 = vshll.u32 %v10675_v15, 16 }
 0x299   : > { %7788 = vmatprep.mubr.msk.bf16.mxu1 %vm9669_vm1, %v9668_v1  ;;  %v4525_v43 = vsel %vm4418_vm8, %v4515_v48, %v4524_v38  ;;  %v4545_v48 = vshrl.u32 %v10701_v58, 16 }
 0x29a   : > { %v4532_v12 = vrot.slane %v4530_v56, 4  ;;  %v6640_v56 = vcombine.low %v1843_v29, %v9574_v9 }
 0x29b   : > { %8319 = vmatmul.mubr.msk.bf16.gmra.mrb[28].mxu0 %vm685_vm2, %v4498_v37  ;;  %v1425_v37 = vsel %vm1374_vm7, %v1422_v45, %v1424_v35  ;;  %v1428_v45 = vrot.slane %v9573_v32, 1 }
 0x29c   : > { %8322 = vmatprep.mubr.msk.bf16.mxu0 %vm9669_vm1, %v9668_v1  ;;  %v4533_v15 = vor.u32 %v4532_v12, %v4529_v18  ;;  %v2050_v12 = vshrl.u32 %v6640_v56, 16  ;;  %v2053_v23 = vshll.u32 %v6640_v56, 16  ;;  %v4584_v56 = vshll.u32 %v10763_v55, 16 }
 0x29d   : > { %v1429_v53 = vsel %vm1374_vm7, %v1426_v16, %v1428_v45 }
 0x29e   : > { %v2052_v63 = vrot.slane %v2050_v12, 1  ;;  %v2055_v10 = vrot.slane %v2053_v23, 2 }
 0x2a0   : > { %7789 = vmatmul.mubr.msk.bf16.gmra.mrb[88].mxu1 %vm685_vm2, %v1421_v62  ;;  %v1427_v62 = vsel %vm1374_vm7, %v1424_v35, %v1426_v16  ;;  %v4554_v35 = vshrl.u32 %v10714_v41, 16  ;;  %v4563_v16 = vshrl.u32 %v10730_v52, 16 }
 0x2a1   : > { %7792 = vmatprep.mubr.msk.bf16.mxu1 %vm9669_vm1, %v9668_v1 }
 0x2a2   : > { %v4556_v24 = vrot.slane %v4554_v35, 3 }
 0x2a3   : > { %8323 = vmatmul.mubr.msk.bf16.gmra.mrb[32].mxu0 %vm685_vm2, %v4507_v46  ;;  %v4534_v46 = vsel %vm4418_vm8, %v4524_v38, %v4533_v15  ;;  %v4557_v38 = vshll.u32 %v10714_v41, 16 }
 0x2a4   : > { %8326 = vmatprep.mubr.msk.bf16.mxu0 %vm9669_vm1, %v9668_v1 }
 0x2a5   : > { %v4559_v18 = vrot.slane %v4557_v38, 4 }
 0x2a7   : > { %v4560_v41 = vor.u32 %v4559_v18, %v4556_v24 }
 0x2a8   : > { %7793 = vmatmul.mubr.msk.bf16.gmra.mrb[92].mxu1 %vm685_vm2, %v1423_v44  ;;  %v4543_v44 = vsel %vm4418_vm8, %v4533_v15, %v4542_v54  ;;  %v4566_v15 = vshll.u32 %v10730_v52, 16 }
 0x2a9   : > { %7796 = vmatprep.mubr.msk.bf16.mxu1 %vm9669_vm1, %v9668_v1 }
 0x2ab   : > { %8327 = vmatmul.mubr.msk.bf16.gmra.mrb[36].mxu0 %vm685_vm2, %v4516_v13  ;;  %v4547_v13 = vrot.slane %v4545_v48, 3  ;;  %v2056_v48 = vor.u32 %v2055_v10, %v2052_v63  ;;  %v12026_v10 = vshrl.u32 %v9797_v42, 16 }
 0x2ac   : > { %8330 = vmatprep.mubr.msk.bf16.mxu0 %vm9669_vm1, %v9668_v1 }
 0x2ad   : > { %v4551_v58 = vor.u32 %v4550_v22, %v4547_v13  ;;  %v12022_v13 = vshrl.u32 %v9764_v17, 16 }
 0x2af   : > { %v4561_v32 = vsel %vm4418_vm8, %v4551_v58, %v4560_v41  ;;  %v2069_v22 = vrot.slane %v12022_v13, 1 }
 0x2b0   : > { %7797 = vmatmul.mubr.msk.bf16.gmra.mrb[96].mxu1 %vm685_vm2, %v1425_v37  ;;  %v1431_v37 = vsel %vm1374_vm7, %v1428_v45, %v1430_v47  ;;  %v4565_v45 = vrot.slane %v4563_v16, 3 }
 0x2b1   : > { %7800 = vmatprep.mubr.msk.bf16.mxu1 %vm9669_vm1, %v9668_v1 }
 0x2b3   : > { %8331 = vmatmul.mubr.msk.bf16.gmra.mrb[40].mxu0 %vm685_vm2, %v4525_v43  ;;  %v4552_v43 = vsel %vm4418_vm8, %v4542_v54, %v4551_v58  ;;  %v4568_v54 = vrot.slane %v4566_v15, 4  ;;  %v4590_v15 = vshrl.u32 %v10777_v50, 16 }
 0x2b4   : > { %8334 = vmatprep.mubr.msk.bf16.mxu0 %vm9669_vm1, %v9668_v1 }
 0x2b5   : > { %v4569_v52 = vor.u32 %v4568_v54, %v4565_v45 }
 0x2b7   : > { %v4570_v58 = vsel %vm4418_vm8, %v4560_v41, %v4569_v52  ;;  %v4586_v41 = vrot.slane %v4584_v56, 4 }
 0x2b8   : > { %7801 = vmatmul.mubr.msk.bf16.gmra.mrb[100].mxu1 %vm685_vm2, %v1427_v62  ;;  %v12020_v62 = vshrl.u32 %v9750_v7, 16  ;;  %v4572_v7 = vshrl.u32 %v10748_v3, 16 }
 0x2b9   : > { %7804 = vmatprep.mubr.msk.bf16.mxu1 %vm9669_vm1, %v9668_v1 }
 0x2ba   : > { %v4574_v35 = vrot.slane %v4572_v7, 3 }
 0x2bb   : > { %8335 = vmatmul.mubr.msk.bf16.gmra.mrb[44].mxu0 %vm685_vm2, %v4534_v46  ;;  %v2060_v46 = vrot.slane %v12020_v62, 1  ;;  %v2087_v62 = vrot.slane %v12026_v10, 1  ;;  %v4626_v10 = vshrl.u32 %v10833_v5, 16 }
 0x2bc   : > { %8338 = vmatprep.mubr.msk.bf16.mxu0 %vm9669_vm1, %v9668_v1 }
 0x2bd   : > { %v2064_v4 = vor.u32 %v2063_v61, %v2060_v46  ;;  %v12027_v46 = vshll.u32 %v9797_v42, 16  ;;  %v4602_v42 = vshll.u32 %v10791_v21, 16 }
 0x2bf   : > { %v2090_v0 = vrot.slane %v12027_v46, 2  ;;  %v12034_v46 = vshrl.u32 %v9854_v19, 16 }
 0x2c0   : > { %7805 = vmatmul.mubr.msk.bf16.gmra.mrb[104].mxu1 %vm685_vm2, %v1429_v53  ;;  %v4575_v53 = vshll.u32 %v10748_v3, 16 }
 0x2c1   : > { %7808 = vmatprep.mubr.msk.bf16.mxu1 %vm9669_vm1, %v9668_v1  ;;  %v2091_v54 = vor.u32 %v2090_v0, %v2087_v62  ;;  %v2123_v0 = vrot.slane %v12034_v46, 1 }
 0x2c2   : > { %v4577_v38 = vrot.slane %v4575_v53, 4  ;;  %v12029_v53 = vshll.u32 %v9810_v51, 16 }
 0x2c3   : > { %8339 = vmatmul.mubr.msk.bf16.gmra.mrb[48].mxu0 %vm685_vm2, %v4543_v44  ;;  %v2065_v44 = vsel %vm2048_vm9, %v2056_v48, %v2064_v4  ;;  %v4599_v48 = vshrl.u32 %v10791_v21, 16 }
 0x2c4   : > { %8342 = vmatprep.mubr.msk.bf16.mxu0 %vm9669_vm1, %v9668_v1  ;;  %v4578_v9 = vor.u32 %v4577_v38, %v4574_v35  ;;  %v12030_v38 = vshrl.u32 %v9823_v60, 16 }
 0x2c6   : > { %v4579_v12 = vsel %vm4418_vm8, %v4569_v52, %v4578_v9  ;;  %v12028_v52 = vshrl.u32 %v9810_v51, 16  ;;  %v4611_v51 = vshll.u32 %v10805_v57, 16 }
 0x2c8   : > { %7809 = vmatmul.mubr.msk.bf16.gmra.mrb[108].mxu1 %vm685_vm2, %v1431_v37  ;;  %v2096_v7 = vrot.slane %v12028_v52, 1  ;;  %v12036_v52 = vshrl.u32 %v9871_v28, 16 }
 0x2c9   : > { %7812 = vmatprep.mubr.msk.bf16.mxu1 %vm9669_vm1, %v9668_v1 }
 0x2cb   : > { %8343 = vmatmul.mubr.msk.bf16.gmra.mrb[52].mxu0 %vm685_vm2, %v4552_v43  ;;  %v12024_v43 = vshrl.u32 %v9783_v33, 16 }
 0x2cc   : > { %8346 = vmatprep.mubr.msk.bf16.mxu0 %vm9669_vm1, %v9668_v1 }
 0x2cd   : > { %v2078_v24 = vrot.slane %v12024_v43, 1  ;;  %v4613_v43 = vrot.slane %v4611_v51, 4  ;;  %v12038_v51 = vshrl.u32 %v9890_v39, 16 }
 0x2d0   : > { %7813 = vmatmul.mubr.msk.bf16.gmra.mrb[112].mxu1 %vm685_vm2, %v1430_v47  ;;  %v12023_v47 = vshll.u32 %v9764_v17, 16  ;;  %v4581_v17 = vshrl.u32 %v10763_v55, 16 }
 0x2d1   : > { %7818 = vmatprep.mubr.msk.bf16.mxu1 %vm9669_vm1, %v9668_v1 }
 0x2d2   : > { %v2072_v29 = vrot.slane %v12023_v47, 2  ;;  %v4583_v23 = vrot.slane %v4581_v17, 3  ;;  %v4604_v47 = vrot.slane %v4602_v42, 4  ;;  %v4635_v42 = vshrl.u32 %v10847_v27, 16 }
 0x2d3   : > { %8347 = vmatmul.mubr.msk.bf16.gmra.mrb[56].mxu0 %vm685_vm2, %v4561_v32  ;;  %v4592_v32 = vrot.slane %v4590_v15, 3 }
 0x2d4   : > { %8350 = vmatprep.mubr.msk.bf16.mxu0 %vm9669_vm1, %v9668_v1  ;;  %v2073_v3 = vor.u32 %v2072_v29, %v2069_v22  ;;  %v4587_v55 = vor.u32 %v4586_v41, %v4583_v23  ;;  %v4601_v22 = vrot.slane %v4599_v48, 3  ;;  %v12033_v41 = vshll.u32 %v9839_v8, 16 }
 0x2d6   : > { %v2074_v37 = vsel %vm2048_vm9, %v2064_v4, %v2073_v3  ;;  %v4588_v61 = vsel %vm4418_vm8, %v4578_v9, %v4587_v55  ;;  %v4605_v21 = vor.u32 %v4604_v47, %v4601_v22  ;;  %v12031_v9 = vshll.u32 %v9823_v60, 16 }
 0x2d7   : > { %v4620_v60 = vshll.u32 %v10819_v31, 16  ;;  %v4637_v22 = vrot.slane %v4635_v42, 3 }
 0x2d8   : > { %7819 = vmatmul.mubr.msk.bf16.vlgmr.msra.gmra.mrb[0].mxu1 %vm685_vm2, %v2065_v44  ;;  %v2099_v44 = vrot.slane %v12029_v53, 2  ;;  %v2108_v17 = vrot.slane %v12031_v9, 2  ;;  %v12037_v53 = vshll.u32 %v9871_v28, 16  ;;  %v4647_v28 = vshll.u32 %v10861_v30, 16 }
 0x2d9   : > { %8525 = vmatpush3.bf16.msra.mxu1 %v9722_v2  ;;  %7822 = vmatprep.mubr.msk.bf16.mxu1 %vm9669_vm1, %v9668_v1  ;;  %v12025_v2 = vshll.u32 %v9783_v33, 16  ;;  %v4593_v33 = vshll.u32 %v10777_v50, 16 }
 0x2da   : > { %v2100_v29 = vor.u32 %v2099_v44, %v2096_v7  ;;  %v2132_v7 = vrot.slane %v12036_v52, 1  ;;  %v2135_v44 = vrot.slane %v12037_v53, 2  ;;  %v12044_v52 = vshrl.u32 %v9941_v11, 16 }
 0x2db   : > { %8351 = vmatmul.mubr.msk.bf16.gmra.mrb[60].mxu0 %vm685_vm2, %v4570_v58  ;;  %v2081_v18 = vrot.slane %v12025_v2, 2  ;;  %v4595_v45 = vrot.slane %v4593_v33, 4  ;;  %v4608_v58 = vshrl.u32 %v10805_v57, 16  ;;  %v4617_v2 = vshrl.u32 %v10819_v31, 16 }
 0x2dc   : > { %8354 = vmatprep.mubr.msk.bf16.mxu0 %vm9669_vm1, %v9668_v1  ;;  %v2101_v35 = vsel %vm2048_vm9, %v2091_v54, %v2100_v29  ;;  %v4622_v33 = vrot.slane %v4620_v60, 4  ;;  %v12040_v60 = vshrl.u32 %v9907_v49, 16  ;;  %v12045_v53 = vshll.u32 %v9941_v11, 16 }
 0x2dd   : > { %v2082_v16 = vor.u32 %v2081_v18, %v2078_v24  ;;  %v4596_v50 = vor.u32 %v4595_v45, %v4592_v32  ;;  %v4619_v15 = vrot.slane %v4617_v2, 3 }
 0x2df   : > { %v2083_v63 = vsel %vm2048_vm9, %v2073_v3, %v2082_v16  ;;  %v2092_v4 = vsel %vm2048_vm9, %v2082_v16, %v2091_v54  ;;  %v4597_v13 = vsel %vm4418_vm8, %v4587_v55, %v4596_v50  ;;  %v2105_v3 = vrot.slane %v12030_v38, 1 }
 0x2e0   : > { %7823 = vmatmul.mubr.msk.bf16.gmra.mrb[4].mxu1 %vm685_vm2, %v2074_v37  ;;  %v4606_v56 = vsel %vm4418_vm8, %v4596_v50, %v4605_v21  ;;  %v4610_v37 = vrot.slane %v4608_v58, 3  ;;  %v2117_v16 = vrot.slane %v12033_v41, 2  ;;  %v4623_v31 = vor.u32 %v4622_v33, %v4619_v15  ;;  %v5536_v33 = vld [vmem:[%s11935_s2 + $0x20] sm:$0xff] }
 0x2e1   : > { %7826 = vmatprep.mubr.msk.bf16.mxu1 %vm9669_vm1, %v9668_v1  ;;  %v2109_v24 = vor.u32 %v2108_v17, %v2105_v3  ;;  %v4628_v54 = vrot.slane %v4626_v10, 3  ;;  %v12039_v38 = vshll.u32 %v9890_v39, 16  ;;  %v4665_v10 = vshll.u32 %v10889_v20, 16 }
 0x2e2   : > { %v4614_v57 = vor.u32 %v4613_v43, %v4610_v37  ;;  %v4653_v43 = vshrl.u32 %v10875_v14, 16 }
 0x2e3   : > { %8355 = vmatmul.mubr.msk.bf16.gmra.mrb[64].mxu0 %vm685_vm2, %v4579_v12  ;;  %v2110_v18 = vsel %vm2048_vm9, %v2100_v29, %v2109_v24  ;;  %v12032_v12 = vshrl.u32 %v9839_v8, 16  ;;  %v4629_v8 = vshll.u32 %v10833_v5, 16  ;;  %v2136_v29 = vor.u32 %v2135_v44, %v2132_v7 }
 0x2e4   : > { %8358 = vmatprep.mubr.msk.bf16.mxu0 %vm9669_vm1, %v9668_v1  ;;  %v4615_v55 = vsel %vm4418_vm8, %v4605_v21, %v4614_v57  ;;  %v4624_v45 = vsel %vm4418_vm8, %v4614_v57, %v4623_v31  ;;  %v4644_v21 = vshrl.u32 %v10861_v30, 16  ;;  %v2144_v3 = vrot.slane %v12039_v38, 2  ;;  %v5532_v30 = vld [vmem:[%s11935_s2] sm:$0xff] }
 0x2e5   : > { %v2114_v23 = vrot.slane %v12032_v12, 1  ;;  %v4631_v50 = vrot.slane %v4629_v8, 4  ;;  %v9670_v57 = vmov 0   ;;  %v12041_v12 = vshll.u32 %v9907_v49, 16  ;;  %v5534_v49 = vld [vmem:[%s11935_s2 + $0x10] sm:$0xff] }
 0x2e6   : > { %v4646_v17 = vrot.slane %v4644_v21, 3  ;;  %9423 = vset.pattern.permute.xlu0 %v9670_v57  ;;  %9424 = vset.pattern.permute.xlu1 %v9670_v57  ;;  %v2168_v7 = vrot.slane %v12044_v52, 1  ;;  %v2171_v44 = vrot.slane %v12045_v53, 2  ;;  %v5539_v21 = vld [vmem:[%s11935_s2 + $0x38] sm:$0xff] }
 0x2e7   : > { %v4632_v5 = vor.u32 %v4631_v50, %v4628_v54  ;;  %5591 = vperm.xlu0 %9423, %v5532_v30   ;;  %5601 = vperm.xlu1 %9424, %v5534_v49   ;;  %v4667_v50 = vrot.slane %v4665_v10, 4  ;;  %v12051_v49 = vshll.u32 %v10273_v26, 16  ;;  %v9575_v10 = vld [vmem:[%s9746_s29 + $0x14] sm:$0xf] }
 0x2e8   : > { %7827 = vmatmul.mubr.msk.bf16.gmra.mrb[8].mxu1 %vm685_vm2, %v2083_v63  ;;  %v2118_v63 = vor.u32 %v2117_v16, %v2114_v23  ;;  %v2153_v23 = vrot.slane %v12041_v12, 2  ;;  %v4655_v16 = vrot.slane %v4653_v43, 3  ;;  %v2172_v11 = vor.u32 %v2171_v44, %v2168_v7  ;;  %v5548_v12 = vld [vmem:[%s11935_s2 + $0x80] sm:$0xff] }
 0x2e9   : > { %7830 = vmatprep.mubr.msk.bf16.mxu1 %vm9669_vm1, %v9668_v1  ;;  %v12054_v7 = vshrl.u32 %v10310_v34, 16  ;;  %v12055_v44 = vshll.u32 %v10310_v34, 16 }
 0x2ea   : > { %v2119_v62 = vsel %vm2048_vm9, %v2109_v24, %v2118_v63  ;;  %v4656_v24 = vshll.u32 %v10875_v14, 16  ;;  %v5533_v14 = vld [vmem:[%s11935_s2 + $0x8] sm:$0xff] }
 0x2eb   : > { %8359 = vmatmul.mubr.msk.bf16.gmra.mrb[68].mxu0 %vm685_vm2, %v4588_v61  ;;  %v12035_v61 = vshll.u32 %v9854_v19, 16  ;;  %v4638_v19 = vshll.u32 %v10847_v27, 16  ;;  %5596 = vperm.xlu0 %9423, %v5533_v14   ;;  %v12050_v14 = vshrl.u32 %v10273_v26, 16  ;;  %v2213_v53 = vrot.slane %v12054_v7, 1  ;;  %v5576_v7 = vld [vmem:[%s11935_s2 + $0x160] sm:$0xff] }
 0x2ec   : > { %8362 = vmatprep.mubr.msk.bf16.mxu0 %vm9669_vm1, %v9668_v1 }
 0x2ed   : > { %v2126_v32 = vrot.slane %v12035_v61, 2  ;;  %v4640_v47 = vrot.slane %v4638_v19, 4 }
 0x2ef   : > { %v2127_v48 = vor.u32 %v2126_v32, %v2123_v0  ;;  %v4641_v27 = vor.u32 %v4640_v47, %v4637_v22  ;;  %v12043_v0 = vshll.u32 %v9924_v59, 16  ;;  %v11266_v32 = vld [vmem:[%s9746_s29 + $0xf4] sm:$0xf]  ;;  %5611 = vperm.xlu0 %9423, %v5536_v33   ;;  %v5540_v22 = vld [vmem:[%s11935_s2 + $0x40] sm:$0xff]  ;;  %v2198_v33 = vrot.slane %v12051_v49, 2 }
 0x2f0   : > { %7831 = vmatmul.mubr.msk.bf16.gmra.mrb[12].mxu1 %vm685_vm2, %v2092_v4 }
 0x2f1   : > { %7834 = vmatprep.mubr.msk.bf16.mxu1 %vm9669_vm1, %v9668_v1  ;;  %v2128_v4 = vsel %vm2048_vm9, %v2118_v63, %v2127_v48  ;;  %v2137_v58 = vsel %vm2048_vm9, %v2127_v48, %v2136_v29  ;;  %v4642_v9 = vsel %vm4418_vm8, %v4632_v5, %v4641_v27  ;;  %v2162_v61 = vrot.slane %v12043_v0, 2  ;;  %v5554_v0 = vld [vmem:[%s11935_s2 + $0xb0] sm:$0xff] }
 0x2f3   : > { %8363 = vmatmul.mubr.msk.bf16.gmra.mrb[72].mxu0 %vm685_vm2, %v4597_v13  ;;  %v4633_v13 = vsel %vm4418_vm8, %v4623_v31, %v4632_v5  ;;  %v4662_v31 = vshrl.u32 %v10889_v20, 16  ;;  %v6820_v20 = vcombine.low %v10900_v6, %v11266_v32  ;;  %v5538_v5 = vld [vmem:[%s11935_s2 + $0x30] sm:$0xff] }
 0x2f4   : > { %8366 = vmatprep.mubr.msk.bf16.mxu0 %vm9669_vm1, %v9668_v1  ;;  %5621 = vperm.xlu0 %9423, %v5538_v5   ;;  %v9577_v5 = vld [vmem:[%s9746_s29 + $0x1c] sm:$0xf] }
 0x2f5   : > { %v4664_v54 = vrot.slane %v4662_v31, 3  ;;  %v4671_v19 = vshrl.u32 %v6820_v20, 16  ;;  %v4674_v6 = vshll.u32 %v6820_v20, 16  ;;  %v5552_v31 = vld [vmem:[%s11935_s2 + $0xa0] sm:$0xff] }
 0x2f7   : > { %v4668_v42 = vor.u32 %v4667_v50, %v4664_v54  ;;  %v12053_v50 = vshll.u32 %v10289_v40, 16 }
 0x2f8   : > { %7835 = vmatmul.mubr.msk.bf16.gmra.mrb[16].mxu1 %vm685_vm2, %v2101_v35  ;;  %v2141_v35 = vrot.slane %v12038_v51, 1  ;;  %5631 = vperm.xlu0 %9423, %v5540_v22   ;;  %v5557_v22 = vld [vmem:[%s11935_s2 + $0xc8] sm:$0xff] }
 0x2f9   : > { %7838 = vmatprep.mubr.msk.bf16.mxu1 %vm9669_vm1, %v9668_v1  ;;  %v2207_v20 = vrot.slane %v12053_v50, 2 }
 0x2fa   : > { %v2145_v37 = vor.u32 %v2144_v3, %v2141_v35  ;;  %v12046_v35 = vshrl.u32 %v9958_v25, 16  ;;  %v12047_v3 = vshll.u32 %v9958_v25, 16  ;;  %v5543_v25 = vld [vmem:[%s11935_s2 + $0x58] sm:$0xff] }
 0x2fb   : > { %8367 = vmatmul.mubr.msk.bf16.gmra.mrb[76].mxu0 %vm685_vm2, %v4606_v56  ;;  %v4649_v56 = vrot.slane %v4647_v28, 4  ;;  %v5542_v28 = vld [vmem:[%s11935_s2 + $0x50] sm:$0xff] }
 0x2fc   : > { %8370 = vmatprep.mubr.msk.bf16.mxu0 %vm9669_vm1, %v9668_v1  ;;  %v2146_v2 = vsel %vm2048_vm9, %v2136_v29, %v2145_v37  ;;  %v4673_v29 = vrot.slane %v4671_v19, 3  ;;  %v2177_v38 = vrot.slane %v12046_v35, 1  ;;  %5641 = vperm.xlu0 %9423, %v5542_v28   ;;  %v5562_v28 = vld [vmem:[%s11935_s2 + $0xf0] sm:$0xff] }
 0x2fd   : > { %v4650_v39 = vor.u32 %v4649_v56, %v4646_v17  ;;  %v5541_v17 = vld [vmem:[%s11935_s2 + $0x48] sm:$0xff]  ;;  %v5544_v56 = vld [vmem:[%s11935_s2 + $0x60] sm:$0xff] }
 0x2ff   : > { %v4651_v41 = vsel %vm4418_vm8, %v4641_v27, %v4650_v39  ;;  %v4676_v27 = vrot.slane %v4674_v6, 4  ;;  %v5555_v6 = vld [vmem:[%s11935_s2 + $0xb8] sm:$0xff] }
 0x300   : > { %7839 = vmatmul.mubr.msk.bf16.gmra.mrb[20].mxu1 %vm685_vm2, %v2110_v18  ;;  %v2150_v18 = vrot.slane %v12040_v60, 1  ;;  %5651 = vperm.xlu0 %9423, %v5544_v56   ;;  %v5564_v56 = vld [vmem:[%s11935_s2 + $0x100] sm:$0xff] }
 0x301   : > { %7842 = vmatprep.mubr.msk.bf16.mxu1 %vm9669_vm1, %v9668_v1 }
 0x302   : > { %v2154_v15 = vor.u32 %v2153_v23, %v2150_v18  ;;  %v5545_v18 = vld [vmem:[%s11935_s2 + $0x68] sm:$0xff] }
 0x303   : > { %8371 = vmatmul.mubr.msk.bf16.gmra.mrb[80].mxu0 %vm685_vm2, %v4615_v55  ;;  %v4658_v55 = vrot.slane %v4656_v24, 4  ;;  %v12048_v24 = vshrl.u32 %v9973_v36, 16 }
 0x304   : > { %8374 = vmatprep.mubr.msk.bf16.mxu0 %vm9669_vm1, %v9668_v1  ;;  %v2155_v8 = vsel %vm2048_vm9, %v2145_v37, %v2154_v15 }
 0x305   : > { %v4659_v63 = vor.u32 %v4658_v55, %v4655_v16  ;;  %v2186_v57 = vrot.slane %v12048_v24, 1  ;;  %v5550_v16 = vld [vmem:[%s11935_s2 + $0x90] sm:$0xff] }
 0x306   : > { %v5566_v24 = vld [vmem:[%s11935_s2 + $0x110] sm:$0xff] }
 0x307   : > { %v4669_v47 = vsel %vm4418_vm8, %v4659_v63, %v4668_v42 }
 0x308   : > { %7843 = vmatmul.mubr.msk.bf16.gmra.mrb[24].mxu1 %vm685_vm2, %v2119_v62  ;;  %v12042_v62 = vshrl.u32 %v9924_v59, 16  ;;  %v5535_v59 = vld [vmem:[%s11935_s2 + $0x18] sm:$0xff] }
 0x309   : > { %7846 = vmatprep.mubr.msk.bf16.mxu1 %vm9669_vm1, %v9668_v1  ;;  %5606 = vperm.xlu1 %9424, %v5535_v59   ;;  %v5556_v59 = vld [vmem:[%s11935_s2 + $0xc0] sm:$0xff] }
 0x30a   : > { %v2159_v46 = vrot.slane %v12042_v62, 1 }
 0x30b   : > { %8375 = vmatmul.mubr.msk.bf16.gmra.mrb[84].mxu0 %vm685_vm2, %v4624_v45  ;;  %v4660_v45 = vsel %vm4418_vm8, %v4650_v39, %v4659_v63  ;;  %v5546_v39 = vld [vmem:[%s11935_s2 + $0x70] sm:$0xff]  ;;  %v5549_v63 = vld [vmem:[%s11935_s2 + $0x88] sm:$0xff] }
 0x30c   : > { %8378 = vmatprep.mubr.msk.bf16.mxu0 %vm9669_vm1, %v9668_v1  ;;  %v2163_v48 = vor.u32 %v2162_v61, %v2159_v46  ;;  %5661 = vperm.xlu0 %9423, %v5546_v39   ;;  %v5551_v46 = vld [vmem:[%s11935_s2 + $0x98] sm:$0xff] }
 0x30e   : > { %v2173_v51 = vsel %vm2048_vm9, %v2163_v48, %v2172_v11 }
 0x310   : > { %7847 = vmatmul.mubr.msk.bf16.gmra.mrb[28].mxu1 %vm685_vm2, %v2128_v4  ;;  %v2164_v4 = vsel %vm2048_vm9, %v2154_v15, %v2163_v48  ;;  %5671 = vperm.xlu0 %9423, %v5548_v12   ;;  %v2195_v15 = vrot.slane %v12050_v14, 1  ;;  %v5553_v48 = vld [vmem:[%s11935_s2 + $0xa8] sm:$0xff]  ;;  %v9584_v14 = vld [vmem:[%s9746_s29 + $0x38] sm:$0xf] }
 0x311   : > { %7850 = vmatprep.mubr.msk.bf16.mxu1 %vm9669_vm1, %v9668_v1 }
 0x312   : > { %v2199_v26 = vor.u32 %v2198_v33, %v2195_v15  ;;  %v5567_v33 = vld [vmem:[%s11935_s2 + $0x118] sm:$0xff] }
 0x313   : > { %8379 = vmatmul.mubr.msk.bf16.gmra.mrb[88].mxu0 %vm685_vm2, %v4633_v13  ;;  %v5537_v13 = vld [vmem:[%s11935_s2 + $0x28] sm:$0xff] }
 0x314   : > { %8382 = vmatprep.mubr.msk.bf16.mxu0 %vm9669_vm1, %v9668_v1  ;;  %5616 = vperm.xlu1 %9424, %v5537_v13   ;;  %v2216_v13 = vrot.slane %v12055_v44, 2  ;;  %v9588_v44 = vld [vmem:[%s9746_s29 + $0x48] sm:$0xf] }
 0x315   : > { %5681 = vperm.xlu0 %9423, %v5550_v16   ;;  %v5568_v16 = vld [vmem:[%s11935_s2 + $0x120] sm:$0xff] }
 0x316   : > { %v2217_v34 = vor.u32 %v2216_v13, %v2213_v53  ;;  %v9587_v53 = vld [vmem:[%s9746_s29 + $0x44] sm:$0xf] }
 0x317   : > { %v6857_v13 = vcombine.low %v9587_v53, %v9588_v44  ;;  %v12080_v53 = vld [vmem:[#allocation10_spill] sm:$0xff] }
 0x318   : > { %7851 = vmatmul.mubr.msk.bf16.gmra.mrb[32].mxu1 %vm685_vm2, %v2137_v58  ;;  %v4677_v58 = vor.u32 %v4676_v27, %v4673_v29  ;;  %5626 = vperm.xlu1 %9424, %v5539_v21   ;;  %v9579_v29 = vld [vmem:[%s9746_s29 + $0x24] sm:$0xf]  ;;  %v9580_v27 = vld [vmem:[%s9746_s29 + $0x28] sm:$0xf]  ;;  %v5559_v21 = vld [vmem:[%s11935_s2 + $0xd8] sm:$0xff]  ;;  %v12081_v44 = vshrl.u32 %v12080_v53, 16 }
 0x319   : > { %7854 = vmatprep.mubr.msk.bf16.mxu1 %vm9669_vm1, %v9668_v1  ;;  %5691 = vperm.xlu0 %9423, %v5552_v31  }
 0x31a   : > { %v4678_v37 = vsel %vm4418_vm8, %v4668_v42, %v4677_v58  ;;  %v9578_v42 = vld [vmem:[%s9746_s29 + $0x20] sm:$0xf] }
 0x31b   : > { %8383 = vmatmul.mubr.msk.bf16.gmra.mrb[92].mxu0 %vm685_vm2, %v4642_v9  ;;  %v2180_v9 = vrot.slane %v12047_v3, 2  ;;  %v6852_v19 = vcombine.low %v9577_v5, %v9578_v42  ;;  %v12065_v42 = vld [vmem:[#allocation5_spill] sm:$0xff] }
 0x31c   : > { %8386 = vmatprep.mubr.msk.bf16.mxu0 %vm9669_vm1, %v9668_v1  ;;  %5636 = vperm.xlu1 %9424, %v5541_v17   ;;  %v5561_v17 = vld [vmem:[%s11935_s2 + $0xe8] sm:$0xff] }
 0x31d   : > { %v2181_v30 = vor.u32 %v2180_v9, %v2177_v38  ;;  %5701 = vperm.xlu0 %9423, %v5554_v0   ;;  %v5569_v0 = vld [vmem:[%s11935_s2 + $0x128] sm:$0xff] }
 0x31f   : > { %v2182_v43 = vsel %vm2048_vm9, %v2172_v11, %v2181_v30  ;;  %v6853_v11 = vcombine.low %v9579_v29, %v9580_v27  ;;  %v5578_v29 = vld [vmem:[%s11935_s2 + $0x170] sm:$0xff] }
 0x320   : > { %7855 = vmatmul.mubr.msk.bf16.gmra.mrb[36].mxu1 %vm685_vm2, %v2146_v2  ;;  %5646 = vperm.xlu1 %9424, %v5543_v25   ;;  %v12049_v2 = vshll.u32 %v9973_v36, 16 }
 0x321   : > { %7858 = vmatprep.mubr.msk.bf16.mxu1 %vm9669_vm1, %v9668_v1  ;;  %5711 = vperm.xlu0 %9423, %v5556_v59   ;;  %v5574_v59 = vld [vmem:[%s11935_s2 + $0x150] sm:$0xff] }
 0x322   : > { %v2189_v60 = vrot.slane %v12049_v2, 2  ;;  %v12059_v2 = vld [vmem:[#allocation3_spill] sm:$0xff] }
 0x323   : > { %8387 = vmatmul.mubr.msk.bf16.gmra.mrb[96].mxu0 %vm685_vm2, %v4651_v41  ;;  %v5547_v41 = vld [vmem:[%s11935_s2 + $0x78] sm:$0xff]  ;;  %v12061_v12 = vshll.u32 %v12059_v2, 16 }
 0x324   : > { %8390 = vmatprep.mubr.msk.bf16.mxu0 %vm9669_vm1, %v9668_v1  ;;  %5656 = vperm.xlu1 %9424, %v5545_v18   ;;  %v2190_v23 = vor.u32 %v2189_v60, %v2186_v57  ;;  %v12060_v60 = vshrl.u32 %v12059_v2, 16  ;;  %v5581_v2 = vld [vmem:[%s11935_s2 + $0x188] sm:$0xff] }
 0x326   : > { %v2191_v55 = vsel %vm2048_vm9, %v2181_v30, %v2190_v23  ;;  %v2200_v61 = vsel %vm2048_vm9, %v2190_v23, %v2199_v26  ;;  %v9582_v30 = vld [vmem:[%s9746_s29 + $0x30] sm:$0xf]  ;;  %v2231_v18 = vrot.slane %v12060_v60, 1  ;;  %v2234_v23 = vrot.slane %v12061_v12, 2  ;;  %v5584_v60 = vld [vmem:[%s11935_s2 + $0x1a0] sm:$0xff] }
 0x327   : > { %v9592_v12 = vld [vmem:[%s9746_s29 + $0x58] sm:$0xf] }
 0x328   : > { %7859 = vmatmul.mubr.msk.bf16.gmra.mrb[40].mxu1 %vm685_vm2, %v2155_v8  ;;  %5666 = vperm.xlu1 %9424, %v5547_v41   ;;  %v9576_v8 = vld [vmem:[%s9746_s29 + $0x18] sm:$0xf]  ;;  %v5565_v41 = vld [vmem:[%s11935_s2 + $0x108] sm:$0xff]  ;;  %v2235_v49 = vor.u32 %v2234_v23, %v2231_v18  ;;  %v9591_v18 = vld [vmem:[%s9746_s29 + $0x54] sm:$0xf] }
 0x329   : > { %7862 = vmatprep.mubr.msk.bf16.mxu1 %vm9669_vm1, %v9668_v1  ;;  %v6851_v62 = vcombine.low %v9575_v10, %v9576_v8  ;;  %v12062_v10 = vld [vmem:[#allocation4_spill] sm:$0xff]  ;;  %v6859_v23 = vcombine.low %v9591_v18, %v9592_v12 }
 0x32a   : > { %v12063_v8 = vshrl.u32 %v12062_v10, 16 }
 0x32b   : > { %8391 = vmatmul.mubr.msk.bf16.gmra.mrb[100].mxu0 %vm685_vm2, %v4660_v45  ;;  %v12052_v45 = vshrl.u32 %v10289_v40, 16 }
 0x32c   : > { %8394 = vmatprep.mubr.msk.bf16.mxu0 %vm9669_vm1, %v9668_v1  ;;  %5676 = vperm.xlu1 %9424, %v5549_v63   ;;  %v5570_v63 = vld [vmem:[%s11935_s2 + $0x130] sm:$0xff] }
 0x32d   : > { %v2204_v54 = vrot.slane %v12052_v45, 1  ;;  %v9585_v45 = vld [vmem:[%s9746_s29 + $0x3c] sm:$0xf] }
 0x32f   : > { %v2208_v40 = vor.u32 %v2207_v20, %v2204_v54  ;;  %v9586_v54 = vld [vmem:[%s9746_s29 + $0x40] sm:$0xf] }
 0x330   : > { %7863 = vmatmul.mubr.msk.bf16.gmra.mrb[44].mxu1 %vm685_vm2, %v2164_v4  ;;  %5686 = vperm.xlu1 %9424, %v5551_v46   ;;  %v5558_v4 = vld [vmem:[%s11935_s2 + $0xd0] sm:$0xff]  ;;  %v6856_v50 = vcombine.low %v9585_v45, %v9586_v54  ;;  %v12077_v54 = vld [vmem:[#allocation9_spill] sm:$0xff] }
 0x331   : > { %7866 = vmatprep.mubr.msk.bf16.mxu1 %vm9669_vm1, %v9668_v1  ;;  %v2209_v52 = vsel %vm2048_vm9, %v2199_v26, %v2208_v40  ;;  %5721 = vperm.xlu0 %9423, %v5558_v4   ;;  %v12064_v26 = vshll.u32 %v12062_v10, 16  ;;  %v5585_v10 = vld [vmem:[%s11935_s2 + $0x1a8] sm:$0xff] }
 0x333   : > { %8395 = vmatmul.mubr.msk.bf16.gmra.mrb[104].mxu0 %vm685_vm2, %v4669_v47  ;;  %v5560_v47 = vld [vmem:[%s11935_s2 + $0xe0] sm:$0xff]  ;;  %v2243_v46 = vrot.slane %v12064_v26, 2 }
 0x334   : > { %8398 = vmatprep.mubr.msk.bf16.mxu0 %vm9669_vm1, %v9668_v1  ;;  %5696 = vperm.xlu1 %9424, %v5553_v48   ;;  %v5571_v48 = vld [vmem:[%s11935_s2 + $0x138] sm:$0xff]  ;;  %v9594_v26 = vld [vmem:[%s9746_s29 + $0x60] sm:$0xf] }
 0x335   : > { %5731 = vperm.xlu0 %9423, %v5560_v47   ;;  %v5575_v47 = vld [vmem:[%s11935_s2 + $0x158] sm:$0xff] }
 0x338   : > { %7867 = vmatmul.mubr.msk.bf16.gmra.mrb[48].mxu1 %vm685_vm2, %v2173_v51  ;;  %5706 = vperm.xlu1 %9424, %v5555_v6   ;;  %v12056_v51 = vld [vmem:[#allocation2_spill] sm:$0xff]  ;;  %v12067_v6 = vshll.u32 %v12065_v42, 16 }
 0x339   : > { %7870 = vmatprep.mubr.msk.bf16.mxu1 %vm9669_vm1, %v9668_v1  ;;  %v12057_v35 = vshrl.u32 %v12056_v51, 16  ;;  %v12058_v3 = vshll.u32 %v12056_v51, 16  ;;  %5741 = vperm.xlu0 %9423, %v5562_v28   ;;  %v5577_v51 = vld [vmem:[%s11935_s2 + $0x168] sm:$0xff] }
 0x33a   : > { %v2252_v4 = vrot.slane %v12067_v6, 2  ;;  %v1900_v6 = vld [vmem:[%s9746_s29 + $0xec] sm:$0x3] }
 0x33b   : > { %8399 = vmatmul.mubr.msk.bf16.gmra.mrb[108].mxu0 %vm685_vm2, %v4678_v37  ;;  %v2222_v38 = vrot.slane %v12057_v35, 1  ;;  %v2225_v9 = vrot.slane %v12058_v3, 2  ;;  %v9581_v37 = vld [vmem:[%s9746_s29 + $0x2c] sm:$0xf]  ;;  %v5580_v35 = vld [vmem:[%s11935_s2 + $0x180] sm:$0xff] }
 0x33c   : > { %8402 = vmatprep.mubr.msk.bf16.mxu0 %vm9669_vm1, %v9668_v1  ;;  %5716 = vperm.xlu1 %9424, %v5557_v22   ;;  %v6854_v25 = vcombine.low %v9581_v37, %v9582_v30  ;;  %v9590_v3 = vld [vmem:[%s9746_s29 + $0x50] sm:$0xf] }
 0x33d   : > { %v2226_v39 = vor.u32 %v2225_v9, %v2222_v38  ;;  %5751 = vperm.xlu0 %9423, %v5564_v56   ;;  %v9589_v38 = vld [vmem:[%s9746_s29 + $0x4c] sm:$0xf]  ;;  %v5579_v56 = vld [vmem:[%s11935_s2 + $0x178] sm:$0xff]  ;;  %v5582_v37 = vld [vmem:[%s11935_s2 + $0x190] sm:$0xff] }
 0x33e   : > { %v6858_v9 = vcombine.low %v9589_v38, %v9590_v3  ;;  %v9600_v38 = vld [vmem:[%s9746_s29 + $0x74] sm:$0xf]  ;;  %v9601_v3 = vld [vmem:[%s9746_s29 + $0x78] sm:$0xf] }
 0x33f   : > { %v2227_v57 = vsel %vm2048_vm9, %v2217_v34, %v2226_v39  ;;  %v2236_v31 = vsel %vm2048_vm9, %v2226_v39, %v2235_v49 }
 0x340   : > { %7871 = vmatmul.mubr.msk.bf16.gmra.mrb[52].mxu1 %vm685_vm2, %v2182_v43  ;;  %5726 = vperm.xlu1 %9424, %v5559_v21   ;;  %v5563_v43 = vld [vmem:[%s11935_s2 + $0xf8] sm:$0xff] }
 0x341   : > { %7874 = vmatprep.mubr.msk.bf16.mxu1 %vm9669_vm1, %v9668_v1  ;;  %5761 = vperm.xlu0 %9423, %v5566_v24  }
 0x343   : > { %8403 = vmatmul.mubr.msk.bf16.gmra.mrb[112].mxu0 %vm685_vm2, %v4677_v58  ;;  %v2218_v58 = vsel %vm2048_vm9, %v2208_v40, %v2217_v34 }
 0x344   : > { %8408 = vmatprep.mubr.msk.bf16.mxu0 %vm9669_vm1, %v9668_v1  ;;  %5736 = vperm.xlu1 %9424, %v5561_v17  }
 0x345   : > { %5771 = vperm.xlu0 %9423, %v5568_v16   ;;  %v5583_v16 = vld [vmem:[%s11935_s2 + $0x198] sm:$0xff] }
 0x348   : > { %7875 = vmatmul.mubr.msk.bf16.gmra.mrb[56].mxu1 %vm685_vm2, %v2191_v55  ;;  %5746 = vperm.xlu1 %9424, %v5563_v43   ;;  %v9583_v55 = vld [vmem:[%s9746_s29 + $0x34] sm:$0xf] }
 0x349   : > { %7878 = vmatprep.mubr.msk.bf16.mxu1 %vm9669_vm1, %v9668_v1  ;;  %v6855_v15 = vcombine.low %v9583_v55, %v9584_v14  ;;  %5781 = vperm.xlu0 %9423, %v5570_v63   ;;  %v5586_v55 = vld [vmem:[%s11935_s2 + $0x1b0] sm:$0xff] }
 0x34b   : > { %8409 = vmatmul.mubr.msk.bf16.vlgmr.msra.gmra.mrb[0].mxu0 %vm685_vm2, %v6851_v62  ;;  %v2240_v62 = vrot.slane %v12063_v8, 1  ;;  %v5588_v8 = vld [vmem:[%s11935_s2 + $0x1c0] sm:$0xff] }
 0x34c   : > { %8412 = vmatprep.mubr.msk.bf16.mxu0 %vm9669_vm1, %v9668_v1  ;;  %5756 = vperm.xlu1 %9424, %v5565_v41  }
 0x34d   : > { %v2244_v20 = vor.u32 %v2243_v46, %v2240_v62  ;;  %v9593_v62 = vld [vmem:[%s9746_s29 + $0x5c] sm:$0xf] }
 0x34e   : > { %v6860_v46 = vcombine.low %v9593_v62, %v9594_v26  ;;  %v9608_v62 = vld [vmem:[%s9746_s29 + $0x90] sm:$0xf] }
 0x34f   : > { %v2245_v5 = vsel %vm2048_vm9, %v2235_v49, %v2244_v20 }
 0x350   : > { %7879 = vmatmul.mubr.msk.bf16.gmra.mrb[60].mxu1 %vm685_vm2, %v2200_v61  ;;  %5766 = vperm.xlu1 %9424, %v5567_v33   ;;  %v5572_v61 = vld [vmem:[%s11935_s2 + $0x140] sm:$0xff] }
 0x351   : > { %7882 = vmatprep.mubr.msk.bf16.mxu1 %vm9669_vm1, %v9668_v1  ;;  %5791 = vperm.xlu0 %9423, %v5572_v61   ;;  %v5587_v61 = vld [vmem:[%s11935_s2 + $0x1b8] sm:$0xff] }
 0x353   : > { %8413 = vmatmul.mubr.msk.bf16.gmra.mrb[4].mxu0 %vm685_vm2, %v6852_v19  ;;  %v12066_v19 = vshrl.u32 %v12065_v42, 16  ;;  %v9596_v42 = vld [vmem:[%s9746_s29 + $0x68] sm:$0xf] }
 0x354   : > { %8416 = vmatprep.mubr.msk.bf16.mxu0 %vm9669_vm1, %v9668_v1  ;;  %5776 = vperm.xlu1 %9424, %v5569_v0  }
 0x355   : > { %v2249_v40 = vrot.slane %v12066_v19, 1  ;;  %5801 = vperm.xlu0 %9423, %v5574_v59  }
 0x357   : > { %v2253_v22 = vor.u32 %v2252_v4, %v2249_v40  ;;  %v9597_v4 = vld [vmem:[%s9746_s29 + $0xe8] sm:$0xf] }
 0x358   : > { %7883 = vmatmul.mubr.msk.bf16.gmra.mrb[64].mxu1 %vm685_vm2, %v2209_v52  ;;  %5786 = vperm.xlu1 %9424, %v5571_v48   ;;  %v5573_v52 = vld [vmem:[%s11935_s2 + $0x148] sm:$0xff]  ;;  %v12079_v48 = vshll.u32 %v12077_v54, 16 }
 0x359   : > { %7886 = vmatprep.mubr.msk.bf16.mxu1 %vm9669_vm1, %v9668_v1  ;;  %5811 = vperm.xlu0 %9423, %v5576_v7   ;;  %v2254_v27 = vsel %vm2048_vm9, %v2244_v20, %v2253_v22 }
 0x35a   : > { %v2288_v59 = vrot.slane %v12079_v48, 2  ;;  %v9611_v48 = vld [vmem:[%s9746_s29 + $0x98] sm:$0xf] }
 0x35b   : > { %8417 = vmatmul.mubr.msk.bf16.gmra.mrb[8].mxu0 %vm685_vm2, %v6853_v11  ;;  %v12068_v11 = vld [vmem:[#allocation6_spill] sm:$0xff] }
 0x35c   : > { %8420 = vmatprep.mubr.msk.bf16.mxu0 %vm9669_vm1, %v9668_v1  ;;  %5796 = vperm.xlu1 %9424, %v5573_v52   ;;  %v12069_v34 = vshrl.u32 %v12068_v11, 16  ;;  %v12070_v28 = vshll.u32 %v12068_v11, 16  ;;  %v11616_v52 = vcombine.low %v9597_v4, %v1900_v6 }
 0x35d   : > { %5821 = vperm.xlu0 %9423, %v5578_v29   ;;  %v9598_v29 = vld [vmem:[%s9746_s29 + $0x6c] sm:$0xf] }
 0x35e   : > { %v2258_v21 = vrot.slane %v12069_v34, 1 }
 0x360   : > { %7887 = vmatmul.mubr.msk.bf16.gmra.mrb[68].mxu1 %vm685_vm2, %v2218_v58  ;;  %5806 = vperm.xlu1 %9424, %v5575_v47   ;;  %v2261_v58 = vrot.slane %v12070_v28, 2  ;;  %v2304_v28 = vshll.u32 %v11616_v52, 16 }
 0x361   : > { %7890 = vmatprep.mubr.msk.bf16.mxu1 %vm9669_vm1, %v9668_v1  ;;  %5831 = vperm.xlu0 %9423, %v5580_v35  }
 0x362   : > { %v2262_v17 = vor.u32 %v2261_v58, %v2258_v21  ;;  %v2301_v21 = vshrl.u32 %v11616_v52, 16  ;;  %v2306_v35 = vrot.slane %v2304_v28, 2  ;;  %v9616_v28 = vld [vmem:[%s9746_s29 + $0xa4] sm:$0xf] }
 0x363   : > { %8421 = vmatmul.mubr.msk.bf16.gmra.mrb[12].mxu0 %vm685_vm2, %v6854_v25  ;;  %v12071_v25 = vld [vmem:[#allocation7_spill] sm:$0xff] }
 0x364   : > { %8424 = vmatprep.mubr.msk.bf16.mxu0 %vm9669_vm1, %v9668_v1  ;;  %5816 = vperm.xlu1 %9424, %v5577_v51   ;;  %v2263_v30 = vsel %vm2048_vm9, %v2253_v22, %v2262_v17  ;;  %v12072_v39 = vshrl.u32 %v12071_v25, 16  ;;  %v12073_v24 = vshll.u32 %v12071_v25, 16  ;;  %v12082_v22 = vshll.u32 %v12080_v53, 16  ;;  %v9613_v53 = vld [vmem:[%s9746_s29 + $0x9c] sm:$0xf] }
 0x365   : > { %5841 = vperm.xlu0 %9423, %v5582_v37   ;;  %v2303_v51 = vrot.slane %v2301_v21, 1 }
 0x366   : > { %v2267_v43 = vrot.slane %v12072_v39, 1  ;;  %v2297_v47 = vrot.slane %v12082_v22, 2  ;;  %v9615_v22 = vld [vmem:[%s9746_s29 + $0xa0] sm:$0xff]  }
 0x368   : > { %7891 = vmatmul.mubr.msk.bf16.gmra.mrb[72].mxu1 %vm685_vm2, %v2227_v57  ;;  %5826 = vperm.xlu1 %9424, %v5579_v56   ;;  %v2270_v57 = vrot.slane %v12073_v24, 2  ;;  %v9603_v24 = vld [vmem:[%s9746_s29 + $0x80] sm:$0xf] }
 0x369   : > { %7894 = vmatprep.mubr.msk.bf16.mxu1 %vm9669_vm1, %v9668_v1  ;;  %5851 = vperm.xlu0 %9423, %v5584_v60  }
 0x36a   : > { %v2271_v41 = vor.u32 %v2270_v57, %v2267_v43  ;;  %v9602_v43 = vld [vmem:[%s9746_s29 + $0x7c] sm:$0xf] }
 0x36b   : > { %8425 = vmatmul.mubr.msk.bf16.gmra.mrb[16].mxu0 %vm685_vm2, %v6855_v15  ;;  %v12074_v15 = vld [vmem:[#allocation8_spill] sm:$0xff]  ;;  %v6864_v57 = vcombine.low %v9602_v43, %v9603_v24 }
 0x36c   : > { %8428 = vmatprep.mubr.msk.bf16.mxu0 %vm9669_vm1, %v9668_v1  ;;  %5836 = vperm.xlu1 %9424, %v5581_v2   ;;  %v2272_v14 = vsel %vm2048_vm9, %v2262_v17, %v2271_v41  ;;  %v12075_v49 = vshrl.u32 %v12074_v15, 16  ;;  %v12076_v63 = vshll.u32 %v12074_v15, 16  ;;  %v2307_v17 = vor.u32 %v2306_v35, %v2303_v51  ;;  %v9618_v35 = vld [vmem:[%s9746_s29 + $0xa8] sm:$0xff]   ;;  %v9620_v43 = vld [vmem:[%s9746_s29 + $0xb0] sm:$0xf] }
 0x36d   : > { %5861 = vperm.xlu0 %9423, %v5586_v55   ;;  %v9606_v55 = vld [vmem:[%s9746_s29 + $0x88] sm:$0xff]  }
 0x36e   : > { %v2276_v33 = vrot.slane %v12075_v49, 1 }
 0x370   : > { %7895 = vmatmul.mubr.msk.bf16.gmra.mrb[76].mxu1 %vm685_vm2, %v2236_v31  ;;  %5846 = vperm.xlu1 %9424, %v5583_v16   ;;  %v2279_v31 = vrot.slane %v12076_v63, 2  ;;  %v12083_v63 = vrot.slane %v9973_v36, 2 }
 0x371   : > { %7898 = vmatprep.mubr.msk.bf16.mxu1 %vm9669_vm1, %v9668_v1  ;;  %5871 = vperm.xlu0 %9423, %v5588_v8   ;;  %v9607_v8 = vld [vmem:[%s9746_s29 + $0x8c] sm:$0xf] }
 0x372   : > { %v2280_v0 = vor.u32 %v2279_v31, %v2276_v33  ;;  %v6866_v26 = vcombine.low %v9607_v8, %v9608_v62 }
 0x373   : > { %8429 = vmatmul.mubr.msk.bf16.gmra.mrb[20].mxu0 %vm685_vm2, %v6856_v50  ;;  %v12078_v50 = vshrl.u32 %v12077_v54, 16 }
 0x374   : > { %8432 = vmatprep.mubr.msk.bf16.mxu0 %vm9669_vm1, %v9668_v1  ;;  %5856 = vperm.xlu1 %9424, %v5585_v10   ;;  %v2281_v45 = vsel %vm2048_vm9, %v2271_v41, %v2280_v0  ;;  %v9605_v41 = vld [vmem:[%s9746_s29 + $0x88] sm:$0xf] }
 0x375   : > { %v2285_v20 = vrot.slane %v12078_v50, 1 }
 0x377   : > { %v2289_v40 = vor.u32 %v2288_v59, %v2285_v20  ;;  %v9610_v20 = vld [vmem:[%s9746_s29 + $0x94] sm:$0xf] }
 0x378   : > { %7899 = vmatmul.mubr.msk.bf16.gmra.mrb[80].mxu1 %vm685_vm2, %v2245_v5  ;;  %5866 = vperm.xlu1 %9424, %v5587_v61   ;;  %v9595_v5 = vld [vmem:[%s9746_s29 + $0x64] sm:$0xf]  ;;  %v6867_v59 = vcombine.low %v9610_v20, %v9611_v48 }
 0x379   : > { %7902 = vmatprep.mubr.msk.bf16.mxu1 %vm9669_vm1, %v9668_v1  ;;  %v6861_v19 = vcombine.low %v9595_v5, %v9596_v42  ;;  %v2290_v7 = vsel %vm2048_vm9, %v2280_v0, %v2289_v40  ;;  %v9612_v5 = vld [vmem:[%s9746_s29 + $0x98] sm:$0xff]   ;;  %v9627_v20 = vld [vmem:[%s9746_s29 + $0xc0] sm:$0xff]  }
 0x37a   : > { %v2762_v42 = vrot.slane %v9612_v5, 2  ;;  %v2772_v48 = vrot.slane %v9627_v20, 2 }
 0x37b   : > { %8433 = vmatmul.mubr.msk.bf16.gmra.mrb[24].mxu0 %vm685_vm2, %v6857_v13  ;;  %v2294_v13 = vrot.slane %v12081_v44, 1  ;;  %v9614_v44 = vld [vmem:[%s9746_s29 + $0xa0] sm:$0xf] }
 0x37c   : > { %8436 = vmatprep.mubr.msk.bf16.mxu0 %vm9669_vm1, %v9668_v1 }
 0x37d   : > { %v2298_v34 = vor.u32 %v2297_v47, %v2294_v13  ;;  %v6868_v13 = vcombine.low %v9613_v53, %v9614_v44  ;;  %v2764_v47 = vrot.slane %v9615_v22, 2  ;;  %v9629_v53 = vld [vmem:[%s9746_s29 + $0xc8] sm:$0xf] }
 0x37f   : > { %v2299_v58 = vsel %vm2048_vm9, %v2289_v40, %v2298_v34  ;;  %v2308_v25 = vsel %vm2048_vm9, %v2298_v34, %v2307_v17  ;;  %v2765_v34 = vsel %vm2726_vm3, %v2762_v42, %v2764_v47 }
 0x380   : > { %7903 = vmatmul.mubr.msk.bf16.gmra.mrb[84].mxu1 %vm685_vm2, %v2254_v27  ;;  %v9599_v27 = vld [vmem:[%s9746_s29 + $0x70] sm:$0xf] }
 0x381   : > { %7906 = vmatprep.mubr.msk.bf16.mxu1 %vm9669_vm1, %v9668_v1  ;;  %v6862_v11 = vcombine.low %v9598_v29, %v9599_v27 }
 0x383   : > { %8437 = vmatmul.mubr.msk.bf16.gmra.mrb[28].mxu0 %vm685_vm2, %v6858_v9  ;;  %v6863_v9 = vcombine.low %v9600_v38, %v9601_v3  ;;  %v2766_v38 = vrot.slane %v9618_v35, 2 }
 0x384   : > { %8440 = vmatprep.mubr.msk.bf16.mxu0 %vm9669_vm1, %v9668_v1 }
 0x388   : > { %7907 = vmatmul.mubr.msk.bf16.gmra.mrb[88].mxu1 %vm685_vm2, %v2263_v30 }
 0x389   : > { %7910 = vmatprep.mubr.msk.bf16.mxu1 %vm9669_vm1, %v9668_v1 }
 0x38b   : > { %8441 = vmatmul.mubr.msk.bf16.gmra.mrb[32].mxu0 %vm685_vm2, %v6859_v23  ;;  %v9604_v23 = vld [vmem:[%s9746_s29 + $0x84] sm:$0xf] }
 0x38c   : > { %8444 = vmatprep.mubr.msk.bf16.mxu0 %vm9669_vm1, %v9668_v1  ;;  %v6865_v16 = vcombine.low %v9604_v23, %v9605_v41 }
 0x390   : > { %7911 = vmatmul.mubr.msk.bf16.gmra.mrb[92].mxu1 %vm685_vm2, %v2272_v14  ;;  %v2758_v14 = vrot.slane %v9606_v55, 2 }
 0x391   : > { %7914 = vmatprep.mubr.msk.bf16.mxu1 %vm9669_vm1, %v9668_v1 }
 0x392   : > { %v2759_v31 = vsel %vm2726_vm3, %v12083_v63, %v2758_v14 }
 0x393   : > { %8445 = vmatmul.mubr.msk.bf16.gmra.mrb[36].mxu0 %vm685_vm2, %v6860_v46  ;;  %v9609_v46 = vld [vmem:[%s9746_s29 + $0x90] sm:$0xff]  }
 0x394   : > { %8448 = vmatprep.mubr.msk.bf16.mxu0 %vm9669_vm1, %v9668_v1  ;;  %v2760_v0 = vrot.slane %v9609_v46, 2 }
 0x396   : > { %v2761_v54 = vsel %vm2726_vm3, %v2758_v14, %v2760_v0  ;;  %v2763_v4 = vsel %vm2726_vm3, %v2760_v0, %v2762_v42  ;;  %v9622_v14 = vld [vmem:[%s9746_s29 + $0xb4] sm:$0xf] }
 0x398   : > { %7915 = vmatmul.mubr.msk.bf16.gmra.mrb[96].mxu1 %vm685_vm2, %v2281_v45 }
 0x399   : > { %7918 = vmatprep.mubr.msk.bf16.mxu1 %vm9669_vm1, %v9668_v1 }
 0x39b   : > { %8449 = vmatmul.mubr.msk.bf16.gmra.mrb[40].mxu0 %vm685_vm2, %v6861_v19 }
 0x39c   : > { %8452 = vmatprep.mubr.msk.bf16.mxu0 %vm9669_vm1, %v9668_v1 }
 0x3a0   : > { %7919 = vmatmul.mubr.msk.bf16.gmra.mrb[100].mxu1 %vm685_vm2, %v2290_v7 }
 0x3a1   : > { %7922 = vmatprep.mubr.msk.bf16.mxu1 %vm9669_vm1, %v9668_v1 }
 0x3a3   : > { %8453 = vmatmul.mubr.msk.bf16.gmra.mrb[44].mxu0 %vm685_vm2, %v6862_v11 }
 0x3a4   : > { %8456 = vmatprep.mubr.msk.bf16.mxu0 %vm9669_vm1, %v9668_v1 }
 0x3a8   : > { %7923 = vmatmul.mubr.msk.bf16.gmra.mrb[104].mxu1 %vm685_vm2, %v2299_v58  ;;  %v9617_v58 = vld [vmem:[%s9746_s29 + $0xa8] sm:$0xf] }
 0x3a9   : > { %7926 = vmatprep.mubr.msk.bf16.mxu1 %vm9669_vm1, %v9668_v1  ;;  %v6869_v51 = vcombine.low %v9616_v28, %v9617_v58  ;;  %v9631_v58 = vld [vmem:[%s9746_s29 + $0xcc] sm:$0xf] }
 0x3ab   : > { %v11639_v56 = vpop.f32.mrb[0].mxu1  ;;  %8457 = vmatmul.mubr.msk.bf16.gmra.mrb[48].mxu0 %vm685_vm2, %v6863_v9 }
 0x3ac   : > { %v7820_v37 = vpop.f32.mrb[1].mxu1  ;;  %8460 = vmatprep.mubr.msk.bf16.mxu0 %vm9669_vm1, %v9668_v1 }
 0x3ad   : > { %v11644_v30 = vpop.f32.mrb[2].mxu1  ;;  %v2767_v37 = vsel %vm2726_vm3, %v2764_v47, %v2766_v38 }
 0x3ae   : > { %v7821_v39 = vpop.f32.mrb[3].mxu1 }
 0x3af   : > { %v9619_v39 = vld [vmem:[%s9746_s29 + $0xac] sm:$0xf] }
 0x3b0   : > { %7927 = vmatmul.mubr.msk.bf16.gmra.mrb[108].mxu1 %vm685_vm2, %v2308_v25  ;;  %v6870_v24 = vcombine.low %v9619_v39, %v9620_v43 }
 0x3b1   : > { %7930 = vmatprep.mubr.msk.bf16.mxu1 %vm9669_vm1, %v9668_v1 }
 0x3b3   : > { %v11652_v2 = vpop.f32.mrb[4].mxu1  ;;  %8461 = vmatmul.mubr.msk.bf16.gmra.mrb[52].mxu0 %vm685_vm2, %v6864_v57  ;;  %v9621_v57 = vld [vmem:[%s9746_s29 + $0xb0] sm:$0xff]  }
 0x3b4   : > { %v7824_v60 = vpop.f32.mrb[5].mxu1  ;;  %8464 = vmatprep.mubr.msk.bf16.mxu0 %vm9669_vm1, %v9668_v1 }
 0x3b5   : > { %v11657_v18 = vpop.f32.mrb[6].mxu1  ;;  %v2768_v60 = vrot.slane %v9621_v57, 2  ;;  %v9634_v57 = vld [vmem:[%s9746_s29 + $0xd4] sm:$0xf] }
 0x3b6   : > { %v7825_v12 = vpop.f32.mrb[7].mxu1 }
 0x3b8   : > { %7931 = vmatmul.mubr.msk.bf16.gmra.mrb[112].mxu1 %vm685_vm2, %v2307_v17 }
 0x3b9   : > { %7996 = vmatprep.mubr.msk.bf16.mxu1 %vm9669_vm1, %v9668_v1 }
 0x3bb   : > { %v11665_v15 = vpop.f32.mrb[8].mxu1  ;;  %8465 = vmatmul.mubr.msk.bf16.gmra.mrb[56].mxu0 %vm685_vm2, %v6865_v16  ;;  %v2769_v16 = vsel %vm2726_vm3, %v2766_v38, %v2768_v60  ;;  %v9633_v38 = vld [vmem:[%s9746_s29 + $0xd0] sm:$0xff]  }
 0x3bc   : > { %v7828_v49 = vpop.f32.mrb[9].mxu1  ;;  %8468 = vmatprep.mubr.msk.bf16.mxu0 %vm9669_vm1, %v9668_v1 }
 0x3bd   : > { %v11670_v33 = vpop.f32.mrb[10].mxu1  ;;  %v9623_v49 = vld [vmem:[%s9746_s29 + $0xb8] sm:$0xf] }
 0x3be   : > { %v7829_v10 = vpop.f32.mrb[11].mxu1  ;;  %v6871_v63 = vcombine.low %v9622_v14, %v9623_v49 }
 0x3c0   : > { %7997 = vmatmul.mubr.msk.bf16.vlgmr.msra.gmra.mrb[60].mxu1 %vm685_vm2, %v2759_v31  ;;  %v9624_v31 = vld [vmem:[%s9746_s29 + $0xb8] sm:$0xff]  }
 0x3c1   : > { %8000 = vmatprep.mubr.msk.bf16.mxu1 %vm9669_vm1, %v9668_v1  ;;  %v2770_v10 = vrot.slane %v9624_v31, 2 }
 0x3c3   : > { %v11681_v61 = vpop.f32.mrb[12].mxu1  ;;  %8469 = vmatmul.mubr.msk.bf16.gmra.mrb[60].mxu0 %vm685_vm2, %v6866_v26  ;;  %v2771_v46 = vsel %vm2726_vm3, %v2768_v60, %v2770_v10  ;;  %v9635_v60 = vld [vmem:[%s9746_s29 + $0xd8] sm:$0xf] }
 0x3c4   : > { %v7832_v36 = vpop.f32.mrb[13].mxu1  ;;  %8472 = vmatprep.mubr.msk.bf16.mxu0 %vm9669_vm1, %v9668_v1 }
 0x3c5   : > { %v11686_v45 = vpop.f32.mrb[14].mxu1  ;;  %v9625_v36 = vld [vmem:[%s9746_s29 + $0xbc] sm:$0xf] }
 0x3c6   : > { %v7833_v50 = vpop.f32.mrb[15].mxu1 }
 0x3c8   : > { %8001 = vmatmul.mubr.msk.bf16.gmra.mrb[64].mxu1 %vm685_vm2, %v2761_v54  ;;  %v9626_v54 = vld [vmem:[%s9746_s29 + $0xc0] sm:$0xf] }
 0x3c9   : > { %8004 = vmatprep.mubr.msk.bf16.mxu1 %vm9669_vm1, %v9668_v1  ;;  %v6872_v50 = vcombine.low %v9625_v36, %v9626_v54  ;;  %v9639_v36 = vld [vmem:[%s9746_s29 + $0xe0] sm:$0xff]  }
 0x3ca   : > { %v2780_v54 = vrot.slane %v9639_v36, 2  ;;  %v6879_v36 = vcombine.low %v11266_v32, %v11266_v32 }
 0x3cb   : > { %v11695_v19 = vpop.f32.mrb[16].mxu1  ;;  %8473 = vmatmul.mubr.msk.bf16.gmra.mrb[64].mxu0 %vm685_vm2, %v6867_v59 }
 0x3cc   : > { %v7836_v40 = vpop.f32.mrb[17].mxu1  ;;  %8476 = vmatprep.mubr.msk.bf16.mxu0 %vm9669_vm1, %v9668_v1 }
 0x3cd   : > { %v11700_v6 = vpop.f32.mrb[18].mxu1  ;;  %v2773_v40 = vsel %vm2726_vm3, %v2770_v10, %v2772_v48 }
 0x3ce   : > { %v7837_v7 = vpop.f32.mrb[19].mxu1 }
 0x3cf   : > { %v9628_v7 = vld [vmem:[%s9746_s29 + $0xc4] sm:$0xf] }
 0x3d0   : > { %8005 = vmatmul.mubr.msk.bf16.gmra.mrb[68].mxu1 %vm685_vm2, %v2763_v4  ;;  %v6873_v44 = vcombine.low %v9628_v7, %v9629_v53  ;;  %v9641_v7 = vld [vmem:[%s9746_s29 + $0xe8] sm:$0xf] }
 0x3d1   : > { %8008 = vmatprep.mubr.msk.bf16.mxu1 %vm9669_vm1, %v9668_v1 }
 0x3d3   : > { %v11709_v29 = vpop.f32.mrb[20].mxu1  ;;  %8477 = vmatmul.mubr.msk.bf16.gmra.mrb[68].mxu0 %vm685_vm2, %v6868_v13  ;;  %v9630_v13 = vld [vmem:[%s9746_s29 + $0xc8] sm:$0xff]  }
 0x3d4   : > { %v7840_v27 = vpop.f32.mrb[21].mxu1  ;;  %8480 = vmatprep.mubr.msk.bf16.mxu0 %vm9669_vm1, %v9668_v1  ;;  %v2774_v22 = vrot.slane %v9630_v13, 2  ;;  %v5592_v13 = vpop.permute.xlu0 %5591 }
 0x3d5   : > { %v11714_v11 = vpop.f32.mrb[22].mxu1 }
 0x3d6   : > { %v7841_v21 = vpop.f32.mrb[23].mxu1 }
 0x3d7   : > { %v2775_v21 = vsel %vm2726_vm3, %v2772_v48, %v2774_v22 }
 0x3d8   : > { %8009 = vmatmul.mubr.msk.bf16.gmra.mrb[72].mxu1 %vm685_vm2, %v2765_v34 }
 0x3d9   : > { %8012 = vmatprep.mubr.msk.bf16.mxu1 %vm9669_vm1, %v9668_v1 }
 0x3db   : > { %v11723_v3 = vpop.f32.mrb[24].mxu1  ;;  %8481 = vmatmul.mubr.msk.bf16.gmra.mrb[72].mxu0 %vm685_vm2, %v6869_v51  ;;  %v9632_v51 = vld [vmem:[%s9746_s29 + $0xd0] sm:$0xf] }
 0x3dc   : > { %v7844_v9 = vpop.f32.mrb[25].mxu1  ;;  %8484 = vmatprep.mubr.msk.bf16.mxu0 %vm9669_vm1, %v9668_v1  ;;  %v6874_v35 = vcombine.low %v9631_v58, %v9632_v51 }
 0x3dd   : > { %v11728_v17 = vpop.f32.mrb[26].mxu1  ;;  %v2776_v9 = vrot.slane %v9633_v38, 2  ;;  %v9642_v38 = vld [vmem:[%s9746_s29 + $0xec] sm:$0xf] }
 0x3de   : > { %v7845_v25 = vpop.f32.mrb[27].mxu1 }
 0x3df   : > { %v2777_v43 = vsel %vm2726_vm3, %v2774_v22, %v2776_v9 }
 0x3e0   : > { %8013 = vmatmul.mubr.msk.bf16.gmra.mrb[76].mxu1 %vm685_vm2, %v2767_v37 }
 0x3e1   : > { %8016 = vmatprep.mubr.msk.bf16.mxu1 %vm9669_vm1, %v9668_v1 }
 0x3e3   : > { %v11737_v12 = vpop.f32.mrb[28].mxu1  ;;  %8485 = vmatmul.mubr.msk.bf16.gmra.mrb[76].mxu0 %vm685_vm2, %v6870_v24 }
 0x3e4   : > { %v7848_v23 = vpop.f32.mrb[29].mxu1  ;;  %8488 = vmatprep.mubr.msk.bf16.mxu0 %vm9669_vm1, %v9668_v1 }
 0x3e5   : > { %v11742_v41 = vpop.f32.mrb[30].mxu1  ;;  %v6875_v23 = vcombine.low %v9634_v57, %v9635_v60 }
 0x3e6   : > { %v7849_v55 = vpop.f32.mrb[31].mxu1 }
 0x3e8   : > { %8017 = vmatmul.mubr.msk.bf16.gmra.mrb[80].mxu1 %vm685_vm2, %v2769_v16  ;;  %v9636_v16 = vld [vmem:[%s9746_s29 + $0xd8] sm:$0xff]  }
 0x3e9   : > { %8020 = vmatprep.mubr.msk.bf16.mxu1 %vm9669_vm1, %v9668_v1  ;;  %v2778_v55 = vrot.slane %v9636_v16, 2  ;;  %v5602_v16 = vpop.permute.xlu1 %5601 }
 0x3eb   : > { %v11751_v8 = vpop.f32.mrb[32].mxu1  ;;  %8489 = vmatmul.mubr.msk.bf16.gmra.mrb[80].mxu0 %vm685_vm2, %v6871_v63  ;;  %v2779_v31 = vsel %vm2726_vm3, %v2776_v9, %v2778_v55  ;;  %v9643_v9 = vld [vmem:[%s9746_s29 + $0xf0] sm:$0xf] }
 0x3ec   : > { %v7852_v62 = vpop.f32.mrb[33].mxu1  ;;  %8492 = vmatprep.mubr.msk.bf16.mxu0 %vm9669_vm1, %v9668_v1 }
 0x3ed   : > { %v11756_v26 = vpop.f32.mrb[34].mxu1  ;;  %v9637_v62 = vld [vmem:[%s9746_s29 + $0xdc] sm:$0xf] }
 0x3ee   : > { %v7853_v0 = vpop.f32.mrb[35].mxu1 }
 0x3f0   : > { %8021 = vmatmul.mubr.msk.bf16.gmra.mrb[84].mxu1 %vm685_vm2, %v2771_v46  ;;  %v9638_v46 = vld [vmem:[%s9746_s29 + $0xe0] sm:$0xf] }
 0x3f1   : > { %8024 = vmatprep.mubr.msk.bf16.mxu1 %vm9669_vm1, %v9668_v1  ;;  %v6876_v0 = vcombine.low %v9637_v62, %v9638_v46 }
 0x3f3   : > { %v11765_v59 = vpop.f32.mrb[36].mxu1  ;;  %8493 = vmatmul.mubr.msk.bf16.gmra.mrb[84].mxu0 %vm685_vm2, %v6872_v50 }
 0x3f4   : > { %v7856_v5 = vpop.f32.mrb[37].mxu1  ;;  %8496 = vmatprep.mubr.msk.bf16.mxu0 %vm9669_vm1, %v9668_v1 }
 0x3f5   : > { %v11770_v42 = vpop.f32.mrb[38].mxu1  ;;  %v2781_v5 = vsel %vm2726_vm3, %v2778_v55, %v2780_v54 }
 0x3f6   : > { %v7857_v4 = vpop.f32.mrb[39].mxu1 }
 0x3f7   : > { %v9640_v4 = vld [vmem:[%s9746_s29 + $0xe4] sm:$0xf]  ;;  %s11855_s29 = scalar_lea.vmem %s11936_s3, %s6517_s15 }
 0x3f8   : > { %8025 = vmatmul.mubr.msk.bf16.gmra.mrb[88].mxu1 %vm685_vm2, %v2773_v40  ;;  %v6877_v53 = vcombine.low %v9640_v4, %v9641_v7 }
 0x3f9   : > { %8028 = vmatprep.mubr.msk.bf16.mxu1 %vm9669_vm1, %v9668_v1 }
 0x3fb   : > { %v11779_v47 = vpop.f32.mrb[40].mxu1  ;;  %8497 = vmatmul.mubr.msk.bf16.gmra.mrb[88].mxu0 %vm685_vm2, %v6873_v44  ;;  %v2782_v44 = vrot.slane %v11616_v52, 2 }
 0x3fc   : > { %v7860_v27 = vpop.f32.mrb[41].mxu1  ;;  %8500 = vmatprep.mubr.msk.bf16.mxu0 %vm9669_vm1, %v9668_v1 }
 0x3fd   : > { %v11784_v34 = vpop.f32.mrb[42].mxu1 }
 0x3fe   : > { %v7861_v28 = vpop.f32.mrb[43].mxu1 }
 0x3ff   : > { %v2783_v28 = vsel %vm2726_vm3, %v2780_v54, %v2782_v44 }
 0x400   : > { %8029 = vmatmul.mubr.msk.bf16.gmra.mrb[92].mxu1 %vm685_vm2, %v2775_v21 }
 0x401   : > { %8032 = vmatprep.mubr.msk.bf16.mxu1 %vm9669_vm1, %v9668_v1 }
 0x403   : > { %v11793_v37 = vpop.f32.mrb[44].mxu1  ;;  %8501 = vmatmul.mubr.msk.bf16.gmra.mrb[92].mxu0 %vm685_vm2, %v6874_v35 }
 0x404   : > { %v7864_v25 = vpop.f32.mrb[45].mxu1  ;;  %8504 = vmatprep.mubr.msk.bf16.mxu0 %vm9669_vm1, %v9668_v1 }
 0x405   : > { %v11798_v39 = vpop.f32.mrb[46].mxu1  ;;  %v6878_v25 = vcombine.low %v9642_v38, %v9643_v9 }
 0x406   : > { %v7865_v24 = vpop.f32.mrb[47].mxu1 }
 0x407   : > { %v5597_v24 = vpop.permute.xlu0 %5596 }
 0x408   : > { %8033 = vmatmul.mubr.msk.bf16.gmra.mrb[96].mxu1 %vm685_vm2, %v2777_v43 }
 0x409   : > { %8036 = vmatprep.mubr.msk.bf16.mxu1 %vm9669_vm1, %v9668_v1 }
 0x40b   : > { %v11807_v14 = vpop.f32.mrb[48].mxu1  ;;  %8505 = vmatmul.mubr.msk.bf16.gmra.mrb[96].mxu0 %vm685_vm2, %v6875_v23 }
 0x40c   : > { %v7868_v49 = vpop.f32.mrb[49].mxu1  ;;  %8508 = vmatprep.mubr.msk.bf16.mxu0 %vm9669_vm1, %v9668_v1 }
 0x40d   : > { %v11812_v63 = vpop.f32.mrb[50].mxu1 }
 0x40e   : > { %v7869_v10 = vpop.f32.mrb[51].mxu1 }
 0x410   : > { %8037 = vmatmul.mubr.msk.bf16.gmra.mrb[100].mxu1 %vm685_vm2, %v2779_v31 }
 0x411   : > { %8040 = vmatprep.mubr.msk.bf16.mxu1 %vm9669_vm1, %v9668_v1 }
 0x413   : > { %v11821_v50 = vpop.f32.mrb[52].mxu1  ;;  %8509 = vmatmul.mubr.msk.bf16.gmra.mrb[100].mxu0 %vm685_vm2, %v6876_v0 }
 0x414   : > { %v7872_v20 = vpop.f32.mrb[53].mxu1  ;;  %8512 = vmatprep.mubr.msk.bf16.mxu0 %vm9669_vm1, %v9668_v1 }
 0x415   : > { %v11826_v48 = vpop.f32.mrb[54].mxu1  ;;  %v5607_v20 = vpop.permute.xlu1 %5606 }
 0x416   : > { %v7873_v40 = vpop.f32.mrb[55].mxu1 }
 0x418   : > { %8041 = vmatmul.mubr.msk.bf16.gmra.mrb[104].mxu1 %vm685_vm2, %v2781_v5 }
 0x419   : > { %8044 = vmatprep.mubr.msk.bf16.mxu1 %vm9669_vm1, %v9668_v1 }
 0x41b   : > { %v11836_v22 = vpop.f32.mrb[56].mxu1  ;;  %8513 = vmatmul.mubr.msk.bf16.gmra.mrb[104].mxu0 %vm685_vm2, %v6877_v53 }
 0x41c   : > { %v7876_v27 = vpop.f32.mrb[57].mxu1  ;;  %8516 = vmatprep.mubr.msk.bf16.mxu0 %vm9669_vm1, %v9668_v1 }
 0x41d   : > { %v11841_v21 = vpop.f32.mrb[58].mxu1 }
 0x41e   : > { %v7877_v58 = vpop.f32.mrb[59].mxu1  ;;  %v5245_v51 = vpop.f32.mrb[0].mxu0 }
 0x41f   : > { %v8526_v35 = vadd.f32 %v5245_v51, %v11639_v56  ;;  %v8410_v52 = vpop.f32.mrb[1].mxu0 }
 0x420   : > { %8045 = vmatmul.mubr.msk.bf16.gmra.mrb[108].mxu1 %vm685_vm2, %v2783_v28  ;;  %v5248_v43 = vpop.f32.mrb[2].mxu0 }
 0x421   : > { %v5874_v57 = vmul.f32 %v8526_v35, %v5592_v13  ;;  %v8527_v60 = vadd.f32 %v5248_v43, %v11644_v30  ;;  %v8411_v23 = vpop.f32.mrb[3].mxu0  ;;  %8048 = vmatprep.mubr.msk.bf16.mxu1 %vm9669_vm1, %v9668_v1  ;;  %v5612_v35 = vpop.permute.xlu0 %5611 }
 0x423   : > { %v5875_v55 = vmul.f32 %v8527_v60, %v5597_v24  ;;  %8517 = vmatmul.mubr.msk.bf16.gmra.mrb[108].mxu0 %vm685_vm2, %v6878_v25  ;;  %v6280_v56 = vmul.f32 %v5874_v57, %v5874_v57  ;;  %v5617_v25 = vpop.permute.xlu1 %5616 }
 0x424   : > { %8520 = vmatprep.mubr.msk.bf16.mxu0 %vm9669_vm1, %v9668_v1 }
 0x425   : > { %v7028_v30 = vpack.c.bf16 %v5875_v55, %v5874_v57  ;;  %v6217_v49 = vadd.f32 %v5875_v55, %v5874_v57  ;;  %v6281_v31 = vmul.f32 %v5875_v55, %v5875_v55 }
 0x426   : > { %v5253_v10 = vpop.f32.mrb[4].mxu0 }
 0x427   : > { %7029 = vst [vmem:[%s11855_s29] sm:$0xff] %v7028_v30   ;;  %v6337_v62 = vadd.f32 %v6281_v31, %v6280_v56  ;;  %v8528_v46 = vadd.f32 %v5253_v10, %v11652_v2  ;;  %v8414_v0 = vpop.f32.mrb[5].mxu0  ;;  %v5622_v31 = vpop.permute.xlu0 %5621 }
 0x428   : > { %8049 = vmatmul.mubr.msk.bf16.gmra.mrb[112].mxu1 %vm685_vm2, %v2782_v44  ;;  %v5256_v54 = vpop.f32.mrb[6].mxu0  ;;  %v5627_v0 = vpop.permute.xlu1 %5626 }
 0x429   : > { %v5876_v5 = vmul.f32 %v8528_v46, %v5602_v16  ;;  %v8529_v1 = vadd.f32 %v5256_v54, %v11657_v18  ;;  %v8415_v40 = vpop.f32.mrb[7].mxu0 }
 0x42b   : > { %v6282_v4 = vmul.f32 %v5876_v5, %v5876_v5  ;;  %v5877_v7 = vmul.f32 %v8529_v1, %v5607_v20  ;;  %v6218_v53 = vadd.f32 %v6217_v49, %v5876_v5  ;;  %8521 = vmatmul.mubr.msk.bf16.gmra.mrb[112].mxu0 %vm685_vm2, %v6879_v36 }
 0x42d   : > { %v7033_v13 = vpack.c.bf16 %v5877_v7, %v5876_v5  ;;  %v6219_v2 = vadd.f32 %v6218_v53, %v5877_v7  ;;  %v6283_v27 = vmul.f32 %v5877_v7, %v5877_v7  ;;  %v6338_v28 = vadd.f32 %v6337_v62, %v6282_v4 }
 0x42e   : > { %v5261_v58 = vpop.f32.mrb[8].mxu0 }
 0x42f   : > { %7165 = vst [vmem:[%s11855_s29 + $0x8] sm:$0xff] %v7033_v13   ;;  %v6339_v32 = vadd.f32 %v6338_v28, %v6283_v27  ;;  %v8530_v44 = vadd.f32 %v5261_v58, %v11665_v15  ;;  %v8418_v51 = vpop.f32.mrb[9].mxu0 }
 0x430   : > { %v5264_v52 = vpop.f32.mrb[10].mxu0 }
 0x431   : > { %v5878_v18 = vmul.f32 %v8530_v44, %v5612_v35  ;;  %v8531_v38 = vadd.f32 %v5264_v52, %v11670_v33  ;;  %v8419_v9 = vpop.f32.mrb[11].mxu0 }
 0x433   : > { %v6220_v43 = vadd.f32 %v6219_v2, %v5878_v18  ;;  %v6284_v24 = vmul.f32 %v5878_v18, %v5878_v18  ;;  %v5879_v57 = vmul.f32 %v8531_v38, %v5617_v25  ;;  %v5632_v2 = vpop.permute.xlu0 %5631 }
 0x435   : > { %v6340_v60 = vadd.f32 %v6339_v32, %v6284_v24  ;;  %v7038_v23 = vpack.c.bf16 %v5879_v57, %v5878_v18  ;;  %v6221_v16 = vadd.f32 %v6220_v43, %v5879_v57  ;;  %v6285_v55 = vmul.f32 %v5879_v57, %v5879_v57  ;;  %v5637_v32 = vpop.permute.xlu1 %5636 }
 0x436   : > { %v5269_v56 = vpop.f32.mrb[12].mxu0 }
 0x437   : > { %7166 = vst [vmem:[%s11855_s29 + $0x10] sm:$0xff] %v7038_v23   ;;  %v6341_v30 = vadd.f32 %v6340_v60, %v6285_v55  ;;  %v8532_v15 = vadd.f32 %v5269_v56, %v11681_v61  ;;  %v8422_v49 = vpop.f32.mrb[13].mxu0  ;;  %v5642_v57 = vpop.permute.xlu0 %5641 }
 0x438   : > { %v5272_v10 = vpop.f32.mrb[14].mxu0 }
 0x439   : > { %v5880_v62 = vmul.f32 %v8532_v15, %v5622_v31  ;;  %v8533_v33 = vadd.f32 %v5272_v10, %v11686_v45  ;;  %v8423_v46 = vpop.f32.mrb[15].mxu0  ;;  %v5647_v55 = vpop.permute.xlu1 %5646 }
 0x43b   : > { %v6222_v36 = vadd.f32 %v6221_v16, %v5880_v62  ;;  %v6286_v54 = vmul.f32 %v5880_v62, %v5880_v62  ;;  %v5881_v20 = vmul.f32 %v8533_v33, %v5627_v0 }
 0x43d   : > { %v6342_v5 = vadd.f32 %v6341_v30, %v6286_v54  ;;  %v7043_v1 = vpack.c.bf16 %v5881_v20, %v5880_v62  ;;  %v6223_v40 = vadd.f32 %v6222_v36, %v5881_v20  ;;  %v6287_v4 = vmul.f32 %v5881_v20, %v5881_v20  ;;  %v5652_v36 = vpop.permute.xlu0 %5651 }
 0x43e   : > { %v5277_v7 = vpop.f32.mrb[16].mxu0 }
 0x43f   : > { %7167 = vst [vmem:[%s11855_s29 + $0x18] sm:$0xff] %v7043_v1   ;;  %v6343_v53 = vadd.f32 %v6342_v5, %v6287_v4  ;;  %v8534_v61 = vadd.f32 %v5277_v7, %v11695_v19  ;;  %v8426_v13 = vpop.f32.mrb[17].mxu0  ;;  %v5657_v1 = vpop.permute.xlu1 %5656 }
 0x440   : > { %v5280_v27 = vpop.f32.mrb[18].mxu0 }
 0x441   : > { %v5882_v28 = vmul.f32 %v8534_v61, %v5632_v2  ;;  %v8535_v45 = vadd.f32 %v5280_v27, %v11700_v6  ;;  %v8427_v58 = vpop.f32.mrb[19].mxu0 }
 0x442   : > { %v5662_v58 = vpop.permute.xlu0 %5661 }
 0x443   : > { %v6224_v44 = vadd.f32 %v6223_v40, %v5882_v28  ;;  %v6288_v51 = vmul.f32 %v5882_v28, %v5882_v28  ;;  %v5883_v35 = vmul.f32 %v8535_v45, %v5637_v32 }
 0x445   : > { %v6344_v52 = vadd.f32 %v6343_v53, %v6288_v51  ;;  %v7048_v18 = vpack.c.bf16 %v5883_v35, %v5882_v28  ;;  %v6225_v38 = vadd.f32 %v6224_v44, %v5883_v35  ;;  %v6289_v9 = vmul.f32 %v5883_v35, %v5883_v35  ;;  %v5667_v35 = vpop.permute.xlu1 %5666 }
 0x446   : > { %v5285_v25 = vpop.f32.mrb[20].mxu0 }
 0x447   : > { %7168 = vst [vmem:[%s11855_s29 + $0x20] sm:$0xff] %v7048_v18   ;;  %v6345_v43 = vadd.f32 %v6344_v52, %v6289_v9  ;;  %v8536_v19 = vadd.f32 %v5285_v25, %v11709_v29  ;;  %v8430_v24 = vpop.f32.mrb[21].mxu0 }
 0x448   : > { %v5288_v60 = vpop.f32.mrb[22].mxu0 }
 0x449   : > { %v5884_v23 = vmul.f32 %v8536_v19, %v5642_v57  ;;  %v8537_v6 = vadd.f32 %v5288_v60, %v11714_v11  ;;  %v8431_v16 = vpop.f32.mrb[23].mxu0 }
 0x44b   : > { %v6226_v56 = vadd.f32 %v6225_v38, %v5884_v23  ;;  %v6290_v30 = vmul.f32 %v5884_v23, %v5884_v23  ;;  %v5885_v15 = vmul.f32 %v8537_v6, %v5647_v55 }
 0x44d   : > { %v6346_v49 = vadd.f32 %v6345_v43, %v6290_v30  ;;  %v7053_v31 = vpack.c.bf16 %v5885_v15, %v5884_v23  ;;  %v6227_v10 = vadd.f32 %v6226_v56, %v5885_v15  ;;  %v6291_v62 = vmul.f32 %v5885_v15, %v5885_v15  ;;  %v5672_v23 = vpop.permute.xlu0 %5671  ;;  %v5677_v56 = vpop.permute.xlu1 %5676 }
 0x44e   : > { %v5293_v33 = vpop.f32.mrb[24].mxu0 }
 0x44f   : > { %7169 = vst [vmem:[%s11855_s29 + $0x28] sm:$0xff] %v7053_v31   ;;  %v6347_v46 = vadd.f32 %v6346_v49, %v6291_v62  ;;  %v8538_v29 = vadd.f32 %v5293_v33, %v11723_v3  ;;  %v8434_v0 = vpop.f32.mrb[25].mxu0 }
 0x450   : > { %v5296_v54 = vpop.f32.mrb[26].mxu0 }
 0x451   : > { %v5886_v20 = vmul.f32 %v8538_v29, %v5652_v36  ;;  %v8539_v11 = vadd.f32 %v5296_v54, %v11728_v17  ;;  %v8435_v5 = vpop.f32.mrb[27].mxu0  ;;  %v5682_v36 = vpop.permute.xlu0 %5681 }
 0x452   : > { %v5687_v5 = vpop.permute.xlu1 %5686 }
 0x453   : > { %v6228_v40 = vadd.f32 %v6227_v10, %v5886_v20  ;;  %v6292_v4 = vmul.f32 %v5886_v20, %v5886_v20  ;;  %v5887_v7 = vmul.f32 %v8539_v11, %v5657_v1 }
 0x455   : > { %v6348_v53 = vadd.f32 %v6347_v46, %v6292_v4  ;;  %v7058_v61 = vpack.c.bf16 %v5887_v7, %v5886_v20  ;;  %v6229_v13 = vadd.f32 %v6228_v40, %v5887_v7  ;;  %v6293_v2 = vmul.f32 %v5887_v7, %v5887_v7 }
 0x456   : > { %v5301_v27 = vpop.f32.mrb[28].mxu0 }
 0x457   : > { %7170 = vst [vmem:[%s11855_s29 + $0x30] sm:$0xff] %v7058_v61   ;;  %v6349_v28 = vadd.f32 %v6348_v53, %v6293_v2  ;;  %v8540_v3 = vadd.f32 %v5301_v27, %v11737_v12  ;;  %v8438_v45 = vpop.f32.mrb[29].mxu0 }
 0x458   : > { %v5304_v32 = vpop.f32.mrb[30].mxu0 }
 0x459   : > { %v5888_v44 = vmul.f32 %v8540_v3, %v5662_v58  ;;  %v8541_v17 = vadd.f32 %v5304_v32, %v11742_v41  ;;  %v8439_v51 = vpop.f32.mrb[31].mxu0  ;;  %v5692_v3 = vpop.permute.xlu0 %5691 }
 0x45b   : > { %v6230_v52 = vadd.f32 %v6229_v13, %v5888_v44  ;;  %v6294_v18 = vmul.f32 %v5888_v44, %v5888_v44  ;;  %v5889_v38 = vmul.f32 %v8541_v17, %v5667_v35 }
 0x45d   : > { %v6350_v9 = vadd.f32 %v6349_v28, %v6294_v18  ;;  %v7063_v25 = vpack.c.bf16 %v5889_v38, %v5888_v44  ;;  %v6231_v43 = vadd.f32 %v6230_v52, %v5889_v38  ;;  %v6295_v19 = vmul.f32 %v5889_v38, %v5889_v38  ;;  %v5697_v44 = vpop.permute.xlu1 %5696 }
 0x45e   : > { %v5309_v24 = vpop.f32.mrb[32].mxu0 }
 0x45f   : > { %7171 = vst [vmem:[%s11855_s29 + $0x38] sm:$0xff] %v7063_v25   ;;  %v6351_v57 = vadd.f32 %v6350_v9, %v6295_v19  ;;  %v8542_v12 = vadd.f32 %v5309_v24, %v11751_v8  ;;  %v8442_v60 = vpop.f32.mrb[33].mxu0  ;;  %v5702_v24 = vpop.permute.xlu0 %5701 }
 0x460   : > { %v5312_v6 = vpop.f32.mrb[34].mxu0 }
 0x461   : > { %v5890_v16 = vmul.f32 %v8542_v12, %v5672_v23  ;;  %v8543_v41 = vadd.f32 %v5312_v6, %v11756_v26  ;;  %v8443_v55 = vpop.f32.mrb[35].mxu0  ;;  %v5707_v23 = vpop.permute.xlu1 %5706 }
 0x463   : > { %v6232_v30 = vadd.f32 %v6231_v43, %v5890_v16  ;;  %v6296_v15 = vmul.f32 %v5890_v16, %v5890_v16  ;;  %v5891_v49 = vmul.f32 %v8543_v41, %v5677_v56 }
 0x465   : > { %v6352_v31 = vadd.f32 %v6351_v57, %v6296_v15  ;;  %v7068_v10 = vpack.c.bf16 %v5891_v49, %v5890_v16  ;;  %v6233_v62 = vadd.f32 %v6232_v30, %v5891_v49  ;;  %v6297_v33 = vmul.f32 %v5891_v49, %v5891_v49 }
 0x466   : > { %v5317_v46 = vpop.f32.mrb[36].mxu0 }
 0x467   : > { %7172 = vst [vmem:[%s11855_s29 + $0x40] sm:$0xff] %v7068_v10   ;;  %v6353_v29 = vadd.f32 %v6352_v31, %v6297_v33  ;;  %v8544_v8 = vadd.f32 %v5317_v46, %v11765_v59  ;;  %v8446_v0 = vpop.f32.mrb[37].mxu0 }
 0x468   : > { %v5320_v54 = vpop.f32.mrb[38].mxu0 }
 0x469   : > { %v5892_v20 = vmul.f32 %v8544_v8, %v5682_v36  ;;  %v8545_v26 = vadd.f32 %v5320_v54, %v11770_v42  ;;  %v8447_v11 = vpop.f32.mrb[39].mxu0  ;;  %v5717_v8 = vpop.permute.xlu1 %5716 }
 0x46b   : > { %v6234_v1 = vadd.f32 %v6233_v62, %v5892_v20  ;;  %v6298_v40 = vmul.f32 %v5892_v20, %v5892_v20  ;;  %v5893_v4 = vmul.f32 %v8545_v26, %v5687_v5  ;;  %v5712_v62 = vpop.permute.xlu0 %5711 }
 0x46d   : > { %v6354_v7 = vadd.f32 %v6353_v29, %v6298_v40  ;;  %v7073_v53 = vpack.c.bf16 %v5893_v4, %v5892_v20  ;;  %v6235_v61 = vadd.f32 %v6234_v1, %v5893_v4  ;;  %v6299_v13 = vmul.f32 %v5893_v4, %v5893_v4 }
 0x46e   : > { %v5325_v2 = vpop.f32.mrb[40].mxu0 }
 0x46f   : > { %7173 = vst [vmem:[%s11855_s29 + $0x48] sm:$0xff] %v7073_v53   ;;  %v6355_v27 = vadd.f32 %v6354_v7, %v6299_v13  ;;  %v8546_v59 = vadd.f32 %v5325_v2, %v11779_v47  ;;  %v8450_v28 = vpop.f32.mrb[41].mxu0  ;;  %v5722_v7 = vpop.permute.xlu0 %5721 }
 0x470   : > { %v5328_v45 = vpop.f32.mrb[42].mxu0  ;;  %v5727_v2 = vpop.permute.xlu1 %5726 }
 0x471   : > { %v5894_v58 = vmul.f32 %v8546_v59, %v5692_v3  ;;  %v8547_v42 = vadd.f32 %v5328_v45, %v11784_v34  ;;  %v8451_v32 = vpop.f32.mrb[43].mxu0 }
 0x473   : > { %v6236_v17 = vadd.f32 %v6235_v61, %v5894_v58  ;;  %v6300_v51 = vmul.f32 %v5894_v58, %v5894_v58  ;;  %v5895_v35 = vmul.f32 %v8547_v42, %v5697_v44 }
 0x475   : > { %v6356_v52 = vadd.f32 %v6355_v27, %v6300_v51  ;;  %v7078_v18 = vpack.c.bf16 %v5895_v35, %v5894_v58  ;;  %v6237_v38 = vadd.f32 %v6236_v17, %v5895_v35  ;;  %v6301_v9 = vmul.f32 %v5895_v35, %v5895_v35  ;;  %v5732_v51 = vpop.permute.xlu0 %5731 }
 0x476   : > { %v5333_v25 = vpop.f32.mrb[44].mxu0 }
 0x477   : > { %7174 = vst [vmem:[%s11855_s29 + $0x50] sm:$0xff] %v7078_v18   ;;  %v6357_v43 = vadd.f32 %v6356_v52, %v6301_v9  ;;  %v8548_v47 = vadd.f32 %v5333_v25, %v11793_v37  ;;  %v8454_v19 = vpop.f32.mrb[45].mxu0 }
 0x478   : > { %v5336_v57 = vpop.f32.mrb[46].mxu0 }
 0x479   : > { %v5896_v12 = vmul.f32 %v8548_v47, %v5702_v24  ;;  %v8549_v34 = vadd.f32 %v5336_v57, %v11798_v39  ;;  %v8455_v60 = vpop.f32.mrb[47].mxu0 }
 0x47b   : > { %v6238_v6 = vadd.f32 %v6237_v38, %v5896_v12  ;;  %v6302_v16 = vmul.f32 %v5896_v12, %v5896_v12  ;;  %v5897_v41 = vmul.f32 %v8549_v34, %v5707_v23  ;;  %v5737_v38 = vpop.permute.xlu1 %5736 }
 0x47d   : > { %v6358_v55 = vadd.f32 %v6357_v43, %v6302_v16  ;;  %v7083_v56 = vpack.c.bf16 %v5897_v41, %v5896_v12  ;;  %v6239_v30 = vadd.f32 %v6238_v6, %v5897_v41  ;;  %v6303_v15 = vmul.f32 %v5897_v41, %v5897_v41 }
 0x47e   : > { %v5341_v49 = vpop.f32.mrb[48].mxu0 }
 0x47f   : > { %7175 = vst [vmem:[%s11855_s29 + $0x58] sm:$0xff] %v7083_v56   ;;  %v6359_v31 = vadd.f32 %v6358_v55, %v6303_v15  ;;  %v8550_v37 = vadd.f32 %v5341_v49, %v11807_v14  ;;  %v8458_v10 = vpop.f32.mrb[49].mxu0  ;;  %v5742_v55 = vpop.permute.xlu0 %5741 }
 0x480   : > { %v5344_v33 = vpop.f32.mrb[50].mxu0  ;;  %v5747_v49 = vpop.permute.xlu1 %5746 }
 0x481   : > { %v5898_v46 = vmul.f32 %v8550_v37, %v5712_v62  ;;  %v8551_v39 = vadd.f32 %v5344_v33, %v11812_v63  ;;  %v8459_v29 = vpop.f32.mrb[51].mxu0 }
 0x483   : > { %v6240_v0 = vadd.f32 %v6239_v30, %v5898_v46  ;;  %v6304_v36 = vmul.f32 %v5898_v46, %v5898_v46  ;;  %v5899_v54 = vmul.f32 %v8551_v39, %v5717_v8 }
 0x485   : > { %v6360_v20 = vadd.f32 %v6359_v31, %v6304_v36  ;;  %v7088_v26 = vpack.c.bf16 %v5899_v54, %v5898_v46  ;;  %v6241_v11 = vadd.f32 %v6240_v0, %v5899_v54  ;;  %v6305_v5 = vmul.f32 %v5899_v54, %v5899_v54 }
 0x486   : > { %v5349_v1 = vpop.f32.mrb[52].mxu0 }
 0x487   : > { %7176 = vst [vmem:[%s11855_s29 + $0x60] sm:$0xff] %v7088_v26   ;;  %v6361_v40 = vadd.f32 %v6360_v20, %v6305_v5  ;;  %v8552_v14 = vadd.f32 %v5349_v1, %v11821_v50  ;;  %v8462_v4 = vpop.f32.mrb[53].mxu0  ;;  %v5752_v5 = vpop.permute.xlu0 %5751 }
 0x488   : > { %v5352_v53 = vpop.f32.mrb[54].mxu0 }
 0x489   : > { %v5900_v61 = vmul.f32 %v8552_v14, %v5722_v7  ;;  %v8553_v63 = vadd.f32 %v5352_v53, %v11826_v48  ;;  %v8463_v13 = vpop.f32.mrb[55].mxu0  ;;  %v5757_v7 = vpop.permute.xlu1 %5756 }
 0x48b   : > { %v6242_v27 = vadd.f32 %v6241_v11, %v5900_v61  ;;  %v6306_v59 = vmul.f32 %v5900_v61, %v5900_v61  ;;  %v5901_v28 = vmul.f32 %v8553_v63, %v5727_v2 }
 0x48d   : > { %v6362_v3 = vadd.f32 %v6361_v40, %v6306_v59  ;;  %v7093_v45 = vpack.c.bf16 %v5901_v28, %v5900_v61  ;;  %v6243_v58 = vadd.f32 %v6242_v27, %v5901_v28  ;;  %v6307_v42 = vmul.f32 %v5901_v28, %v5901_v28 }
 0x48e   : > { %v5357_v32 = vpop.f32.mrb[56].mxu0 }
 0x48f   : > { %7177 = vst [vmem:[%s11855_s29 + $0x68] sm:$0xff] %v7093_v45   ;;  %v6363_v44 = vadd.f32 %v6362_v3, %v6307_v42  ;;  %v8554_v50 = vadd.f32 %v5357_v32, %v11836_v22  ;;  %v8466_v17 = vpop.f32.mrb[57].mxu0 }
 0x490   : > { %v5360_v35 = vpop.f32.mrb[58].mxu0  ;;  %v5762_v17 = vpop.permute.xlu0 %5761 }
 0x491   : > { %v5902_v52 = vmul.f32 %v8554_v50, %v5732_v51  ;;  %v8555_v48 = vadd.f32 %v5360_v35, %v11841_v21  ;;  %v8467_v18 = vpop.f32.mrb[59].mxu0 }
 0x492   : > { %v5767_v18 = vpop.permute.xlu1 %5766 }
 0x493   : > { %v6244_v9 = vadd.f32 %v6243_v58, %v5902_v52  ;;  %v6308_v25 = vmul.f32 %v5902_v52, %v5902_v52  ;;  %v5903_v43 = vmul.f32 %v8555_v48, %v5737_v38  ;;  %v3028_v47 = vpop.f32.mrb[60].mxu1 }
 0x494   : > { %v7998_v19 = vpop.f32.mrb[61].mxu1 }
 0x495   : > { %v6364_v24 = vadd.f32 %v6363_v44, %v6308_v25  ;;  %v7098_v57 = vpack.c.bf16 %v5903_v43, %v5902_v52  ;;  %v6245_v12 = vadd.f32 %v6244_v9, %v5903_v43  ;;  %v6309_v34 = vmul.f32 %v5903_v43, %v5903_v43  ;;  %v3031_v60 = vpop.f32.mrb[62].mxu1 }
 0x496   : > { %v7999_v22 = vpop.f32.mrb[63].mxu1  ;;  %v5365_v23 = vpop.f32.mrb[60].mxu0 }
 0x497   : > { %7178 = vst [vmem:[%s11855_s29 + $0x70] sm:$0xff] %v7098_v57   ;;  %v6365_v6 = vadd.f32 %v6364_v24, %v6309_v34  ;;  %v8556_v16 = vadd.f32 %v5365_v23, %v3028_v47  ;;  %v8470_v41 = vpop.f32.mrb[61].mxu0 }
 0x498   : > { %v5368_v21 = vpop.f32.mrb[62].mxu0  ;;  %v5772_v41 = vpop.permute.xlu0 %5771 }
 0x499   : > { %v5904_v56 = vmul.f32 %v8556_v16, %v5742_v55  ;;  %v8557_v30 = vadd.f32 %v5368_v21, %v3031_v60  ;;  %v8471_v15 = vpop.f32.mrb[63].mxu0 }
 0x49a   : > { %v5777_v15 = vpop.permute.xlu1 %5776 }
 0x49b   : > { %v6246_v31 = vadd.f32 %v6245_v12, %v5904_v56  ;;  %v6310_v37 = vmul.f32 %v5904_v56, %v5904_v56  ;;  %v5905_v10 = vmul.f32 %v8557_v30, %v5747_v49  ;;  %v3036_v62 = vpop.f32.mrb[64].mxu1 }
 0x49c   : > { %v8002_v33 = vpop.f32.mrb[65].mxu1 }
 0x49d   : > { %v6366_v46 = vadd.f32 %v6365_v6, %v6310_v37  ;;  %v7103_v39 = vpack.c.bf16 %v5905_v10, %v5904_v56  ;;  %v6247_v29 = vadd.f32 %v6246_v31, %v5905_v10  ;;  %v6311_v8 = vmul.f32 %v5905_v10, %v5905_v10  ;;  %v3039_v0 = vpop.f32.mrb[66].mxu1 }
 0x49e   : > { %v8003_v36 = vpop.f32.mrb[67].mxu1  ;;  %v5373_v54 = vpop.f32.mrb[64].mxu0 }
 0x49f   : > { %7179 = vst [vmem:[%s11855_s29 + $0x78] sm:$0xff] %v7103_v39   ;;  %v6367_v20 = vadd.f32 %v6366_v46, %v6311_v8  ;;  %v8558_v26 = vadd.f32 %v5373_v54, %v3036_v62  ;;  %v8474_v11 = vpop.f32.mrb[65].mxu0 }
 0x4a0   : > { %v5376_v1 = vpop.f32.mrb[66].mxu0  ;;  %v5782_v11 = vpop.permute.xlu0 %5781 }
 0x4a1   : > { %v5906_v40 = vmul.f32 %v8558_v26, %v5752_v5  ;;  %v8559_v14 = vadd.f32 %v5376_v1, %v3039_v0  ;;  %v8475_v4 = vpop.f32.mrb[67].mxu0 }
 0x4a2   : > { %v5787_v4 = vpop.permute.xlu1 %5786 }
 0x4a3   : > { %v6248_v53 = vadd.f32 %v6247_v29, %v5906_v40  ;;  %v6312_v61 = vmul.f32 %v5906_v40, %v5906_v40  ;;  %v5907_v63 = vmul.f32 %v8559_v14, %v5757_v7  ;;  %v3044_v13 = vpop.f32.mrb[68].mxu1 }
 0x4a4   : > { %v8006_v2 = vpop.f32.mrb[69].mxu1 }
 0x4a5   : > { %v6368_v27 = vadd.f32 %v6367_v20, %v6312_v61  ;;  %v7108_v59 = vpack.c.bf16 %v5907_v63, %v5906_v40  ;;  %v6249_v28 = vadd.f32 %v6248_v53, %v5907_v63  ;;  %v6313_v3 = vmul.f32 %v5907_v63, %v5907_v63  ;;  %v3047_v45 = vpop.f32.mrb[70].mxu1 }
 0x4a6   : > { %v8007_v58 = vpop.f32.mrb[71].mxu1  ;;  %v5381_v42 = vpop.f32.mrb[68].mxu0 }
 0x4a7   : > { %7180 = vst [vmem:[%s11855_s29 + $0x80] sm:$0xff] %v7108_v59   ;;  %v6369_v32 = vadd.f32 %v6368_v27, %v6313_v3  ;;  %v8560_v44 = vadd.f32 %v5381_v42, %v3044_v13  ;;  %v8478_v50 = vpop.f32.mrb[69].mxu0 }
 0x4a8   : > { %v5384_v51 = vpop.f32.mrb[70].mxu0  ;;  %v5792_v50 = vpop.permute.xlu0 %5791 }
 0x4a9   : > { %v5908_v35 = vmul.f32 %v8560_v44, %v5762_v17  ;;  %v8561_v52 = vadd.f32 %v5384_v51, %v3047_v45  ;;  %v8479_v48 = vpop.f32.mrb[71].mxu0 }
 0x4aa   : > { %v5797_v48 = vpop.permute.xlu1 %5796 }
 0x4ab   : > { %v6250_v38 = vadd.f32 %v6249_v28, %v5908_v35  ;;  %v6314_v9 = vmul.f32 %v5908_v35, %v5908_v35  ;;  %v5909_v25 = vmul.f32 %v8561_v52, %v5767_v18  ;;  %v3052_v43 = vpop.f32.mrb[72].mxu1 }
 0x4ac   : > { %v8010_v47 = vpop.f32.mrb[73].mxu1 }
 0x4ad   : > { %v6370_v19 = vadd.f32 %v6369_v32, %v6314_v9  ;;  %v7113_v24 = vpack.c.bf16 %v5909_v25, %v5908_v35  ;;  %v6251_v57 = vadd.f32 %v6250_v38, %v5909_v25  ;;  %v6315_v12 = vmul.f32 %v5909_v25, %v5909_v25  ;;  %v3055_v34 = vpop.f32.mrb[74].mxu1 }
 0x4ae   : > { %v8011_v60 = vpop.f32.mrb[75].mxu1  ;;  %v5389_v22 = vpop.f32.mrb[72].mxu0 }
 0x4af   : > { %7181 = vst [vmem:[%s11855_s29 + $0x88] sm:$0xff] %v7113_v24   ;;  %v6371_v23 = vadd.f32 %v6370_v19, %v6315_v12  ;;  %v8562_v6 = vadd.f32 %v5389_v22, %v3052_v43  ;;  %v8482_v16 = vpop.f32.mrb[73].mxu0 }
 0x4b0   : > { %v5392_v55 = vpop.f32.mrb[74].mxu0  ;;  %v5802_v16 = vpop.permute.xlu0 %5801 }
 0x4b1   : > { %v5910_v21 = vmul.f32 %v8562_v6, %v5772_v41  ;;  %v8563_v56 = vadd.f32 %v5392_v55, %v3055_v34  ;;  %v8483_v30 = vpop.f32.mrb[75].mxu0 }
 0x4b2   : > { %v5807_v30 = vpop.permute.xlu1 %5806 }
 0x4b3   : > { %v6252_v49 = vadd.f32 %v6251_v57, %v5910_v21  ;;  %v6316_v31 = vmul.f32 %v5910_v21, %v5910_v21  ;;  %v5911_v37 = vmul.f32 %v8563_v56, %v5777_v15  ;;  %v3060_v10 = vpop.f32.mrb[76].mxu1 }
 0x4b4   : > { %v8014_v62 = vpop.f32.mrb[77].mxu1 }
 0x4b5   : > { %v6372_v33 = vadd.f32 %v6371_v23, %v6316_v31  ;;  %v7118_v46 = vpack.c.bf16 %v5911_v37, %v5910_v21  ;;  %v6253_v39 = vadd.f32 %v6252_v49, %v5911_v37  ;;  %v6317_v29 = vmul.f32 %v5911_v37, %v5911_v37  ;;  %v3063_v8 = vpop.f32.mrb[78].mxu1 }
 0x4b6   : > { %v8015_v0 = vpop.f32.mrb[79].mxu1  ;;  %v5397_v36 = vpop.f32.mrb[76].mxu0 }
 0x4b7   : > { %7182 = vst [vmem:[%s11855_s29 + $0x90] sm:$0xff] %v7118_v46   ;;  %v6373_v54 = vadd.f32 %v6372_v33, %v6317_v29  ;;  %v8564_v20 = vadd.f32 %v5397_v36, %v3060_v10  ;;  %v8486_v26 = vpop.f32.mrb[77].mxu0 }
 0x4b8   : > { %v5400_v5 = vpop.f32.mrb[78].mxu0  ;;  %v5812_v26 = vpop.permute.xlu0 %5811 }
 0x4b9   : > { %v5912_v1 = vmul.f32 %v8564_v20, %v5782_v11  ;;  %v8565_v40 = vadd.f32 %v5400_v5, %v3063_v8  ;;  %v8487_v14 = vpop.f32.mrb[79].mxu0 }
 0x4ba   : > { %v5817_v14 = vpop.permute.xlu1 %5816 }
 0x4bb   : > { %v6254_v7 = vadd.f32 %v6253_v39, %v5912_v1  ;;  %v6318_v53 = vmul.f32 %v5912_v1, %v5912_v1  ;;  %v5913_v61 = vmul.f32 %v8565_v40, %v5787_v4  ;;  %v3068_v63 = vpop.f32.mrb[80].mxu1 }
 0x4bc   : > { %v8018_v13 = vpop.f32.mrb[81].mxu1 }
 0x4bd   : > { %v6374_v2 = vadd.f32 %v6373_v54, %v6318_v53  ;;  %v7123_v27 = vpack.c.bf16 %v5913_v61, %v5912_v1  ;;  %v6255_v59 = vadd.f32 %v6254_v7, %v5913_v61  ;;  %v6319_v28 = vmul.f32 %v5913_v61, %v5913_v61  ;;  %v3071_v3 = vpop.f32.mrb[82].mxu1 }
 0x4be   : > { %v8019_v45 = vpop.f32.mrb[83].mxu1  ;;  %v5405_v58 = vpop.f32.mrb[80].mxu0 }
 0x4bf   : > { %7183 = vst [vmem:[%s11855_s29 + $0x98] sm:$0xff] %v7123_v27   ;;  %v6375_v42 = vadd.f32 %v6374_v2, %v6319_v28  ;;  %v8566_v32 = vadd.f32 %v5405_v58, %v3068_v63  ;;  %v8490_v44 = vpop.f32.mrb[81].mxu0 }
 0x4c0   : > { %v5408_v17 = vpop.f32.mrb[82].mxu0  ;;  %v5822_v44 = vpop.permute.xlu0 %5821 }
 0x4c1   : > { %v5914_v51 = vmul.f32 %v8566_v32, %v5792_v50  ;;  %v8567_v35 = vadd.f32 %v5408_v17, %v3071_v3  ;;  %v8491_v52 = vpop.f32.mrb[83].mxu0 }
 0x4c2   : > { %v5827_v52 = vpop.permute.xlu1 %5826 }
 0x4c3   : > { %v6256_v18 = vadd.f32 %v6255_v59, %v5914_v51  ;;  %v6320_v38 = vmul.f32 %v5914_v51, %v5914_v51  ;;  %v5915_v9 = vmul.f32 %v8567_v35, %v5797_v48  ;;  %v3076_v25 = vpop.f32.mrb[84].mxu1 }
 0x4c4   : > { %v8022_v43 = vpop.f32.mrb[85].mxu1 }
 0x4c5   : > { %v6376_v47 = vadd.f32 %v6375_v42, %v6320_v38  ;;  %v7128_v19 = vpack.c.bf16 %v5915_v9, %v5914_v51  ;;  %v6257_v24 = vadd.f32 %v6256_v18, %v5915_v9  ;;  %v6321_v57 = vmul.f32 %v5915_v9, %v5915_v9  ;;  %v3079_v12 = vpop.f32.mrb[86].mxu1 }
 0x4c6   : > { %v8023_v34 = vpop.f32.mrb[87].mxu1  ;;  %v5413_v60 = vpop.f32.mrb[84].mxu0 }
 0x4c7   : > { %7184 = vst [vmem:[%s11855_s29 + $0xa0] sm:$0xff] %v7128_v19   ;;  %v6377_v22 = vadd.f32 %v6376_v47, %v6321_v57  ;;  %v8568_v23 = vadd.f32 %v5413_v60, %v3076_v25  ;;  %v8494_v6 = vpop.f32.mrb[85].mxu0 }
 0x4c8   : > { %v5416_v41 = vpop.f32.mrb[86].mxu0  ;;  %v5832_v6 = vpop.permute.xlu0 %5831 }
 0x4c9   : > { %v5916_v55 = vmul.f32 %v8568_v23, %v5802_v16  ;;  %v8569_v21 = vadd.f32 %v5416_v41, %v3079_v12  ;;  %v8495_v56 = vpop.f32.mrb[87].mxu0 }
 0x4ca   : > { %v5837_v56 = vpop.permute.xlu1 %5836 }
 0x4cb   : > { %v6258_v15 = vadd.f32 %v6257_v24, %v5916_v55  ;;  %v6322_v49 = vmul.f32 %v5916_v55, %v5916_v55  ;;  %v5917_v31 = vmul.f32 %v8569_v21, %v5807_v30  ;;  %v3084_v37 = vpop.f32.mrb[88].mxu1 }
 0x4cc   : > { %v8026_v10 = vpop.f32.mrb[89].mxu1 }
 0x4cd   : > { %v6378_v62 = vadd.f32 %v6377_v22, %v6322_v49  ;;  %v7133_v33 = vpack.c.bf16 %v5917_v31, %v5916_v55  ;;  %v6259_v46 = vadd.f32 %v6258_v15, %v5917_v31  ;;  %v6323_v39 = vmul.f32 %v5917_v31, %v5917_v31  ;;  %v3087_v29 = vpop.f32.mrb[90].mxu1 }
 0x4ce   : > { %v8027_v8 = vpop.f32.mrb[91].mxu1  ;;  %v5421_v0 = vpop.f32.mrb[88].mxu0 }
 0x4cf   : > { %7185 = vst [vmem:[%s11855_s29 + $0xa8] sm:$0xff] %v7133_v33   ;;  %v6379_v36 = vadd.f32 %v6378_v62, %v6323_v39  ;;  %v8570_v54 = vadd.f32 %v5421_v0, %v3084_v37  ;;  %v8498_v20 = vpop.f32.mrb[89].mxu0 }
 0x4d0   : > { %v5424_v11 = vpop.f32.mrb[90].mxu0  ;;  %v5842_v20 = vpop.permute.xlu0 %5841 }
 0x4d1   : > { %v5918_v5 = vmul.f32 %v8570_v54, %v5812_v26  ;;  %v8571_v1 = vadd.f32 %v5424_v11, %v3087_v29  ;;  %v8499_v40 = vpop.f32.mrb[91].mxu0 }
 0x4d2   : > { %v5847_v40 = vpop.permute.xlu1 %5846 }
 0x4d3   : > { %v6260_v4 = vadd.f32 %v6259_v46, %v5918_v5  ;;  %v6324_v7 = vmul.f32 %v5918_v5, %v5918_v5  ;;  %v5919_v53 = vmul.f32 %v8571_v1, %v5817_v14  ;;  %v3092_v61 = vpop.f32.mrb[92].mxu1 }
 0x4d4   : > { %v8030_v63 = vpop.f32.mrb[93].mxu1 }
 0x4d5   : > { %v6380_v13 = vadd.f32 %v6379_v36, %v6324_v7  ;;  %v7138_v2 = vpack.c.bf16 %v5919_v53, %v5918_v5  ;;  %v6261_v27 = vadd.f32 %v6260_v4, %v5919_v53  ;;  %v6325_v59 = vmul.f32 %v5919_v53, %v5919_v53  ;;  %v3095_v28 = vpop.f32.mrb[94].mxu1 }
 0x4d6   : > { %v8031_v3 = vpop.f32.mrb[95].mxu1  ;;  %v5429_v45 = vpop.f32.mrb[92].mxu0 }
 0x4d7   : > { %7186 = vst [vmem:[%s11855_s29 + $0xb0] sm:$0xff] %v7138_v2   ;;  %v6381_v58 = vadd.f32 %v6380_v13, %v6325_v59  ;;  %v8572_v42 = vadd.f32 %v5429_v45, %v3092_v61  ;;  %v8502_v32 = vpop.f32.mrb[93].mxu0 }
 0x4d8   : > { %v5432_v50 = vpop.f32.mrb[94].mxu0  ;;  %v5852_v32 = vpop.permute.xlu0 %5851 }
 0x4d9   : > { %v5920_v17 = vmul.f32 %v8572_v42, %v5822_v44  ;;  %v8573_v51 = vadd.f32 %v5432_v50, %v3095_v28  ;;  %v8503_v35 = vpop.f32.mrb[95].mxu0 }
 0x4da   : > { %v5857_v35 = vpop.permute.xlu1 %5856 }
 0x4db   : > { %v6262_v48 = vadd.f32 %v6261_v27, %v5920_v17  ;;  %v6326_v18 = vmul.f32 %v5920_v17, %v5920_v17  ;;  %v5921_v38 = vmul.f32 %v8573_v51, %v5827_v52  ;;  %v3100_v9 = vpop.f32.mrb[96].mxu1 }
 0x4dc   : > { %v8034_v25 = vpop.f32.mrb[97].mxu1 }
 0x4dd   : > { %v6382_v43 = vadd.f32 %v6381_v58, %v6326_v18  ;;  %v7143_v47 = vpack.c.bf16 %v5921_v38, %v5920_v17  ;;  %v6263_v19 = vadd.f32 %v6262_v48, %v5921_v38  ;;  %v6327_v24 = vmul.f32 %v5921_v38, %v5921_v38  ;;  %v3103_v57 = vpop.f32.mrb[98].mxu1 }
 0x4de   : > { %v8035_v12 = vpop.f32.mrb[99].mxu1  ;;  %v5437_v34 = vpop.f32.mrb[96].mxu0 }
 0x4df   : > { %7187 = vst [vmem:[%s11855_s29 + $0xb8] sm:$0xff] %v7143_v47   ;;  %v6383_v60 = vadd.f32 %v6382_v43, %v6327_v24  ;;  %v8574_v22 = vadd.f32 %v5437_v34, %v3100_v9  ;;  %v8506_v23 = vpop.f32.mrb[97].mxu0 }
 0x4e0   : > { %v5440_v16 = vpop.f32.mrb[98].mxu0  ;;  %v5862_v23 = vpop.permute.xlu0 %5861 }
 0x4e1   : > { %v5922_v41 = vmul.f32 %v8574_v22, %v5832_v6  ;;  %v8575_v55 = vadd.f32 %v5440_v16, %v3103_v57  ;;  %v8507_v21 = vpop.f32.mrb[99].mxu0 }
 0x4e2   : > { %v5867_v21 = vpop.permute.xlu1 %5866 }
 0x4e3   : > { %v6264_v30 = vadd.f32 %v6263_v19, %v5922_v41  ;;  %v6328_v15 = vmul.f32 %v5922_v41, %v5922_v41  ;;  %v5923_v49 = vmul.f32 %v8575_v55, %v5837_v56  ;;  %v3108_v31 = vpop.f32.mrb[100].mxu1 }
 0x4e4   : > { %v8038_v37 = vpop.f32.mrb[101].mxu1 }
 0x4e5   : > { %v6384_v10 = vadd.f32 %v6383_v60, %v6328_v15  ;;  %v7148_v62 = vpack.c.bf16 %v5923_v49, %v5922_v41  ;;  %v6265_v33 = vadd.f32 %v6264_v30, %v5923_v49  ;;  %v6329_v46 = vmul.f32 %v5923_v49, %v5923_v49  ;;  %v3111_v39 = vpop.f32.mrb[102].mxu1 }
 0x4e6   : > { %v8039_v29 = vpop.f32.mrb[103].mxu1  ;;  %v5445_v8 = vpop.f32.mrb[100].mxu0 }
 0x4e7   : > { %7188 = vst [vmem:[%s11855_s29 + $0xc0] sm:$0xff] %v7148_v62   ;;  %v6385_v0 = vadd.f32 %v6384_v10, %v6329_v46  ;;  %v8576_v36 = vadd.f32 %v5445_v8, %v3108_v31  ;;  %v8510_v54 = vpop.f32.mrb[101].mxu0 }
 0x4e8   : > { %v5448_v26 = vpop.f32.mrb[102].mxu0  ;;  %v5872_v54 = vpop.permute.xlu0 %5871 }
 0x4e9   : > { %v5924_v11 = vmul.f32 %v8576_v36, %v5842_v20  ;;  %v8577_v5 = vadd.f32 %v5448_v26, %v3111_v39  ;;  %v8511_v1 = vpop.f32.mrb[103].mxu0 }
 0x4eb   : > { %v6266_v14 = vadd.f32 %v6265_v33, %v5924_v11  ;;  %v6330_v4 = vmul.f32 %v5924_v11, %v5924_v11  ;;  %v5925_v7 = vmul.f32 %v8577_v5, %v5847_v40  ;;  %v3116_v53 = vpop.f32.mrb[104].mxu1 }
 0x4ec   : > { %v8042_v61 = vpop.f32.mrb[105].mxu1 }
 0x4ed   : > { %v6386_v63 = vadd.f32 %v6385_v0, %v6330_v4  ;;  %v7153_v13 = vpack.c.bf16 %v5925_v7, %v5924_v11  ;;  %v6267_v2 = vadd.f32 %v6266_v14, %v5925_v7  ;;  %v6331_v27 = vmul.f32 %v5925_v7, %v5925_v7  ;;  %v3119_v59 = vpop.f32.mrb[106].mxu1 }
 0x4ee   : > { %v8043_v28 = vpop.f32.mrb[107].mxu1  ;;  %v5453_v3 = vpop.f32.mrb[104].mxu0 }
 0x4ef   : > { %7189 = vst [vmem:[%s11855_s29 + $0xc8] sm:$0xff] %v7153_v13   ;;  %v6387_v45 = vadd.f32 %v6386_v63, %v6331_v27  ;;  %v8578_v58 = vadd.f32 %v5453_v3, %v3116_v53  ;;  %v8514_v42 = vpop.f32.mrb[105].mxu0 }
 0x4f0   : > { %v5456_v44 = vpop.f32.mrb[106].mxu0 }
 0x4f1   : > { %v5926_v50 = vmul.f32 %v8578_v58, %v5852_v32  ;;  %v8579_v17 = vadd.f32 %v5456_v44, %v3119_v59  ;;  %v8515_v51 = vpop.f32.mrb[107].mxu0 }
 0x4f3   : > { %v6268_v52 = vadd.f32 %v6267_v2, %v5926_v50  ;;  %v6332_v48 = vmul.f32 %v5926_v50, %v5926_v50  ;;  %v5927_v18 = vmul.f32 %v8579_v17, %v5857_v35  ;;  %v3124_v38 = vpop.f32.mrb[108].mxu1 }
 0x4f4   : > { %v8046_v9 = vpop.f32.mrb[109].mxu1 }
 0x4f5   : > { %v6388_v25 = vadd.f32 %v6387_v45, %v6332_v48  ;;  %v7158_v43 = vpack.c.bf16 %v5927_v18, %v5926_v50  ;;  %v6269_v47 = vadd.f32 %v6268_v52, %v5927_v18  ;;  %v6333_v19 = vmul.f32 %v5927_v18, %v5927_v18  ;;  %v3127_v24 = vpop.f32.mrb[110].mxu1 }
 0x4f6   : > { %v8047_v57 = vpop.f32.mrb[111].mxu1  ;;  %v5461_v12 = vpop.f32.mrb[108].mxu0 }
 0x4f7   : > { %7190 = vst [vmem:[%s11855_s29 + $0xd0] sm:$0xff] %v7158_v43   ;;  %v6389_v34 = vadd.f32 %v6388_v25, %v6333_v19  ;;  %v8580_v60 = vadd.f32 %v5461_v12, %v3124_v38  ;;  %v8518_v22 = vpop.f32.mrb[109].mxu0 }
 0x4f8   : > { %v5464_v6 = vpop.f32.mrb[110].mxu0 }
 0x4f9   : > { %v5928_v16 = vmul.f32 %v8580_v60, %v5862_v23  ;;  %v8581_v41 = vadd.f32 %v5464_v6, %v3127_v24  ;;  %v8519_v55 = vpop.f32.mrb[111].mxu0 }
 0x4fb   : > { %v6270_v56 = vadd.f32 %v6269_v47, %v5928_v16  ;;  %v6334_v30 = vmul.f32 %v5928_v16, %v5928_v16  ;;  %v5929_v15 = vmul.f32 %v8581_v41, %v5867_v21  ;;  %v3132_v49 = vpop.f32.mrb[112].mxu1 }
 0x4fc   : > { %v8050_v31 = vpop.f32.mrb[113].mxu1 }
 0x4fd   : > { %v6390_v37 = vadd.f32 %v6389_v34, %v6334_v30  ;;  %v7163_v10 = vpack.c.bf16 %v5929_v15, %v5928_v16  ;;  %v6271_v62 = vadd.f32 %v6270_v56, %v5929_v15  ;;  %v6335_v33 = vmul.f32 %v5929_v15, %v5929_v15  ;;  %v3135_v46 = vpop.f32.mrb[114].mxu1 }
 0x4fe   : > { %v8051_v39 = vpop.f32.mrb[115].mxu1  ;;  %v5469_v29 = vpop.f32.mrb[112].mxu0 }
 0x4ff   : > { %7191 = vst [vmem:[%s11855_s29 + $0xd8] sm:$0xff] %v7163_v10   ;;  %v6391_v8 = vadd.f32 %v6390_v37, %v6335_v33  ;;  %v8582_v0 = vadd.f32 %v5469_v29, %v3132_v49  ;;  %v8522_v36 = vpop.f32.mrb[113].mxu0 }
 0x500   : > { %v5472_v20 = vpop.f32.mrb[114].mxu0 }
 0x501   : > { %v5930_v26 = vmul.f32 %v8582_v0, %v5872_v54  ;;  %v8523_v11 = vpop.f32.mrb[115].mxu0 }
 0x503   : > { %v7024_v5 = vpack.c.bf16 %v5930_v26, %v5930_v26  ;;  %v6272_v1 = vadd.f32 %v6271_v62, %v5930_v26  ;;  %v6336_v40 = vmul.f32 %v5930_v26, %v5930_v26 }
 0x505   : > { %6216 = vst [vmem:[%s11855_s29 + $0xe0] sm:$0xf] %v7024_v5  ;;  %v6273_v14 = vrot.slane %v6272_v1, 4  ;;  %v6392_v4 = vadd.f32 %v6391_v8, %v6336_v40 }
 0x507   : > { %v6274_v7 = vadd.f32 %v6273_v14, %v6272_v1  ;;  %v6393_v53 = vrot.slane %v6392_v4, 4 }
 0x509   : > { %v6275_v61 = vrot.slane %v6274_v7, 2  ;;  %v6394_v63 = vadd.f32 %v6393_v53, %v6392_v4 }
 0x50b   : > { %v6276_v13 = vadd.f32 %v6275_v61, %v6274_v7  ;;  %v6395_v2 = vrot.slane %v6394_v63, 2 }
 0x50d   : > { %v6277_v27 = vrot.slane %v6276_v13, 1  ;;  %v6396_v59 = vadd.f32 %v6395_v2, %v6394_v63 }
 0x50f   : > { %v6278_v28 = vadd.f32 %v6277_v27, %v6276_v13  ;;  %v6397_v3 = vrot.slane %v6396_v59, 1 }
 0x511   : > { %6279 = vst [vmem:[%s244_s20] sm:$0x1] %v6278_v28  ;;  %v6398_v45 = vadd.f32 %v6397_v3, %v6396_v59 }
 0x513   : > { %6399 = vst [vmem:[%s244_s20 + $0x1] sm:$0x1] %v6398_v45 }
 0x514 PF: > { %s15_s17 = sadd.s32 1, %s9666_s17   ;;  %s12084_s15 = smov %s9662_s16 }
 0x515   : > { %p12_p6 = scmp.ge.s32.totalorder %s15_s17, 4   ;;  %s12085_s16 = smov %s12087_s18 }
 0x517   :  { %14 = sbr.rel (!%p12_p6) target bundleno = 2 (0x2), region = 82 }

</bundles_post_ra>
